<compile_context>
chip_gen: v7x
topology: tpu7x:2x2x1
jax: 0.10.0
libtpu: 0.0.40
codegen_flags: <defaults>
</compile_context>

<pallas_src>
import math

import jax
import jax.numpy as jnp
from jax.experimental import pallas as pl
from jax.experimental.pallas import tpu as pltpu

NUM_CLASSES = 100
OUT_PAD = 128       # lane-dense padded output width
D1 = 512            # m1 feature dim
D2 = 2048           # m2 feature dim
DH = 512            # hidden dim of self.weights


# -----------------------------------------------------------------------------
# Kernel
# -----------------------------------------------------------------------------
def weight_mlp_kernel(xflat_ref, p1_ref, p2_ref, w1a_ref, w1b_ref, b1_ref,
                      w2_ref, b2_ref, out_ref, acc1_ref, acc2_ref):
    # grid = (n_per_ch, 3): outer axis = spatial chunk, inner axis = channel.
    # p1's block index is constant across the inner axis -> fetched once per s.
    s = pl.program_id(0)
    c = pl.program_id(1)
    ns = pl.num_programs(0)
    nc = pl.num_programs(1)

    @pl.when((s == 0) & (c == 0))
    def _init():
        acc1_ref[...] = jnp.zeros_like(acc1_ref)
        acc2_ref[...] = jnp.zeros_like(acc2_ref)

    x_chunk = xflat_ref[...]                                      # (B, tk) bf16

    # transforms.Grayscale(): 0.2989 R + 0.5870 G + 0.1140 B (ITU-R 601-2).
    # The scalar channel coefficient commutes with the chunk matmul.
    coef = jnp.where(c == 0, 0.2989,
                     jnp.where(c == 1, 0.5870, 0.1140)).astype(jnp.float32)

    # Backbone stubs, K-accumulated in f32 VMEM scratch:
    #   out1 = m1(gray) -> (B, 512);   out2 = m2(x) -> (B, 2048)
    acc1_ref[...] += coef * jnp.dot(x_chunk, p1_ref[...],
                                    preferred_element_type=jnp.float32)
    acc2_ref[...] += jnp.dot(x_chunk, p2_ref[...],
                             preferred_element_type=jnp.float32)

    @pl.when((s == ns - 1) & (c == nc - 1))
    def _finalize():
        out1 = acc1_ref[...].astype(jnp.bfloat16)                 # (B, 512)
        out2 = acc2_ref[...].astype(jnp.bfloat16)                 # (B, 2048)
        # torch.cat((out1, out2), 1) @ W1.T + b1 == out1 @ W1a + out2 @ W1b + b1
        h = (jnp.dot(out1, w1a_ref[...], preferred_element_type=jnp.float32)
             + jnp.dot(out2, w1b_ref[...], preferred_element_type=jnp.float32)
             + b1_ref[...])                                       # (B, 512)
        out = (jnp.dot(h.astype(jnp.bfloat16), w2_ref[...],
                       preferred_element_type=jnp.float32)
               + b2_ref[...])                                     # (B, 128) padded
        out_ref[...] = out.astype(out_ref.dtype)


# -----------------------------------------------------------------------------
# Parameter prep (one-time, not per-call)
# -----------------------------------------------------------------------------
def _round_up(n, m):
    return -(-n // m) * m


def prepare_params(params):
    """Pad spatial dim to x128, transpose/split W1, transpose+pad W2, cast bf16."""
    p1, p2, w1, b1, w2, b2 = params
    hw = p1.shape[0]
    hw_pad = _round_up(hw, 128)
    if hw_pad != hw:
        # Zero rows contribute nothing to the accumulation -> exact.
        p1 = jnp.pad(p1, ((0, hw_pad - hw), (0, 0)))
        p2 = jnp.pad(p2.reshape(3, hw, D2),
                     ((0, 0), (0, hw_pad - hw), (0, 0))).reshape(3 * hw_pad, D2)
    w1_t = w1.T                                               # (2560, 512)
    w1a = w1_t[:D1, :].astype(jnp.bfloat16)                   # (512, 512)
    w1b = w1_t[D1:, :].astype(jnp.bfloat16)                   # (2048, 512)
    w2_pad = jnp.zeros((DH, OUT_PAD), jnp.bfloat16).at[:, :NUM_CLASSES].set(
        w2.T.astype(jnp.bfloat16))                            # (512, 128)
    b2_pad = jnp.zeros((1, OUT_PAD), jnp.float32).at[:, :NUM_CLASSES].set(
        b2.astype(jnp.float32))                               # (1, 128)
    return (p1.astype(jnp.bfloat16), p2.astype(jnp.bfloat16),
            w1a, w1b, b1.reshape(1, -1).astype(jnp.float32), w2_pad, b2_pad)


# -----------------------------------------------------------------------------
# VMEM budgeting / tile selection
# -----------------------------------------------------------------------------
def _padded_block_bytes(shape, dtype):
    s = list(shape)
    if len(s) >= 2:
        s[-2] = -(-s[-2] // 8) * 8
    s[-1] = -(-s[-1] // 128) * 128
    return math.prod(s) * jnp.dtype(dtype).itemsize


def _vmem_cap_bytes():
    """~75% of physical VMEM: 48 MiB on v7x (64 MiB), 96 MiB on v5e/v6e (128 MiB)."""
    phys = 64 << 20  # conservative default (v7x physical VMEM)
    try:
        info = pltpu.get_tpu_info()
        phys = int(getattr(info, "vmem_capacity_bytes", phys))
    except Exception:
        pass
    return min((phys * 3) // 4, 100 << 20)


def _vmem_needed_bytes(tk, B):
    """Double-buffered pipeline blocks + output + f32 accumulator scratch."""
    blocks = [((B, tk), jnp.bfloat16),        # xflat chunk
              ((tk, D1), jnp.bfloat16),       # p1 chunk
              ((tk, D2), jnp.bfloat16),       # p2 chunk
              ((DH, DH), jnp.bfloat16),       # w1a
              ((D2, DH), jnp.bfloat16),       # w1b
              ((1, DH), jnp.float32),         # b1
              ((DH, OUT_PAD), jnp.bfloat16),  # w2
              ((1, OUT_PAD), jnp.float32),    # b2
              ((B, OUT_PAD), jnp.float32)]    # out
    dbuf = 2 * sum(_padded_block_bytes(s, d) for s, d in blocks)
    scratch = (_padded_block_bytes((B, D1), jnp.float32)
               + _padded_block_bytes((B, D2), jnp.float32))
    return dbuf + scratch


def _pick_tk(hw_pad, B, vmem_cap):
    """Largest lane-aligned K tile dividing hw_pad that fits the VMEM budget."""
    cands = [t for t in (8192, 4096, 2048, 1024, 512, 256, 128) if hw_pad % t == 0]
    if not cands:
        cands = [hw_pad]
    for t in cands:
        if _vmem_needed_bytes(t, B) + (4 << 20) <= vmem_cap:
            return t
    return cands[-1]


# -----------------------------------------------------------------------------
# Forward wrapper
# -----------------------------------------------------------------------------
def weight_mlp_forward(x, prepped):
    """x: (B, 3, H, W) float32, NCHW. prepped: output of prepare_params()."""
    p1, p2, w1a, w1b, b1, w2p, b2p = prepped
    B, C, H, W = x.shape
    assert C == 3
    hw = H * W
    hw_pad = p1.shape[0]
    assert hw_pad >= hw and p2.shape[0] == C * hw_pad

    x3 = x.reshape(B, C, hw)
    if hw_pad != hw:
        x3 = jnp.pad(x3, ((0, 0), (0, 0), (0, hw_pad - hw)))
    xflat = x3.reshape(B, C * hw_pad).astype(jnp.bfloat16)

    vmem_cap = _vmem_cap_bytes()
    tk = _pick_tk(hw_pad, B, vmem_cap)
    n_per_ch = hw_pad // tk

    inputs = (xflat, p1, p2, w1a, w1b, b1, w2p, b2p)
    in_specs = [
        pl.BlockSpec((B, tk), lambda s, c: (0, c * n_per_ch + s)),   # x chunk
        pl.BlockSpec((tk, D1), lambda s, c: (s, 0)),                 # p1: resident across c
        pl.BlockSpec((tk, D2), lambda s, c: (c * n_per_ch + s, 0)),  # p2 chunk
        pl.BlockSpec((DH, DH), lambda s, c: (0, 0)),                 # w1a (resident)
        pl.BlockSpec((D2, DH), lambda s, c: (0, 0)),                 # w1b (resident)
        pl.BlockSpec((1, DH), lambda s, c: (0, 0)),                  # b1
        pl.BlockSpec((DH, OUT_PAD), lambda s, c: (0, 0)),            # w2 (padded)
        pl.BlockSpec((1, OUT_PAD), lambda s, c: (0, 0)),             # b2 (padded)
    ]
    out_spec = pl.BlockSpec((B, OUT_PAD), lambda s, c: (0, 0))
    scratch = [pltpu.VMEM((B, D1), jnp.float32),
               pltpu.VMEM((B, D2), jnp.float32)]

    # B-aware VMEM limit: never under-provision relative to the actual blocks.
    needed = _vmem_needed_bytes(tk, B)
    vmem_limit = int(max(vmem_cap, needed + (4 << 20)))

    flops = 2 * B * (C * hw_pad * (D1 + D2) + (D1 + D2) * DH + DH * OUT_PAD)
    bytes_accessed = int(sum(a.size * a.dtype.itemsize for a in inputs)
                         + B * OUT_PAD * 4)
    cost = pl.CostEstimate(flops=flops, transcendentals=0,
                           bytes_accessed=bytes_accessed)

    out_pad = pl.pallas_call(
        weight_mlp_kernel,
        out_shape=jax.ShapeDtypeStruct((B, OUT_PAD), jnp.float32),
        grid_spec=pltpu.PrefetchScalarGridSpec(
            num_scalar_prefetch=0,
            grid=(n_per_ch, C),            # channel innermost -> p1 streamed once
            in_specs=in_specs,
            out_specs=out_spec,
            scratch_shapes=scratch,
        ),
        compiler_params=pltpu.CompilerParams(
            dimension_semantics=("arbitrary", "arbitrary"),
            vmem_limit_bytes=vmem_limit,
        ),
        cost_estimate=cost,
    )(*inputs)

    return out_pad[:, :NUM_CLASSES]


# -----------------------------------------------------------------------------
# Deterministic params + pure-JAX reference
# -----------------------------------------------------------------------------
def make_params(key, HW):
    """Shapes from weightMLP.__init__ + backbone stubs."""
    ks = jax.random.split(key, 6)
    # backbone stubs: gray (HW) -> 512, rgb flat (3*HW) -> 2048
    p1 = jax.random.normal(ks[0], (HW, D1), jnp.float32) * (1.0 / jnp.sqrt(HW))
    p2 = jax.random.normal(ks[1], (3 * HW, D2), jnp.float32) * (1.0 / jnp.sqrt(3 * HW))
    # self.weights  = nn.Linear(512 + 2048, 512)
    w1 = jax.random.uniform(ks[2], (DH, D1 + D2), jnp.float32, -1.0, 1.0) / jnp.sqrt(2560.0)
    b1 = jax.random.uniform(ks[3], (DH,), jnp.float32, -1.0, 1.0) / jnp.sqrt(2560.0)
    # self.weights2 = nn.Linear(512, 100)
    w2 = jax.random.uniform(ks[4], (NUM_CLASSES, DH), jnp.float32, -1.0, 1.0) / jnp.sqrt(512.0)
    b2 = jax.random.uniform(ks[5], (NUM_CLASSES,), jnp.float32, -1.0, 1.0) / jnp.sqrt(512.0)
    return (p1, p2, w1, b1, w2, b2)


def ref_forward(x, params):
    """Pure-JAX f32 reference mirroring the PyTorch forward (with the same stubs)."""
    p1, p2, w1, b1, w2, b2 = params
    B = x.shape[0]
    gray = 0.2989 * x[:, 0] + 0.5870 * x[:, 1] + 0.1140 * x[:, 2]   # (B, H, W)
    out1 = gray.reshape(B, -1) @ p1                                  # m1 stub -> (B, 512)
    out2 = x.reshape(B, -1) @ p2                                     # m2 stub -> (B, 2048)
    out = jnp.concatenate((out1, out2), axis=1)                      # (B, 2560)
    out = out @ w1.T + b1                                            # (B, 512)
    out = out @ w2.T + b2                                            # (B, 100)
    return out


if __name__ == "__main__":
    key = jax.random.PRNGKey(0)
    kx, kp = jax.random.split(key)

    B, C, H, W = 2, 3, 16, 16
    x = jax.random.normal(kx, (B, C, H, W), jnp.float32)
    params = make_params(kp, H * W)

    prepped = prepare_params(params)          # one-time weight prep (bf16, transposed, padded)
    out = weight_mlp_forward(x, prepped)
    out = jax.block_until_ready(out)

    expected = ref_forward(x, params)
    assert out.shape == (B, NUM_CLASSES), out.shape
    # bf16 activation/weight streaming -> loosen tolerance vs the f32 reference.
    assert jnp.allclose(out, expected, rtol=5e-2, atol=5e-2), "mismatch vs reference"

    print("KERNEL_OK")
</pallas_src>

<mosaic_0001>
module attributes {stable_mosaic.version = 11 : i64} {
  func.func @weight_mlp_kernel(%arg0: i32, %arg1: i32, %arg2: memref<2x256xbf16, #tpu.memory_space<vmem>>, %arg3: memref<256x512xbf16, #tpu.memory_space<vmem>>, %arg4: memref<256x2048xbf16, #tpu.memory_space<vmem>>, %arg5: memref<512x512xbf16, #tpu.memory_space<vmem>>, %arg6: memref<2048x512xbf16, #tpu.memory_space<vmem>>, %arg7: memref<1x512xf32, #tpu.memory_space<vmem>>, %arg8: memref<512x128xbf16, #tpu.memory_space<vmem>>, %arg9: memref<1x128xf32, #tpu.memory_space<vmem>>, %arg10: memref<2x128xf32, #tpu.memory_space<vmem>>, %arg11: memref<2x512xf32, #tpu.memory_space<vmem>>, %arg12: memref<2x2048xf32, #tpu.memory_space<vmem>>) attributes {dimension_semantics = [#tpu.dimension_semantics<arbitrary>, #tpu.dimension_semantics<arbitrary>], iteration_bounds = array<i64: 1, 3>, scalar_prefetch = 0 : i64, scratch_operands = 2 : i64, tpu.core_type = #tpu.core_type<tc>, window_params = [{transform_indices = @transform_0, window_bounds = array<i64: 2, 256>}, {transform_indices = @transform_1, window_bounds = array<i64: 256, 512>}, {transform_indices = @transform_2, window_bounds = array<i64: 256, 2048>}, {pipeline_mode = #tpu.pipeline_mode<synchronous>, transform_indices = @transform_3, window_bounds = array<i64: 512, 512>}, {pipeline_mode = #tpu.pipeline_mode<synchronous>, transform_indices = @transform_4, window_bounds = array<i64: 2048, 512>}, {pipeline_mode = #tpu.pipeline_mode<synchronous>, transform_indices = @transform_5, window_bounds = array<i64: 1, 512>}, {pipeline_mode = #tpu.pipeline_mode<synchronous>, transform_indices = @transform_6, window_bounds = array<i64: 512, 128>}, {pipeline_mode = #tpu.pipeline_mode<synchronous>, transform_indices = @transform_7, window_bounds = array<i64: 1, 128>}, {pipeline_mode = #tpu.pipeline_mode<synchronous>, transform_indices = @transform_8, window_bounds = array<i64: 2, 128>}]} {
    %c0_i32 = arith.constant 0 : i32
    %0 = arith.cmpi eq, %arg0, %c0_i32 : i32
    %c0_i32_0 = arith.constant 0 : i32
    %1 = arith.cmpi eq, %arg1, %c0_i32_0 : i32
    %2 = arith.andi %0, %1 : i1
    %3 = arith.extui %2 : i1 to i32
    %c0_i32_1 = arith.constant 0 : i32
    %4 = arith.cmpi ne, %3, %c0_i32_1 : i32
    scf.if %4 {
      %cst_22 = arith.constant 0.000000e+00 : f32
      %27 = vector.broadcast %cst_22 : f32 to vector<2x512xf32>
      %c0_23 = arith.constant 0 : index
      %c0_24 = arith.constant 0 : index
      %28 = vector.load %arg11[%c0_23, %c0_24] : memref<2x512xf32, #tpu.memory_space<vmem>>, vector<2x512xf32>
      tpu.vector_store %arg11[%c0_23, %c0_24], %27 {strides = array<i32>} : memref<2x512xf32, #tpu.memory_space<vmem>>, vector<2x512xf32>,
      %cst_25 = arith.constant 0.000000e+00 : f32
      %29 = vector.broadcast %cst_25 : f32 to vector<2x2048xf32>
      %c0_26 = arith.constant 0 : index
      %c0_27 = arith.constant 0 : index
      %30 = vector.load %arg12[%c0_26, %c0_27] : memref<2x2048xf32, #tpu.memory_space<vmem>>, vector<2x2048xf32>
      tpu.vector_store %arg12[%c0_26, %c0_27], %29 {strides = array<i32>} : memref<2x2048xf32, #tpu.memory_space<vmem>>, vector<2x2048xf32>,
    } else {
    }
    %c0 = arith.constant 0 : index
    %c0_2 = arith.constant 0 : index
    %5 = vector.load %arg2[%c0, %c0_2] : memref<2x256xbf16, #tpu.memory_space<vmem>>, vector<2x256xbf16>
    %c0_i32_3 = arith.constant 0 : i32
    %6 = arith.cmpi eq, %arg1, %c0_i32_3 : i32
    %c1_i32 = arith.constant 1 : i32
    %7 = arith.cmpi eq, %arg1, %c1_i32 : i32
    %cst = arith.constant 5.870000e-01 : f32
    %cst_4 = arith.constant 1.140000e-01 : f32
    %8 = arith.select %7, %cst, %cst_4 : f32
    %cst_5 = arith.constant 2.989000e-01 : f32
    %9 = arith.select %6, %cst_5, %8 : f32
    %c0_6 = arith.constant 0 : index
    %c0_7 = arith.constant 0 : index
    %10 = vector.load %arg11[%c0_6, %c0_7] : memref<2x512xf32, #tpu.memory_space<vmem>>, vector<2x512xf32>
    %c0_8 = arith.constant 0 : index
    %c0_9 = arith.constant 0 : index
    %11 = vector.load %arg3[%c0_8, %c0_9] : memref<256x512xbf16, #tpu.memory_space<vmem>>, vector<256x512xbf16>
    %cst_10 = arith.constant dense<0.000000e+00> : vector<2x512xf32>
    %12 = tpu.matmul %5, %11, %cst_10 {dimension_numbers = #tpu.dot_dimension_numbers<[1], [0], [0], [1], [0, 0, 1, 1], [], []>} : vector<2x256xbf16>, vector<256x512xbf16>, vector<2x512xf32> -> vector<2x512xf32>
    %13 = vector.broadcast %9 : f32 to vector<2x512xf32>
    %14 = arith.mulf %13, %12 : vector<2x512xf32>
    %15 = arith.addf %10, %14 : vector<2x512xf32>
    %c0_11 = arith.constant 0 : index
    %c0_12 = arith.constant 0 : index
    %16 = vector.load %arg11[%c0_11, %c0_12] : memref<2x512xf32, #tpu.memory_space<vmem>>, vector<2x512xf32>
    tpu.vector_store %arg11[%c0_11, %c0_12], %15 {strides = array<i32>} : memref<2x512xf32, #tpu.memory_space<vmem>>, vector<2x512xf32>,
    %c0_13 = arith.constant 0 : index
    %c0_14 = arith.constant 0 : index
    %17 = vector.load %arg12[%c0_13, %c0_14] : memref<2x2048xf32, #tpu.memory_space<vmem>>, vector<2x2048xf32>
    %c0_15 = arith.constant 0 : index
    %c0_16 = arith.constant 0 : index
    %18 = vector.load %arg4[%c0_15, %c0_16] : memref<256x2048xbf16, #tpu.memory_space<vmem>>, vector<256x2048xbf16>
    %cst_17 = arith.constant dense<0.000000e+00> : vector<2x2048xf32>
    %19 = tpu.matmul %5, %18, %cst_17 {dimension_numbers = #tpu.dot_dimension_numbers<[1], [0], [0], [1], [0, 0, 1, 1], [], []>} : vector<2x256xbf16>, vector<256x2048xbf16>, vector<2x2048xf32> -> vector<2x2048xf32>
    %20 = arith.addf %17, %19 : vector<2x2048xf32>
    %c0_18 = arith.constant 0 : index
    %c0_19 = arith.constant 0 : index
    %21 = vector.load %arg12[%c0_18, %c0_19] : memref<2x2048xf32, #tpu.memory_space<vmem>>, vector<2x2048xf32>
    tpu.vector_store %arg12[%c0_18, %c0_19], %20 {strides = array<i32>} : memref<2x2048xf32, #tpu.memory_space<vmem>>, vector<2x2048xf32>,
    %c0_i32_20 = arith.constant 0 : i32
    %22 = arith.cmpi eq, %arg0, %c0_i32_20 : i32
    %c2_i32 = arith.constant 2 : i32
    %23 = arith.cmpi eq, %arg1, %c2_i32 : i32
    %24 = arith.andi %22, %23 : i1
    %25 = arith.extui %24 : i1 to i32
    %c0_i32_21 = arith.constant 0 : i32
    %26 = arith.cmpi ne, %25, %c0_i32_21 : i32
    scf.if %26 {
      %c0_22 = arith.constant 0 : index
      %c0_23 = arith.constant 0 : index
      %27 = vector.load %arg11[%c0_22, %c0_23] : memref<2x512xf32, #tpu.memory_space<vmem>>, vector<2x512xf32>
      %28 = arith.truncf %27 : vector<2x512xf32> to vector<2x512xbf16>
      %c0_24 = arith.constant 0 : index
      %c0_25 = arith.constant 0 : index
      %29 = vector.load %arg12[%c0_24, %c0_25] : memref<2x2048xf32, #tpu.memory_space<vmem>>, vector<2x2048xf32>
      %30 = arith.truncf %29 : vector<2x2048xf32> to vector<2x2048xbf16>
      %c0_26 = arith.constant 0 : index
      %c0_27 = arith.constant 0 : index
      %31 = vector.load %arg5[%c0_26, %c0_27] : memref<512x512xbf16, #tpu.memory_space<vmem>>, vector<512x512xbf16>
      %cst_28 = arith.constant dense<0.000000e+00> : vector<2x512xf32>
      %32 = tpu.matmul %28, %31, %cst_28 {dimension_numbers = #tpu.dot_dimension_numbers<[1], [0], [0], [1], [0, 0, 1, 1], [], []>} : vector<2x512xbf16>, vector<512x512xbf16>, vector<2x512xf32> -> vector<2x512xf32>
      %c0_29 = arith.constant 0 : index
      %c0_30 = arith.constant 0 : index
      %33 = vector.load %arg6[%c0_29, %c0_30] : memref<2048x512xbf16, #tpu.memory_space<vmem>>, vector<2048x512xbf16>
      %cst_31 = arith.constant dense<0.000000e+00> : vector<2x512xf32>
      %34 = tpu.matmul %30, %33, %cst_31 {dimension_numbers = #tpu.dot_dimension_numbers<[1], [0], [0], [1], [0, 0, 1, 1], [], []>} : vector<2x2048xbf16>, vector<2048x512xbf16>, vector<2x512xf32> -> vector<2x512xf32>
      %35 = arith.addf %32, %34 : vector<2x512xf32>
      %c0_32 = arith.constant 0 : index
      %c0_33 = arith.constant 0 : index
      %36 = vector.load %arg7[%c0_32, %c0_33] : memref<1x512xf32, #tpu.memory_space<vmem>>, vector<1x512xf32>
      %37 = vector.broadcast %36 : vector<1x512xf32> to vector<2x512xf32>
      %38 = arith.addf %35, %37 : vector<2x512xf32>
      %39 = arith.truncf %38 : vector<2x512xf32> to vector<2x512xbf16>
      %c0_34 = arith.constant 0 : index
      %c0_35 = arith.constant 0 : index
      %40 = vector.load %arg8[%c0_34, %c0_35] : memref<512x128xbf16, #tpu.memory_space<vmem>>, vector<512x128xbf16>
      %cst_36 = arith.constant dense<0.000000e+00> : vector<2x128xf32>
      %41 = tpu.matmul %39, %40, %cst_36 {dimension_numbers = #tpu.dot_dimension_numbers<[1], [0], [0], [1], [0, 0, 1, 1], [], []>} : vector<2x512xbf16>, vector<512x128xbf16>, vector<2x128xf32> -> vector<2x128xf32>
      %c0_37 = arith.constant 0 : index
      %c0_38 = arith.constant 0 : index
      %42 = vector.load %arg9[%c0_37, %c0_38] : memref<1x128xf32, #tpu.memory_space<vmem>>, vector<1x128xf32>
      %43 = vector.broadcast %42 : vector<1x128xf32> to vector<2x128xf32>
      %44 = arith.addf %41, %43 : vector<2x128xf32>
      %c0_39 = arith.constant 0 : index
      %c0_40 = arith.constant 0 : index
      %45 = vector.load %arg10[%c0_39, %c0_40] : memref<2x128xf32, #tpu.memory_space<vmem>>, vector<2x128xf32>
      tpu.vector_store %arg10[%c0_39, %c0_40], %44 {strides = array<i32>} : memref<2x128xf32, #tpu.memory_space<vmem>>, vector<2x128xf32>,
    } else {
    }
    return
  }
  func.func @transform_0(%arg0: i32, %arg1: i32) -> (i32, i32) {
    %c1_i32 = arith.constant 1 : i32
    %0 = arith.muli %arg1, %c1_i32 : i32
    %1 = arith.addi %0, %arg0 : i32
    %c0_i32 = arith.constant 0 : i32
    %c0_i32_0 = arith.constant 0 : i32
    return %c0_i32, %1 : i32, i32
  }
  func.func @transform_1(%arg0: i32, %arg1: i32) -> (i32, i32) {
    %c0_i32 = arith.constant 0 : i32
    %c0_i32_0 = arith.constant 0 : i32
    return %arg0, %c0_i32 : i32, i32
  }
  func.func @transform_2(%arg0: i32, %arg1: i32) -> (i32, i32) {
    %c1_i32 = arith.constant 1 : i32
    %0 = arith.muli %arg1, %c1_i32 : i32
    %1 = arith.addi %0, %arg0 : i32
    %c0_i32 = arith.constant 0 : i32
    %c0_i32_0 = arith.constant 0 : i32
    return %1, %c0_i32 : i32, i32
  }
  func.func @transform_3(%arg0: i32, %arg1: i32) -> (i32, i32) {
    %c0_i32 = arith.constant 0 : i32
    %c0_i32_0 = arith.constant 0 : i32
    %c0_i32_1 = arith.constant 0 : i32
    return %c0_i32, %c0_i32_0 : i32, i32
  }
  func.func @transform_4(%arg0: i32, %arg1: i32) -> (i32, i32) {
    %c0_i32 = arith.constant 0 : i32
    %c0_i32_0 = arith.constant 0 : i32
    %c0_i32_1 = arith.constant 0 : i32
    return %c0_i32, %c0_i32_0 : i32, i32
  }
  func.func @transform_5(%arg0: i32, %arg1: i32) -> (i32, i32) {
    %c0_i32 = arith.constant 0 : i32
    %c0_i32_0 = arith.constant 0 : i32
    %c0_i32_1 = arith.constant 0 : i32
    return %c0_i32, %c0_i32_0 : i32, i32
  }
  func.func @transform_6(%arg0: i32, %arg1: i32) -> (i32, i32) {
    %c0_i32 = arith.constant 0 : i32
    %c0_i32_0 = arith.constant 0 : i32
    %c0_i32_1 = arith.constant 0 : i32
    return %c0_i32, %c0_i32_0 : i32, i32
  }
  func.func @transform_7(%arg0: i32, %arg1: i32) -> (i32, i32) {
    %c0_i32 = arith.constant 0 : i32
    %c0_i32_0 = arith.constant 0 : i32
    %c0_i32_1 = arith.constant 0 : i32
    return %c0_i32, %c0_i32_0 : i32, i32
  }
  func.func @transform_8(%arg0: i32, %arg1: i32) -> (i32, i32) {
    %c0_i32 = arith.constant 0 : i32
    %c0_i32_0 = arith.constant 0 : i32
    %c0_i32_1 = arith.constant 0 : i32
    return %c0_i32, %c0_i32_0 : i32, i32
  }
}

</mosaic_0001>

<bundles_post_ra>
// kernel: tpu_custom_call.1
= control target key start
LH: loop header
LB: loop body
LE: loop exit
PB: predicated region body
PF: predicated region fallthrough
CT: control target
= control target key end

     0   :  { %s11836_s0 = inlined_call_operand.hbm [shape: bf16[2,768], index: 0, kind: input, shape index: {}]   ;;  %s11837_s1 = inlined_call_operand.hbm [shape: bf16[256,512], index: 1, kind: input, shape index: {}]   ;;  %s11838_s2 = inlined_call_operand.hbm [shape: bf16[768,2048], index: 2, kind: input, shape index: {}]   ;;  %s11839_s3 = inlined_call_operand.hbm [shape: bf16[512,512], index: 3, kind: input, shape index: {}]   ;;  %s11840_s4 = inlined_call_operand.hbm [shape: bf16[2048,512], index: 4, kind: input, shape index: {}]   ;;  %s11841_s5 = inlined_call_operand.hbm [shape: f32[1,512], index: 5, kind: input, shape index: {}]   ;;  %s11842_s6 = inlined_call_operand.hbm [shape: bf16[512,128], index: 6, kind: input, shape index: {}]   ;;  %s11843_s7 = inlined_call_operand.hbm [shape: f32[1,128], index: 7, kind: input, shape index: {}]   ;;  %s11844_s8 = inlined_call_operand.hbm [shape: f32[2,128], index: 8, kind: output, shape index: {}]  }
   0x1   :  { %11860 = sst [smem:[#allocation28_spill]] %s11836_s0 }
   0x2   :  { %11861 = sst [smem:[#allocation29_spill]] %s11837_s1 }
   0x3   :  { %11862 = sst [smem:[#allocation30_spill]] %s11840_s4 }
   0x4   :  { %11863 = sst [smem:[#allocation31_spill]] %s11842_s6 }
   0x5   :  { %11864 = sst [smem:[#allocation32_spill]] %s11844_s8 }
   0x6   :  { %13 = vsyncpa [#allocation5], 0 }
   0x7   :  { %15 = vsyncpa [#allocation5 + $0x1], 0 }
   0x8   :  { %16 = vsyncpa [#allocation8], 0 }
   0x9   :  { %17 = vsyncpa [#allocation12], 0 }
   0xa   :  { %18 = vsyncpa [#allocation15], 0 }
   0xb   :  { %19 = vsyncpa [#allocation6], 0  ;;  %s10980_s27 = smov 0   ;;  %s10982_s28 = smov 0  }
   0xc   :  { %s10984_s29 = smov 0   ;;  %s10986_s30 = smov 0  }
   0xd   :  { %s10988_s9 = smov 0   ;;  %s10990_s10 = smov 0  }
   0xe LB: > { %11865 = sst [smem:[#allocation25_spill]] %s10908_s30  ;;  %s11011_s11 = sadd.s32 4294967295, %s10916_s10   ;;  %s10916_s10 = sphi %s10990_s10, %s25_s10   ;;  %s10912_s9 = sphi %s10988_s9, %s11906_s9   ;;  %s10908_s30 = sphi %s10986_s30, %s11905_s30   ;;  %s10904_s29 = sphi %s10984_s29, %s11904_s29   ;;  %s10900_s28 = sphi %s10982_s28, %s11903_s28   ;;  %s10896_s27 = sphi %s10980_s27, %s11902_s27  }
   0xf   : > { %p8286_p0 = scmp.ge.s32.totalorder %s10916_s10, 1  ;;  %p11848_p1 = scmp.eq.s32.totalorder %s11011_s11, 0 }
  0x10   : > { %p250_p2 = scmp.lt.s32.totalorder %s10916_s10, 4  ;;  %s10918_s13 = smov [#allocation7]  }
  0x11   : > { %s266_s14 = sshll.u32 %s10918_s13, 4  ;;  %s10919_s16 = smov [#allocation11]   ;;  %s11020_s14 = int_to_ptr.vmem [resolvable:$true] %s266_s14 }
  0x12   : > { %p11016_p3 = pnand %p8286_p0, %p250_p2  ;;  %s292_s17 = sshll.u32 %s10919_s16, 4  ;;  %s11030_s17 = int_to_ptr.vmem [resolvable:$true] %s292_s17 }
  0x13   : > { %s10920_s18 = smov [#allocation14]   ;;  %s11868_s1 = sld [smem:[#allocation29_spill]] }
  0x14   : > { %s11866_s12 = scalar_select %p11016_p3, 1, 0 }
  0x15   : > { %p9391_p4 = pneg %p11016_p3  ;;  %s11032_s19 = sshll.u32 %s10920_s18, 4  ;;  %s317_s19 = int_to_ptr.vmem [resolvable:$true] %s11032_s19 }
  0x17   : > { %p11026_p5 = pnand %p9391_p4, %p11848_p1 }
  0x19   : > { %s11867_s15 = scalar_select %p11026_p5, 1, 0 }
  0x1a   : > { %s10588_s22 = scalar_lea.hbm %s11868_s1, 8192  ;;  %p11042_p7 = pneg %p11026_p5 }
  0x1b   : > { %p10589_p6 = scmp.ne.s32.totalorder %s11868_s1, %s10588_s22  ;;  %p10595_p10 = scmp.lt.u32.totalorder %s10588_s22, %s11868_s1 }
  0x1d   : > { %p10591_p8 = pnand %p11042_p7, %p10589_p6 }
  0x1f   : > { %p10592_p9 = pneg %p10591_p8 }
  0x21   : > { %p10597_p11 = pnand %p10595_p10, %p10592_p9 }
  0x23   : > { %10600 = shalt.err (!%p10597_p11)
}
  0x24   : > { %s10601_s16 = scalar_lea.vmem %s11020_s14, 8192  ;;  %p10609_p2 = scmp.lt.s32.totalorder %s11020_s14, %s11020_s14 }
  0x25   : > { %p10602_p12 = scmp.ne.s32.totalorder %s11020_s14, %s10601_s16  ;;  %p10610_p4 = scmp.lt.s32.totalorder %s10601_s16, %s10601_s16 }
  0x27   : > { %p10604_p13 = pnand %p10602_p12, %p11042_p7  ;;  %p10611_p6 = por %p10610_p4, %p10609_p2 }
  0x29   : > { %p10605_p0 = pneg %p10604_p13 }
  0x2b   : > { %p10612_p8 = pnand %p10611_p6, %p10605_p0 }
  0x2d   : > { %10615 = shalt.err (!%p10612_p8)
}
  0x2e   : > { %s11851_s18 = smov 256   ;;  %s11852_s20 = smov 16  }
  0x2f   : > { %9394 = dma.hbm_to_vmem [thread:$0]  (!%p11026_p5), %s11868_s1, 8192, %s11020_s14, [#allocation8], %s11851_s18, %s11851_s18, %s11852_s20  }
  0x30   : > { %s11870_s4 = sld [smem:[#allocation30_spill]] }
  0x36   : > { %s10616_s26 = scalar_lea.hbm %s11870_s4, 65536 }
  0x37   : > { %p10617_p9 = scmp.ne.s32.totalorder %s11870_s4, %s10616_s26  ;;  %p10623_p12 = scmp.lt.u32.totalorder %s10616_s26, %s11870_s4 }
  0x39   : > { %p10619_p10 = pnand %p10617_p9, %p11042_p7 }
  0x3b   : > { %p10620_p11 = pneg %p10619_p10 }
  0x3d   : > { %p10625_p13 = pnand %p10623_p12, %p10620_p11 }
  0x3f   : > { %10628 = shalt.err (!%p10625_p13)
}
  0x40   : > { %s10629_s14 = scalar_lea.vmem %s11030_s17, 65536  ;;  %p10637_p6 = scmp.lt.s32.totalorder %s11030_s17, %s11030_s17 }
  0x41   : > { %p10630_p0 = scmp.ne.s32.totalorder %s11030_s17, %s10629_s14  ;;  %p10638_p8 = scmp.lt.s32.totalorder %s10629_s14, %s10629_s14 }
  0x43   : > { %p10632_p2 = pnand %p10630_p0, %p11042_p7  ;;  %p10639_p9 = por %p10638_p8, %p10637_p6 }
  0x45   : > { %p10633_p4 = pneg %p10632_p2 }
  0x47   : > { %p10640_p10 = pnand %p10639_p9, %p10633_p4 }
  0x49   : > { %10643 = shalt.err (!%p10640_p10)
}
  0x4a   : > { %9400 = dma.hbm_to_vmem [thread:$0]  (!%p11026_p5), %s11870_s4, 65536, %s11030_s17, [#allocation12], %s11851_s18, %s11851_s18, %s11852_s20  }
  0x4b   : > { %s11871_s6 = sld [smem:[#allocation31_spill]] }
  0x51   : > { %s10644_s23 = scalar_lea.hbm %s11871_s6, 4096 }
  0x52   : > { %p10645_p11 = scmp.ne.s32.totalorder %s11871_s6, %s10644_s23  ;;  %p10651_p0 = scmp.lt.u32.totalorder %s10644_s23, %s11871_s6 }
  0x54   : > { %p10647_p12 = pnand %p10645_p11, %p11042_p7 }
  0x56   : > { %p10648_p13 = pneg %p10647_p12 }
  0x58   : > { %p10653_p2 = pnand %p10651_p0, %p10648_p13 }
  0x5a   : > { %10656 = shalt.err (!%p10653_p2)
}
  0x5b   : > { %s10657_s14 = scalar_lea.vmem %s317_s19, 4096  ;;  %p10665_p9 = scmp.lt.s32.totalorder %s317_s19, %s317_s19 }
  0x5c   : > { %p10658_p4 = scmp.ne.s32.totalorder %s317_s19, %s10657_s14  ;;  %p10666_p10 = scmp.lt.s32.totalorder %s10657_s14, %s10657_s14 }
  0x5e   : > { %p10660_p6 = pnand %p10658_p4, %p11042_p7  ;;  %p10667_p1 = por %p10666_p10, %p10665_p9 }
  0x60   : > { %p10661_p8 = pneg %p10660_p6 }
  0x62   : > { %p10668_p3 = pnand %p10667_p1, %p10661_p8 }
  0x64   : > { %10671 = shalt.err (!%p10668_p3)
}
  0x65   : > { %s11850_s17 = smov 64   ;;  %s10924_s8 = smov 4  }
  0x66   : > { %9406 = dma.hbm_to_vmem [thread:$0]  (!%p11026_p5), %s11871_s6, 4096, %s317_s19, [#allocation15], %s11850_s17, %s11850_s17, %s10924_s8  }
  0x67   : > { %s34_s22 = sadd.s32 1, %s10912_s9  ;;  %s46_s23 = sadd.s32 1, %s10904_s29 }
  0x68   : > { %p35_p1 = scmp.ge.s32.totalorder %s34_s22, 3  ;;  %p53_p3 = scmp.ne.s32.totalorder %s10904_s29, %s10900_s28 }
  0x69   : > { %p54_p11 = scmp.eq.s32.totalorder %s10916_s10, 0  ;;  %p59_p13 = scmp.ne.s32.totalorder %s10900_s28, %s10896_s27 }
  0x6a   : > { %s11908_s22 = smov (%p35_p1, %s34_s22), 0  ;;  %p9423_p0 = scmp.lt.s32.totalorder %s10916_s10, 3 }
  0x6b   : > { %11872 = sst [smem:[#allocation26_spill]] %s11908_s22  ;;  %p11120_p12 = por %p54_p11, %p53_p3 }
  0x6c   : > { %s43_s26 = ssub.s32 %s10912_s9, %s11908_s22  ;;  %p11874_p4 = scmp.eq.s32.totalorder %s11011_s11, 0 }
  0x6d   : > { %p44_p2 = scmp.eq.s32.totalorder %s43_s26, 0  ;;  %s341_s13 = sand.u32 1, %s10916_s10  }
  0x6e   : > { %p11131_p6 = por %p11874_p4, %p59_p13  ;;  %s343_s16 = sand.u32 1, %s10904_s29  }
  0x6f   : > { %s11138_s14 = scalar_select %p44_p2, %s10904_s29, %s46_s23  }
  0x70   : > { %s11875_s19 = scalar_select %p11131_p6, 1, 0 }
  0x71   : > { %11876 = sst [smem:[#allocation27_spill]] %s11138_s14  ;;  %s8294_s8 = sshll.u32 %s343_s16, 1 }
  0x72   : > { %s9310_s30 = sshll.u32 %s10912_s9, 5  ;;  %s11877_s0 = sld [smem:[#allocation28_spill]] }
  0x73   : > { %s345_s27 = scalar_lea.vmem [#allocation4], %s8294_s8  ;;  %p11150_p8 = pnand %p9423_p0, %p11120_p12 }
  0x74   : > { %s354_s26 = sshll.u32 %s345_s27, 4  ;;  %s11154_s23 = sshll.u32 %s343_s16, 11  ;;  %s11146_s26 = int_to_ptr.vmem [resolvable:$true] %s354_s26 }
  0x75   : > { %s11878_s20 = scalar_select %p11150_p8, 1, 0 }
  0x76   : > { %p11856_p10 = pneg %p11150_p8 }
  0x78   : > { %s11144_s18 = scalar_lea.hbm %s11877_s0, %s9310_s30  ;;  %s11157_s30 = scalar_lea.sflag [#allocation5], %s341_s13 }
  0x79   : > { %s10672_s21 = scalar_lea.hbm %s11144_s18, 32  ;;  %s10677_s27 = scalar_lea.hbm %s11877_s0, 96 }
  0x7a   : > { %p10673_p9 = scmp.ne.s32.totalorder %s11144_s18, %s10672_s21  ;;  %p10678_p11 = scmp.lt.u32.totalorder %s11144_s18, %s11877_s0 }
  0x7b   : > { %p10679_p12 = scmp.lt.u32.totalorder %s10677_s27, %s10672_s21  ;;  %p10681_p0 = scmp.lt.u32.totalorder %s10672_s21, %s11144_s18 }
  0x7c   : > { %p10675_p1 = pnand %p11856_p10, %p10673_p9 }
  0x7d   : > { %p10680_p13 = por %p10679_p12, %p10678_p11 }
  0x7e   : > { %p10676_p3 = pneg %p10675_p1 }
  0x7f   : > { %p10682_p2 = por %p10681_p0, %p10680_p13 }
  0x81   : > { %p10683_p4 = pnand %p10682_p2, %p10676_p3 }
  0x83   : > { %10686 = shalt.err (!%p10683_p4)
}
  0x84   : > { %s10687_s13 = scalar_lea.vmem %s11146_s26, 32  ;;  %s10925_s16 = smov [#allocation4]  }
  0x85   : > { %p10688_p9 = scmp.ne.s32.totalorder %s11146_s26, %s10687_s13  ;;  %s10692_s24 = sshll.u32 %s10925_s16, 4  ;;  %s10693_s24 = int_to_ptr.vmem [resolvable:$false] %s10692_s24 }
  0x86   : > { %s10694_s1 = scalar_lea.vmem %s10693_s24, 64  ;;  %p10695_p5 = scmp.lt.s32.totalorder %s11146_s26, %s10693_s24 }
  0x87   : > { %p10690_p1 = pnand %p10688_p9, %p11856_p10  ;;  %p10696_p11 = scmp.lt.s32.totalorder %s10694_s1, %s10687_s13 }
  0x89   : > { %p10691_p6 = pneg %p10690_p1  ;;  %p10697_p12 = por %p10696_p11, %p10695_p5 }
  0x8b   : > { %p10698_p13 = pnand %p10697_p12, %p10691_p6 }
  0x8d   : > { %10701 = shalt.err (!%p10698_p13)
}
  0x8e   : > { %9413 = dma.hbm_to_vmem [thread:$0]  (!%p11150_p8), %s11144_s18, 32, %s11146_s26, %s11157_s30  }
  0x8f   : > { %s365_s4 = scalar_lea.vmem [#allocation9], %s11154_s23  ;;  %s10926_s8 = smov [#allocation10]  }
  0x90   : > { %s374_s21 = sshll.u32 %s365_s4, 4  ;;  %s279_s27 = sshll.u32 %s10926_s8, 4  ;;  %s11186_s21 = int_to_ptr.vmem [resolvable:$true] %s374_s21  ;;  %s280_s27 = int_to_ptr.vmem [resolvable:$true] %s279_s27 }
  0x91   : > { %s10702_s24 = scalar_lea.hbm %s11839_s3, 16384 }
  0x92   : > { %p10703_p5 = scmp.ne.s32.totalorder %s11839_s3, %s10702_s24  ;;  %p10709_p0 = scmp.lt.u32.totalorder %s10702_s24, %s11839_s3 }
  0x94   : > { %p10705_p6 = pnand %p10703_p5, %p11042_p7 }
  0x96   : > { %p10706_p3 = pneg %p10705_p6 }
  0x98   : > { %p10711_p2 = pnand %p10709_p0, %p10706_p3 }
  0x9a   : > { %10714 = shalt.err (!%p10711_p2)
}
  0x9b   : > { %s10715_s26 = scalar_lea.vmem %s280_s27, 16384  ;;  %p10723_p11 = scmp.lt.s32.totalorder %s280_s27, %s280_s27 }
  0x9c   : > { %p10716_p4 = scmp.ne.s32.totalorder %s280_s27, %s10715_s26  ;;  %p10724_p12 = scmp.lt.s32.totalorder %s10715_s26, %s10715_s26 }
  0x9e   : > { %p10718_p9 = pnand %p10716_p4, %p11042_p7  ;;  %p10725_p13 = por %p10724_p12, %p10723_p11 }
  0xa0   : > { %p10719_p1 = pneg %p10718_p9 }
  0xa2   : > { %p10726_p10 = pnand %p10725_p13, %p10719_p1 }
  0xa4   : > { %10729 = shalt.err (!%p10726_p10)
}
  0xa5   : > { %p11879_p5 = scmp.ne.s32.totalorder %s11867_s15, 0  ;;  %s11880_s23 = smov 16  }
  0xa6   : > { %s11881_s17 = smov 256   ;;  %s10927_s8 = smov [#allocation13]  }
  0xa7   : > { %9397 = dma.hbm_to_vmem [thread:$0]  (!%p11879_p5), %s11839_s3, 16384, %s280_s27, [#allocation8], %s11881_s17, %s11881_s17, %s11880_s23  }
  0xa8   : > { %s306_s16 = sshll.u32 %s10927_s8, 4  ;;  %s10928_s13 = smov [#allocation16]   ;;  %s307_s16 = int_to_ptr.vmem [resolvable:$true] %s306_s16 }
  0xa9   : > { %s330_s24 = sshll.u32 %s10928_s13, 4  ;;  %s10730_s26 = scalar_lea.hbm %s11841_s5, 64  ;;  %s331_s24 = int_to_ptr.vmem [resolvable:$true] %s330_s24 }
  0xaa   : > { %p10731_p10 = scmp.ne.s32.totalorder %s11841_s5, %s10730_s26  ;;  %p10737_p0 = scmp.lt.u32.totalorder %s10730_s26, %s11841_s5 }
  0xac   : > { %p10733_p6 = pnand %p10731_p10, %p11042_p7 }
  0xae   : > { %p10734_p3 = pneg %p10733_p6 }
  0xb0   : > { %p10739_p2 = pnand %p10737_p0, %p10734_p3 }
  0xb2   : > { %10742 = shalt.err (!%p10739_p2)
}
  0xb3   : > { %s10743_s27 = scalar_lea.vmem %s307_s16, 64  ;;  %p10751_p11 = scmp.lt.s32.totalorder %s307_s16, %s307_s16 }
  0xb4   : > { %p10744_p4 = scmp.ne.s32.totalorder %s307_s16, %s10743_s27  ;;  %p10752_p12 = scmp.lt.s32.totalorder %s10743_s27, %s10743_s27 }
  0xb6   : > { %p10746_p9 = pnand %p10744_p4, %p11042_p7  ;;  %p10753_p13 = por %p10752_p12, %p10751_p11 }
  0xb8   : > { %p10747_p1 = pneg %p10746_p9 }
  0xba   : > { %p10754_p8 = pnand %p10753_p13, %p10747_p1 }
  0xbc   : > { %10757 = shalt.err (!%p10754_p8)
}
  0xbd   : > { %9403 = dma.hbm_to_vmem [thread:$0]  (!%p11879_p5), %s11841_s5, 64, %s307_s16, [#allocation12]  }
  0xbe   : > { %s11882_s14 = sshll.u32 %s10912_s9, 15  ;;  %s10758_s1 = scalar_lea.hbm %s11843_s7, 16 }
  0xbf   : > { %s11232_s4 = scalar_lea.hbm %s11838_s2, %s11882_s14  ;;  %p10759_p8 = scmp.ne.s32.totalorder %s11843_s7, %s10758_s1 }
  0xc0   : > { %p10765_p3 = scmp.lt.u32.totalorder %s10758_s1, %s11843_s7 }
  0xc1   : > { %p10761_p10 = pnand %p10759_p8, %p11042_p7 }
  0xc3   : > { %p10762_p6 = pneg %p10761_p10 }
  0xc5   : > { %p10767_p0 = pnand %p10765_p3, %p10762_p6 }
  0xc7   : > { %10770 = shalt.err (!%p10767_p0)
}
  0xc8   : > { %s10771_s27 = scalar_lea.vmem %s331_s24, 16  ;;  %s10778_s6 = scalar_lea.vmem %s331_s24, 32 }
  0xc9   : > { %p10772_p2 = scmp.ne.s32.totalorder %s331_s24, %s10771_s27  ;;  %p10779_p1 = scmp.lt.s32.totalorder %s331_s24, %s331_s24 }
  0xca   : > { %p10780_p11 = scmp.lt.s32.totalorder %s10778_s6, %s10771_s27 }
  0xcb   : > { %p10774_p4 = pnand %p10772_p2, %p11042_p7 }
  0xcc   : > { %p10781_p12 = por %p10780_p11, %p10779_p1 }
  0xcd   : > { %p10775_p9 = pneg %p10774_p4 }
  0xcf   : > { %p10782_p13 = pnand %p10781_p12, %p10775_p9 }
  0xd1   : > { %10785 = shalt.err (!%p10782_p13)
}
  0xd2   : > { %9409 = dma.hbm_to_vmem [thread:$0]  (!%p11879_p5), %s11843_s7, 16, %s331_s24, [#allocation15]  }
  0xd3   : > { %s10786_s25 = scalar_lea.hbm %s11232_s4, 32768  ;;  %p11883_p8 = scmp.ne.s32.totalorder %s11878_s20, 0 }
  0xd4   : > { %p10787_p7 = scmp.ne.s32.totalorder %s11232_s4, %s10786_s25  ;;  %s10791_s8 = scalar_lea.hbm %s11838_s2, 98304 }
  0xd5   : > { %p11884_p10 = pneg %p11883_p8  ;;  %p10792_p0 = scmp.lt.u32.totalorder %s11232_s4, %s11838_s2 }
  0xd6   : > { %p10793_p2 = scmp.lt.u32.totalorder %s10791_s8, %s10786_s25  ;;  %p10795_p9 = scmp.lt.u32.totalorder %s10786_s25, %s11232_s4 }
  0xd7   : > { %p10789_p6 = pnand %p10787_p7, %p11884_p10 }
  0xd8   : > { %p10794_p4 = por %p10793_p2, %p10792_p0 }
  0xd9   : > { %p10790_p3 = pneg %p10789_p6 }
  0xda   : > { %p10796_p1 = por %p10795_p9, %p10794_p4 }
  0xdc   : > { %p10797_p11 = pnand %p10796_p1, %p10790_p3 }
  0xde   : > { %10800 = shalt.err (!%p10797_p11)
}
  0xdf   : > { %s10801_s24 = scalar_lea.vmem %s11186_s21, 32768  ;;  %p11885_p12 = pmov %p11884_p10 }
  0xe0   : > { %p10802_p5 = scmp.ne.s32.totalorder %s11186_s21, %s10801_s24  ;;  %s10929_s1 = smov [#allocation9]  }
  0xe1   : > { %s10806_s18 = sshll.u32 %s10929_s1, 4  ;;  %s10807_s18 = int_to_ptr.vmem [resolvable:$false] %s10806_s18 }
  0xe2   : > { %p10804_p13 = pnand %p10802_p5, %p11885_p12  ;;  %s10808_s26 = scalar_lea.vmem %s10807_s18, 65536 }
  0xe3   : > { %p10809_p10 = scmp.lt.s32.totalorder %s11186_s21, %s10807_s18  ;;  %p10810_p6 = scmp.lt.s32.totalorder %s10808_s26, %s10801_s24 }
  0xe4   : > { %p10805_p7 = pneg %p10804_p13 }
  0xe5   : > { %p10811_p0 = por %p10810_p6, %p10809_p10 }
  0xe7   : > { %p10812_p2 = pnand %p10811_p0, %p10805_p7 }
  0xe9   : > { %10815 = shalt.err (!%p10812_p2)
}
  0xea   : > { %s10930_s0 = smov 1024   ;;  %s11886_s16 = smov 64  }
  0xeb   : > { %9416 = dma.hbm_to_vmem [thread:$0]  (!%p11883_p8), %s11232_s4, 32768, %s11186_s21, %s11157_s30, %s10930_s0, %s10930_s0, %s11886_s16  }
  0xec   : > { %p11887_p3 = scmp.ne.s32.totalorder %s11866_s12, 0 }
  0xed   : > { %s388_s27 = sand.u32 (!%p11887_p3), 1, %s11011_s11   ;;  %s390_s6 = sand.u32 (!%p11887_p3), 1, %s10900_s28  }
  0xee   : > { %386 = sbr.rel (%p11887_p3) target bundleno = 1877 (0x755), region = 52  ;;  %s11281_s22 = sshll.u32 (!%p11887_p3), %s390_s6, 1 }
  0xef   : > { %s389_s14 = scalar_lea.sflag (!%p11887_p3), [#allocation5], %s388_s27  ;;  %s392_s25 = scalar_lea.vmem (!%p11887_p3), [#allocation4], %s11281_s22 }
  0xf0   : > { %p11888_p4 = scmp.ne.s32.totalorder (!%p11887_p3), %s11875_s19, 0 }
  0xf5   : > { %10867 = dma.done.wait (%p11888_p4), %s389_s14, 32  }
  0xf6   : > { %10869 = vsyncadd (%p11888_p4), %s389_s14, 4294967264  ;;  %p11889_p8 = scmp.eq.s32.totalorder %s11011_s11, 0 }
  0xf8   : > { %10871 = dma.done.wait (%p11889_p8), [#allocation8], 8192   ;;  %p11890_p9 = pmov %p11889_p8 }
  0xf9   : > { %s8304_s12 = sshll.u32 %s390_s6, 11 }
  0xfa   : > { %10873 = vsyncadd (%p11890_p9), [#allocation8], 4294959104  ;;  %s11292_s20 = scalar_lea.vmem [#allocation9], %s8304_s12 }
  0xfb   : > { %10875 = dma.done.wait (%p11888_p4), %s389_s14, 32768  }
  0xfc   : > { %10877 = vsyncadd (%p11888_p4), %s389_s14, 4294934528  ;;  %p11891_p1 = pmov %p11889_p8 }
  0xfe   : > { %10879 = dma.done.wait (%p11891_p1), [#allocation8], 16384   ;;  %p11892_p11 = pmov %p11891_p1 }
  0xff   : > { %p11893_p5 = pmov %p11891_p1 }
 0x100   : > { %10881 = vsyncadd (%p11892_p11), [#allocation8], 4294950912 }
 0x101   : > { %10883 = dma.done.wait (%p11893_p5), [#allocation12], 65600   ;;  %p11894_p12 = pmov %p11891_p1 }
 0x102   : > { %p11895_p13 = pmov %p11891_p1 }
 0x103   : > { %10885 = vsyncadd (%p11894_p12), [#allocation12], 4294901696 }
 0x104   : > { %10887 = dma.done.wait (%p11895_p13), [#allocation15], 4112   ;;  %p11896_p7 = pmov %p11891_p1 }
 0x105   : > { %s11897_s19 = sld [smem:[#allocation25_spill]] }
 0x106   : > { %10889 = vsyncadd (%p11896_p7), [#allocation15], 4294963184 }
 0x10b   : > { %p465_p10 = scmp.eq.s32.totalorder %s11897_s19, 0 }
 0x10c   : > { %v10931_v0 = vmov (%p465_p10), 0.0  }
 0x10d   : > { %469 = sbr.rel (!%p465_p10) target bundleno = 276 (0x114), region = 88  ;;  %470 = vst [vmem:[#allocation2] sm:$0xff] (%p465_p10), %v10931_v0  ;;  %471 = vst [vmem:[#allocation3] sm:$0xff] (%p465_p10), %v10931_v0 }
 0x10e   : > { %472 = vst [vmem:[#allocation3 + $0x8] sm:$0xff] (%p465_p10), %v10931_v0  ;;  %473 = vst [vmem:[#allocation3 + $0x10] sm:$0xff] (%p465_p10), %v10931_v0 }
 0x10f   : > { %474 = vst [vmem:[#allocation3 + $0x18] sm:$0xff] (%p465_p10), %v10931_v0 }
 0x114 PF: > { %v9495_v1 = vld [vmem:[#allocation7 + $0x4] ss:$16 sps:$4 sm:$0xff]   ;;  %v9497_v2 = vld [vmem:[#allocation7 + $0xc] ss:$16 sps:$4 sm:$0xff]   ;;  %v9499_v3 = vld [vmem:[#allocation7] ss:$16 sps:$4 sm:$0xff]   ;;  %v556_v41 = vlaneseq }
 0x115   : > { %889 = vmatprep.subr.bf16.mxu0 %v9495_v1  ;;  %v9500_v4 = vld [vmem:[#allocation7 + $0x8] ss:$16 sps:$4 sm:$0xff]   ;;  %930 = vmatprep.subr.bf16.mxu1 %v9497_v2  ;;  %v9501_v5 = vld [vmem:[#allocation7 + $0x24] ss:$16 sps:$4 sm:$0xff]   ;;  %v9503_v6 = vld [vmem:[#allocation7 + $0x2c] ss:$16 sps:$4 sm:$0xff]  }
 0x116   : > { %890 = vmatpush1.bf16.msra.mxu0 %v9499_v3  ;;  %931 = vmatpush1.bf16.msra.mxu1 %v9500_v4  ;;  %v9505_v7 = vld [vmem:[#allocation7 + $0x20] ss:$16 sps:$4 sm:$0xff]   ;;  %v9506_v8 = vld [vmem:[#allocation7 + $0x28] ss:$16 sps:$4 sm:$0xff]   ;;  %v9507_v9 = vld [vmem:[#allocation7 + $0x44] ss:$16 sps:$4 sm:$0xff]  }
 0x117   : > { %891 = vmatprep.subr.bf16.mxu0 %v9501_v5  ;;  %932 = vmatprep.subr.bf16.mxu1 %v9503_v6  ;;  %v9509_v10 = vld [vmem:[#allocation7 + $0x4c] ss:$16 sps:$4 sm:$0xff]   ;;  %v9511_v11 = vld [vmem:[#allocation7 + $0x40] ss:$16 sps:$4 sm:$0xff]   ;;  %v9512_v12 = vld [vmem:[#allocation7 + $0x48] ss:$16 sps:$4 sm:$0xff]  }
 0x118   : > { %v9513_v13 = vld [vmem:[#allocation7 + $0x64] ss:$16 sps:$4 sm:$0xff]   ;;  %v9515_v14 = vld [vmem:[#allocation7 + $0x6c] ss:$16 sps:$4 sm:$0xff]   ;;  %v9517_v15 = vld [vmem:[#allocation7 + $0x60] ss:$16 sps:$4 sm:$0xff]  }
 0x119   : > { %v9518_v16 = vld [vmem:[#allocation7 + $0x68] ss:$16 sps:$4 sm:$0xff]   ;;  %v9519_v17 = vld [vmem:[#allocation7 + $0x84] ss:$16 sps:$4 sm:$0xff]   ;;  %v9521_v18 = vld [vmem:[#allocation7 + $0x8c] ss:$16 sps:$4 sm:$0xff]  }
 0x11a   : > { %892 = vmatpush1.bf16.msra.mxu0 %v9505_v7  ;;  %933 = vmatpush1.bf16.msra.mxu1 %v9506_v8  ;;  %v9523_v19 = vld [vmem:[#allocation7 + $0x80] ss:$16 sps:$4 sm:$0xff]   ;;  %v9524_v20 = vld [vmem:[#allocation7 + $0x88] ss:$16 sps:$4 sm:$0xff]   ;;  %v9525_v21 = vld [vmem:[#allocation7 + $0xa4] ss:$16 sps:$4 sm:$0xff]  }
 0x11b   : > { %893 = vmatprep.subr.bf16.mxu0 %v9507_v9  ;;  %934 = vmatprep.subr.bf16.mxu1 %v9509_v10  ;;  %v9527_v22 = vld [vmem:[#allocation7 + $0xac] ss:$16 sps:$4 sm:$0xff]   ;;  %v9529_v23 = vld [vmem:[#allocation7 + $0xa0] ss:$16 sps:$4 sm:$0xff]   ;;  %v9530_v24 = vld [vmem:[#allocation7 + $0xa8] ss:$16 sps:$4 sm:$0xff]  }
 0x11c   : > { %v9531_v25 = vld [vmem:[#allocation7 + $0xc4] ss:$16 sps:$4 sm:$0xff]   ;;  %v9533_v26 = vld [vmem:[#allocation7 + $0xcc] ss:$16 sps:$4 sm:$0xff]   ;;  %v9535_v27 = vld [vmem:[#allocation7 + $0xc0] ss:$16 sps:$4 sm:$0xff]  }
 0x11d   : > { %v9536_v28 = vld [vmem:[#allocation7 + $0xc8] ss:$16 sps:$4 sm:$0xff]   ;;  %v9537_v29 = vld [vmem:[#allocation7 + $0xe4] ss:$16 sps:$4 sm:$0xff]   ;;  %v9539_v30 = vld [vmem:[#allocation7 + $0xec] ss:$16 sps:$4 sm:$0xff]  }
 0x11e   : > { %894 = vmatpush1.bf16.msra.mxu0 %v9511_v11  ;;  %935 = vmatpush1.bf16.msra.mxu1 %v9512_v12  ;;  %v9541_v31 = vld [vmem:[#allocation7 + $0xe0] ss:$16 sps:$4 sm:$0xff]   ;;  %v9542_v32 = vld [vmem:[#allocation7 + $0xe8] ss:$16 sps:$4 sm:$0xff]   ;;  %v9543_v33 = vld [vmem:[#allocation7 + $0x104] ss:$16 sps:$4 sm:$0xff]  }
 0x11f   : > { %895 = vmatprep.subr.bf16.mxu0 %v9513_v13  ;;  %936 = vmatprep.subr.bf16.mxu1 %v9515_v14  ;;  %v9545_v34 = vld [vmem:[#allocation7 + $0x10c] ss:$16 sps:$4 sm:$0xff]   ;;  %v9547_v35 = vld [vmem:[#allocation7 + $0x100] ss:$16 sps:$4 sm:$0xff]   ;;  %v9548_v36 = vld [vmem:[#allocation7 + $0x108] ss:$16 sps:$4 sm:$0xff]  }
 0x120   : > { %v9549_v37 = vld [vmem:[#allocation7 + $0x124] ss:$16 sps:$4 sm:$0xff]   ;;  %v9551_v38 = vld [vmem:[#allocation7 + $0x12c] ss:$16 sps:$4 sm:$0xff]   ;;  %v10932_v39 = vmov 1966171168  }
 0x121   : > { %v554_v40 = vunpack.c.l.s4 %v10932_v39  ;;  %v9553_v42 = vld [vmem:[#allocation7 + $0x120] ss:$16 sps:$4 sm:$0xff]   ;;  %v9554_v43 = vld [vmem:[#allocation7 + $0x128] ss:$16 sps:$4 sm:$0xff]   ;;  %v9555_v44 = vld [vmem:[#allocation7 + $0x144] ss:$16 sps:$4 sm:$0xff]  }
 0x122   : > { %896 = vmatpush1.bf16.msra.mxu0 %v9517_v15  ;;  %937 = vmatpush1.bf16.msra.mxu1 %v9518_v16  ;;  %v9557_v45 = vld [vmem:[#allocation7 + $0x14c] ss:$16 sps:$4 sm:$0xff]   ;;  %v11313_v47 = vshrl.u32 %v556_v41, 7  ;;  %v9559_v48 = vld [vmem:[#allocation7 + $0x140] ss:$16 sps:$4 sm:$0xff]   ;;  %s11898_s30 = sld [smem:[#allocation25_spill]] }
 0x123   : > { %897 = vmatprep.subr.bf16.mxu0 %v9519_v17  ;;  %938 = vmatprep.subr.bf16.mxu1 %v9521_v18  ;;  %v555_v46 = vunpack.c.0.s8 %v554_v40  ;;  %v9560_v49 = vld [vmem:[#allocation7 + $0x148] ss:$16 sps:$4 sm:$0xff]   ;;  %v9561_v50 = vld [vmem:[#allocation7 + $0x164] ss:$16 sps:$4 sm:$0xff]   ;;  %v9563_v51 = vld [vmem:[#allocation7 + $0x16c] ss:$16 sps:$4 sm:$0xff]  }
 0x124   : > { %v8311_v53 = vld.sshfl [vmem:[%s392_s25] sm:$0x11 pattern:$0x75316420]  ;;  %v9565_v54 = vld [vmem:[#allocation7 + $0x160] ss:$16 sps:$4 sm:$0xff]  }
 0x125   : > { %v558_v52 = vsub.s32 %v555_v46, %v11313_v47  ;;  %v9566_v55 = vld [vmem:[#allocation7 + $0x168] ss:$16 sps:$4 sm:$0xff]   ;;  %v552_v56 = vcombine.high %v8311_v53, %v8311_v53  ;;  %v9567_v57 = vld [vmem:[#allocation7 + $0x184] ss:$16 sps:$4 sm:$0xff]   ;;  %v9569_v58 = vld [vmem:[#allocation7 + $0x18c] ss:$16 sps:$4 sm:$0xff]  }
 0x126   : > { %898 = vmatpush1.bf16.msra.mxu0 %v9523_v19  ;;  %939 = vmatpush1.bf16.msra.mxu1 %v9524_v20  ;;  %v9571_v60 = vld [vmem:[#allocation7 + $0x180] ss:$16 sps:$4 sm:$0xff]   ;;  %v9572_v61 = vld [vmem:[#allocation7 + $0x188] ss:$16 sps:$4 sm:$0xff]   ;;  %v9573_v62 = vld [vmem:[#allocation7 + $0x1a4] ss:$16 sps:$4 sm:$0xff]  }
 0x127   : > { %899 = vmatprep.subr.bf16.mxu0 %v9525_v21  ;;  %940 = vmatprep.subr.bf16.mxu1 %v9527_v22  ;;  %v11318_v59 = vrot.slane %v552_v56, %v558_v52  ;;  %v9575_v63 = vld [vmem:[#allocation7 + $0x1ac] ss:$16 sps:$4 sm:$0xff]   ;;  %v9577_v0 = vld [vmem:[#allocation7 + $0x1a0] ss:$16 sps:$4 sm:$0xff]   ;;  %v9578_v1 = vld [vmem:[#allocation7 + $0x1a8] ss:$16 sps:$4 sm:$0xff]   ;;  %v11330_v20 = vrot.slane %v8311_v53, %v558_v52 }
 0x128   : > { %v9579_v2 = vld [vmem:[#allocation7 + $0x1c4] ss:$16 sps:$4 sm:$0xff]   ;;  %v9581_v3 = vld [vmem:[#allocation7 + $0x1cc] ss:$16 sps:$4 sm:$0xff]   ;;  %v9583_v4 = vld [vmem:[#allocation7 + $0x1c0] ss:$16 sps:$4 sm:$0xff]  }
 0x129   : > { %921 = vmatprep.mubr.bf16.mxu0 %v11318_v59  ;;  %962 = vmatprep.mubr.bf16.mxu1 %v11318_v59  ;;  %v9584_v5 = vld [vmem:[#allocation7 + $0x1c8] ss:$16 sps:$4 sm:$0xff]   ;;  %v9585_v6 = vld [vmem:[#allocation7 + $0x1e4] ss:$16 sps:$4 sm:$0xff]   ;;  %v9587_v7 = vld [vmem:[#allocation7 + $0x1ec] ss:$16 sps:$4 sm:$0xff]  }
 0x12a   : > { %900 = vmatpush1.bf16.msra.mxu0 %v9529_v23  ;;  %941 = vmatpush1.bf16.msra.mxu1 %v9530_v24  ;;  %v1004_v8 = vld [vmem:[%s11292_s20] sm:$0xff]  ;;  %v1005_v10 = vld [vmem:[%s11292_s20 + $0x8] sm:$0xff]  ;;  %p476_p6 = scmp.eq.s32.totalorder %s11898_s30, 1  ;;  %p2964_p0 = scmp.eq.s32.totalorder %s11898_s30, 2 }
 0x12b   : > { %901 = vmatprep.subr.bf16.mxu0 %v9531_v25  ;;  %942 = vmatprep.subr.bf16.mxu1 %v9533_v26  ;;  %v1012_v9 = vld [vmem:[%s11292_s20 + $0x40] sm:$0xff]  ;;  %v1013_v11 = vld [vmem:[%s11292_s20 + $0x48] sm:$0xff] }
 0x12c   : > { %v9589_v12 = vld [vmem:[#allocation7 + $0x1e0] ss:$16 sps:$4 sm:$0xff]   ;;  %v9590_v13 = vld [vmem:[#allocation7 + $0x1e8] ss:$16 sps:$4 sm:$0xff]   ;;  %v8377_v14 = vcombine.high %v1004_v8, %v1012_v9  ;;  %v8379_v15 = vcombine.high %v1005_v10, %v1013_v11  ;;  %v8376_v21 = vcombine.low %v1004_v8, %v1012_v9  ;;  %v8378_v22 = vcombine.low %v1005_v10, %v1013_v11 }
 0x12d   : > { %v1020_v16 = vld [vmem:[%s11292_s20 + $0x80] sm:$0xff]  ;;  %v1021_v18 = vld [vmem:[%s11292_s20 + $0x88] sm:$0xff]  ;;  %s477_s21 = scalar_select %p476_p6, 0.587, 0.114 }
 0x12e   : > { %902 = vmatpush1.bf16.msra.mxu0 %v9535_v27  ;;  %943 = vmatpush1.bf16.msra.mxu1 %v9536_v28  ;;  %v1028_v17 = vld [vmem:[%s11292_s20 + $0xc0] sm:$0xff]  ;;  %v1029_v19 = vld [vmem:[%s11292_s20 + $0xc8] sm:$0xff] }
 0x12f   : > { %903 = vmatprep.subr.bf16.mxu0 %v9537_v29  ;;  %944 = vmatprep.subr.bf16.mxu1 %v9539_v30  ;;  %v8393_v23 = vcombine.high %v1020_v16, %v1028_v17  ;;  %v8395_v24 = vcombine.high %v1021_v18, %v1029_v19  ;;  %v1036_v25 = vld [vmem:[%s11292_s20 + $0x100] sm:$0xff]  ;;  %v1037_v27 = vld [vmem:[%s11292_s20 + $0x108] sm:$0xff]  ;;  %v8392_v29 = vcombine.low %v1020_v16, %v1028_v17  ;;  %s11910_s21 = smov (%p465_p10, %s477_s21), 0.2989 }
 0x130   : > { %v1044_v26 = vld [vmem:[%s11292_s20 + $0x140] sm:$0xff]  ;;  %v1045_v28 = vld [vmem:[%s11292_s20 + $0x148] sm:$0xff]  ;;  %v8394_v30 = vcombine.low %v1021_v18, %v1029_v19 }
 0x131   : > { %v1068_v41 = vld [vmem:[%s11292_s20 + $0x200] sm:$0xff]  ;;  %v1085_v52 = vld [vmem:[%s11292_s20 + $0x288] sm:$0xff] }
 0x132   : > { %904 = vmatpush1.bf16.msra.mxu0 %v9541_v31  ;;  %945 = vmatpush1.bf16.msra.mxu1 %v9542_v32  ;;  %v8409_v31 = vcombine.high %v1036_v25, %v1044_v26  ;;  %v8411_v32 = vcombine.high %v1037_v27, %v1045_v28  ;;  %v1093_v53 = vld [vmem:[%s11292_s20 + $0x2c8] sm:$0xff]  ;;  %v1132_v11 = vld [vmem:[%s11292_s20 + $0x400] sm:$0xff] }
 0x133   : > { %905 = vmatprep.subr.bf16.mxu0 %v9543_v33  ;;  %946 = vmatprep.subr.bf16.mxu1 %v9545_v34  ;;  %v1052_v33 = vld [vmem:[%s11292_s20 + $0x180] sm:$0xff] }
 0x134   : > { %v1060_v34 = vld [vmem:[%s11292_s20 + $0x1c0] sm:$0xff] }
 0x135   : > { %v8425_v39 = vcombine.high %v1052_v33, %v1060_v34  ;;  %v1148_v19 = vld [vmem:[%s11292_s20 + $0x480] sm:$0xff] }
 0x136   : > { %906 = vmatpush1.bf16.msra.mxu0 %v9547_v35  ;;  %947 = vmatpush1.bf16.msra.mxu1 %v9548_v36  ;;  %v1053_v35 = vld [vmem:[%s11292_s20 + $0x188] sm:$0xff] }
 0x137   : > { %907 = vmatprep.subr.bf16.mxu0 %v9549_v37  ;;  %948 = vmatprep.subr.bf16.mxu1 %v9551_v38  ;;  %v1061_v36 = vld [vmem:[%s11292_s20 + $0x1c8] sm:$0xff]  ;;  %v8408_v37 = vcombine.low %v1036_v25, %v1044_v26  ;;  %v8410_v38 = vcombine.low %v1037_v27, %v1045_v28  ;;  %v1164_v28 = vld [vmem:[%s11292_s20 + $0x500] sm:$0xff] }
 0x138   : > { %v8427_v40 = vcombine.high %v1053_v35, %v1061_v36  ;;  %v8426_v46 = vcombine.low %v1053_v35, %v1061_v36  ;;  %v1180_v36 = vld [vmem:[%s11292_s20 + $0x580] sm:$0xff] }
 0x13a   : > { %908 = vmatpush1.bf16.msra.mxu0 %v9553_v42  ;;  %949 = vmatpush1.bf16.msra.mxu1 %v9554_v43  ;;  %v1076_v42 = vld [vmem:[%s11292_s20 + $0x240] sm:$0xff]  ;;  %v1069_v43 = vld [vmem:[%s11292_s20 + $0x208] sm:$0xff] }
 0x13b   : > { %909 = vmatprep.subr.bf16.mxu0 %v9555_v44  ;;  %950 = vmatprep.subr.bf16.mxu1 %v9557_v45  ;;  %v1077_v44 = vld [vmem:[%s11292_s20 + $0x248] sm:$0xff]  ;;  %v8424_v45 = vcombine.low %v1052_v33, %v1060_v34 }
 0x13e   : > { %910 = vmatpush1.bf16.msra.mxu0 %v9559_v48  ;;  %951 = vmatpush1.bf16.msra.mxu1 %v9560_v49  ;;  %v8441_v48 = vcombine.high %v1068_v41, %v1076_v42  ;;  %v8443_v49 = vcombine.high %v1069_v43, %v1077_v44 }
 0x13f   : > { %911 = vmatprep.subr.bf16.mxu0 %v9561_v50  ;;  %952 = vmatprep.subr.bf16.mxu1 %v9563_v51  ;;  %v1084_v50 = vld [vmem:[%s11292_s20 + $0x280] sm:$0xff] }
 0x140   : > { %v1092_v51 = vld [vmem:[%s11292_s20 + $0x2c0] sm:$0xff] }
 0x141   : > { %v8457_v56 = vcombine.high %v1084_v50, %v1092_v51 }
 0x142   : > { %912 = vmatpush1.bf16.msra.mxu0 %v9565_v54  ;;  %953 = vmatpush1.bf16.msra.mxu1 %v9566_v55  ;;  %v8440_v54 = vcombine.low %v1068_v41, %v1076_v42  ;;  %v8442_v55 = vcombine.low %v1069_v43, %v1077_v44  ;;  %v1196_v44 = vld [vmem:[%s11292_s20 + $0x600] sm:$0xff] }
 0x143   : > { %913 = vmatprep.subr.bf16.mxu0 %v9567_v57  ;;  %954 = vmatprep.subr.bf16.mxu1 %v9569_v58  ;;  %v8459_v57 = vcombine.high %v1085_v52, %v1093_v53  ;;  %v1100_v58 = vld [vmem:[%s11292_s20 + $0x300] sm:$0xff] }
 0x146   : > { %914 = vmatpush1.bf16.msra.mxu0 %v9571_v60  ;;  %955 = vmatpush1.bf16.msra.mxu1 %v9572_v61  ;;  %v1108_v60 = vld [vmem:[%s11292_s20 + $0x340] sm:$0xff]  ;;  %v1101_v61 = vld [vmem:[%s11292_s20 + $0x308] sm:$0xff] }
 0x147   : > { %915 = vmatprep.subr.bf16.mxu0 %v9573_v62  ;;  %956 = vmatprep.subr.bf16.mxu1 %v9575_v63  ;;  %v1109_v62 = vld [vmem:[%s11292_s20 + $0x348] sm:$0xff]  ;;  %v8456_v63 = vcombine.low %v1084_v50, %v1092_v51 }
 0x148   : > { %v8474_v8 = vcombine.low %v1101_v61, %v1109_v62 }
 0x14a   : > { %916 = vmatpush1.bf16.msra.mxu0 %v9577_v0  ;;  %957 = vmatpush1.bf16.msra.mxu1 %v9578_v1  ;;  %v8458_v0 = vcombine.low %v1085_v52, %v1093_v53  ;;  %v8473_v1 = vcombine.high %v1100_v58, %v1108_v60  ;;  %v1212_v53 = vld [vmem:[%s11292_s20 + $0x680] sm:$0xff] }
 0x14b   : > { %917 = vmatprep.subr.bf16.mxu0 %v9579_v2  ;;  %958 = vmatprep.subr.bf16.mxu1 %v9581_v3  ;;  %v8475_v2 = vcombine.high %v1101_v61, %v1109_v62  ;;  %v1116_v3 = vld [vmem:[%s11292_s20 + $0x380] sm:$0xff] }
 0x14c   : > { %v1228_v62 = vld [vmem:[%s11292_s20 + $0x700] sm:$0xff] }
 0x14e   : > { %918 = vmatpush1.bf16.msra.mxu0 %v9583_v4  ;;  %959 = vmatpush1.bf16.msra.mxu1 %v9584_v5  ;;  %v1124_v4 = vld [vmem:[%s11292_s20 + $0x3c0] sm:$0xff]  ;;  %v1117_v5 = vld [vmem:[%s11292_s20 + $0x388] sm:$0xff] }
 0x14f   : > { %919 = vmatprep.subr.bf16.mxu0 %v9585_v6  ;;  %960 = vmatprep.subr.bf16.mxu1 %v9587_v7  ;;  %v1125_v6 = vld [vmem:[%s11292_s20 + $0x3c8] sm:$0xff]  ;;  %v8472_v7 = vcombine.low %v1100_v58, %v1108_v60  ;;  %v8489_v9 = vcombine.high %v1116_v3, %v1124_v4 }
 0x150   : > { %v8491_v10 = vcombine.high %v1117_v5, %v1125_v6  ;;  %v8490_v16 = vcombine.low %v1117_v5, %v1125_v6  ;;  %v1244_v6 = vld [vmem:[%s11292_s20 + $0x780] sm:$0xff] }
 0x152   : > { %920 = vmatpush1.bf16.msra.mxu0 %v9589_v12  ;;  %961 = vmatpush1.bf16.msra.mxu1 %v9590_v13  ;;  %v1140_v12 = vld [vmem:[%s11292_s20 + $0x440] sm:$0xff]  ;;  %v1133_v13 = vld [vmem:[%s11292_s20 + $0x408] sm:$0xff] }
 0x153   : > { %2540 = vmatprep.subr.bf16.mxu0 %v8377_v14  ;;  %2581 = vmatprep.subr.bf16.mxu1 %v8379_v15  ;;  %v1141_v14 = vld [vmem:[%s11292_s20 + $0x448] sm:$0xff]  ;;  %v8488_v15 = vcombine.low %v1116_v3, %v1124_v4  ;;  %v8505_v17 = vcombine.high %v1132_v11, %v1140_v12 }
 0x154   : > { %v8507_v18 = vcombine.high %v1133_v13, %v1141_v14  ;;  %v8506_v25 = vcombine.low %v1133_v13, %v1141_v14  ;;  %v1006_v14 = vld [vmem:[%s11292_s20 + $0x10] sm:$0xff] }
 0x155   : > { %922 = vmatmul.mubr.bf16.vlgmr.msra.gmra.mrb[0].mxu0 %v11330_v20  ;;  %963 = vmatmul.mubr.bf16.vlgmr.msra.gmra.mrb[0].mxu1 %v11330_v20 }
 0x156   : > { %2541 = vmatpush1.bf16.msra.mxu0 %v8376_v21  ;;  %2582 = vmatpush1.bf16.msra.mxu1 %v8378_v22  ;;  %v1156_v21 = vld [vmem:[%s11292_s20 + $0x4c0] sm:$0xff]  ;;  %v1149_v22 = vld [vmem:[%s11292_s20 + $0x488] sm:$0xff] }
 0x157   : > { %2542 = vmatprep.subr.bf16.mxu0 %v8393_v23  ;;  %2583 = vmatprep.subr.bf16.mxu1 %v8395_v24  ;;  %v1157_v23 = vld [vmem:[%s11292_s20 + $0x4c8] sm:$0xff]  ;;  %v8504_v24 = vcombine.low %v1132_v11, %v1140_v12  ;;  %v8521_v26 = vcombine.high %v1148_v19, %v1156_v21 }
 0x158   : > { %2572 = vmatprep.mubr.bf16.mxu0 %v11318_v59  ;;  %2613 = vmatprep.mubr.bf16.mxu1 %v11318_v59  ;;  %v8523_v27 = vcombine.high %v1149_v22, %v1157_v23  ;;  %v8522_v33 = vcombine.low %v1149_v22, %v1157_v23  ;;  %v1022_v23 = vld [vmem:[%s11292_s20 + $0x90] sm:$0xff] }
 0x15a   : > { %2543 = vmatpush1.bf16.msra.mxu0 %v8392_v29  ;;  %2584 = vmatpush1.bf16.msra.mxu1 %v8394_v30  ;;  %v1172_v29 = vld [vmem:[%s11292_s20 + $0x540] sm:$0xff]  ;;  %v1165_v30 = vld [vmem:[%s11292_s20 + $0x508] sm:$0xff] }
 0x15b   : > { %2544 = vmatprep.subr.bf16.mxu0 %v8409_v31  ;;  %2585 = vmatprep.subr.bf16.mxu1 %v8411_v32  ;;  %v1173_v31 = vld [vmem:[%s11292_s20 + $0x548] sm:$0xff]  ;;  %v8520_v32 = vcombine.low %v1148_v19, %v1156_v21  ;;  %v8537_v34 = vcombine.high %v1164_v28, %v1172_v29 }
 0x15c   : > { %v8539_v35 = vcombine.high %v1165_v30, %v1173_v31  ;;  %v8538_v41 = vcombine.low %v1165_v30, %v1173_v31  ;;  %v1038_v31 = vld [vmem:[%s11292_s20 + $0x110] sm:$0xff] }
 0x15e   : > { %2545 = vmatpush1.bf16.msra.mxu0 %v8408_v37  ;;  %2586 = vmatpush1.bf16.msra.mxu1 %v8410_v38  ;;  %v1188_v37 = vld [vmem:[%s11292_s20 + $0x5c0] sm:$0xff]  ;;  %v1181_v38 = vld [vmem:[%s11292_s20 + $0x588] sm:$0xff] }
 0x15f   : > { %2546 = vmatprep.subr.bf16.mxu0 %v8425_v39  ;;  %2587 = vmatprep.subr.bf16.mxu1 %v8427_v40  ;;  %v1189_v39 = vld [vmem:[%s11292_s20 + $0x5c8] sm:$0xff]  ;;  %v8536_v40 = vcombine.low %v1164_v28, %v1172_v29  ;;  %v8553_v42 = vcombine.high %v1180_v36, %v1188_v37 }
 0x160   : > { %v8555_v43 = vcombine.high %v1181_v38, %v1189_v39  ;;  %v8554_v50 = vcombine.low %v1181_v38, %v1189_v39  ;;  %v1054_v39 = vld [vmem:[%s11292_s20 + $0x190] sm:$0xff] }
 0x162   : > { %2547 = vmatpush1.bf16.msra.mxu0 %v8424_v45  ;;  %2588 = vmatpush1.bf16.msra.mxu1 %v8426_v46  ;;  %v1204_v45 = vld [vmem:[%s11292_s20 + $0x640] sm:$0xff]  ;;  %v1197_v46 = vld [vmem:[%s11292_s20 + $0x608] sm:$0xff] }
 0x163   : > { %2548 = vmatprep.subr.bf16.mxu0 %v8441_v48  ;;  %2589 = vmatprep.subr.bf16.mxu1 %v8443_v49  ;;  %v1205_v48 = vld [vmem:[%s11292_s20 + $0x648] sm:$0xff]  ;;  %v8552_v49 = vcombine.low %v1180_v36, %v1188_v37  ;;  %v8569_v51 = vcombine.high %v1196_v44, %v1204_v45 }
 0x164   : > { %v8571_v52 = vcombine.high %v1197_v46, %v1205_v48  ;;  %v8570_v58 = vcombine.low %v1197_v46, %v1205_v48  ;;  %v1070_v48 = vld [vmem:[%s11292_s20 + $0x210] sm:$0xff] }
 0x166   : > { %2549 = vmatpush1.bf16.msra.mxu0 %v8440_v54  ;;  %2590 = vmatpush1.bf16.msra.mxu1 %v8442_v55  ;;  %v1220_v54 = vld [vmem:[%s11292_s20 + $0x6c0] sm:$0xff]  ;;  %v1213_v55 = vld [vmem:[%s11292_s20 + $0x688] sm:$0xff] }
 0x167   : > { %2550 = vmatprep.subr.bf16.mxu0 %v8457_v56  ;;  %2591 = vmatprep.subr.bf16.mxu1 %v8459_v57  ;;  %v1221_v56 = vld [vmem:[%s11292_s20 + $0x6c8] sm:$0xff]  ;;  %v8568_v57 = vcombine.low %v1196_v44, %v1204_v45  ;;  %v8585_v60 = vcombine.high %v1212_v53, %v1220_v54 }
 0x168   : > { %v8587_v61 = vcombine.high %v1213_v55, %v1221_v56  ;;  %v8586_v3 = vcombine.low %v1213_v55, %v1221_v56  ;;  %v1086_v56 = vld [vmem:[%s11292_s20 + $0x290] sm:$0xff] }
 0x16a   : > { %2551 = vmatpush1.bf16.msra.mxu0 %v8456_v63  ;;  %2592 = vmatpush1.bf16.msra.mxu1 %v8458_v0  ;;  %v1236_v63 = vld [vmem:[%s11292_s20 + $0x740] sm:$0xff]  ;;  %v1229_v0 = vld [vmem:[%s11292_s20 + $0x708] sm:$0xff] }
 0x16b   : > { %2552 = vmatprep.subr.bf16.mxu0 %v8473_v1  ;;  %2593 = vmatprep.subr.bf16.mxu1 %v8475_v2  ;;  %v1237_v1 = vld [vmem:[%s11292_s20 + $0x748] sm:$0xff]  ;;  %v8584_v2 = vcombine.low %v1212_v53, %v1220_v54  ;;  %v8601_v4 = vcombine.high %v1228_v62, %v1236_v63 }
 0x16c   : > { %v8603_v5 = vcombine.high %v1229_v0, %v1237_v1  ;;  %v8602_v11 = vcombine.low %v1229_v0, %v1237_v1  ;;  %v1102_v1 = vld [vmem:[%s11292_s20 + $0x310] sm:$0xff] }
 0x16e   : > { %2553 = vmatpush1.bf16.msra.mxu0 %v8472_v7  ;;  %2594 = vmatpush1.bf16.msra.mxu1 %v8474_v8  ;;  %v1252_v7 = vld [vmem:[%s11292_s20 + $0x7c0] sm:$0xff]  ;;  %v1245_v8 = vld [vmem:[%s11292_s20 + $0x788] sm:$0xff] }
 0x16f   : > { %2554 = vmatprep.subr.bf16.mxu0 %v8489_v9  ;;  %2595 = vmatprep.subr.bf16.mxu1 %v8491_v10  ;;  %v1253_v9 = vld [vmem:[%s11292_s20 + $0x7c8] sm:$0xff]  ;;  %v8600_v10 = vcombine.low %v1228_v62, %v1236_v63  ;;  %v8617_v12 = vcombine.high %v1244_v6, %v1252_v7 }
 0x170   : > { %v8619_v13 = vcombine.high %v1245_v8, %v1253_v9  ;;  %v8618_v19 = vcombine.low %v1245_v8, %v1253_v9  ;;  %v1118_v9 = vld [vmem:[%s11292_s20 + $0x390] sm:$0xff] }
 0x172   : > { %2555 = vmatpush1.bf16.msra.mxu0 %v8488_v15  ;;  %2596 = vmatpush1.bf16.msra.mxu1 %v8490_v16  ;;  %v1014_v15 = vld [vmem:[%s11292_s20 + $0x50] sm:$0xff]  ;;  %v1007_v16 = vld [vmem:[%s11292_s20 + $0x18] sm:$0xff] }
 0x173   : > { %2556 = vmatprep.subr.bf16.mxu0 %v8505_v17  ;;  %2597 = vmatprep.subr.bf16.mxu1 %v8507_v18  ;;  %v1015_v17 = vld [vmem:[%s11292_s20 + $0x58] sm:$0xff]  ;;  %v8616_v18 = vcombine.low %v1244_v6, %v1252_v7  ;;  %v8381_v21 = vcombine.high %v1006_v14, %v1014_v15 }
 0x174   : > { %v8383_v22 = vcombine.high %v1007_v16, %v1015_v17  ;;  %v8382_v28 = vcombine.low %v1007_v16, %v1015_v17  ;;  %v1134_v17 = vld [vmem:[%s11292_s20 + $0x410] sm:$0xff] }
 0x176   : > { %2557 = vmatpush1.bf16.msra.mxu0 %v8504_v24  ;;  %2598 = vmatpush1.bf16.msra.mxu1 %v8506_v25  ;;  %v1030_v24 = vld [vmem:[%s11292_s20 + $0xd0] sm:$0xff]  ;;  %v1023_v25 = vld [vmem:[%s11292_s20 + $0x98] sm:$0xff] }
 0x177   : > { %2558 = vmatprep.subr.bf16.mxu0 %v8521_v26  ;;  %2599 = vmatprep.subr.bf16.mxu1 %v8523_v27  ;;  %v1031_v26 = vld [vmem:[%s11292_s20 + $0xd8] sm:$0xff]  ;;  %v8380_v27 = vcombine.low %v1006_v14, %v1014_v15  ;;  %v8397_v29 = vcombine.high %v1022_v23, %v1030_v24 }
 0x178   : > { %v8399_v30 = vcombine.high %v1023_v25, %v1031_v26  ;;  %v8398_v36 = vcombine.low %v1023_v25, %v1031_v26  ;;  %v1150_v26 = vld [vmem:[%s11292_s20 + $0x490] sm:$0xff] }
 0x17a   : > { %2559 = vmatpush1.bf16.msra.mxu0 %v8520_v32  ;;  %2600 = vmatpush1.bf16.msra.mxu1 %v8522_v33  ;;  %v1046_v32 = vld [vmem:[%s11292_s20 + $0x150] sm:$0xff]  ;;  %v1039_v33 = vld [vmem:[%s11292_s20 + $0x118] sm:$0xff] }
 0x17b   : > { %2560 = vmatprep.subr.bf16.mxu0 %v8537_v34  ;;  %2601 = vmatprep.subr.bf16.mxu1 %v8539_v35  ;;  %v1047_v34 = vld [vmem:[%s11292_s20 + $0x158] sm:$0xff]  ;;  %v8396_v35 = vcombine.low %v1022_v23, %v1030_v24  ;;  %v8413_v37 = vcombine.high %v1038_v31, %v1046_v32 }
 0x17c   : > { %v8415_v38 = vcombine.high %v1039_v33, %v1047_v34  ;;  %v8414_v44 = vcombine.low %v1039_v33, %v1047_v34  ;;  %v1166_v34 = vld [vmem:[%s11292_s20 + $0x510] sm:$0xff] }
 0x17e   : > { %2561 = vmatpush1.bf16.msra.mxu0 %v8536_v40  ;;  %2602 = vmatpush1.bf16.msra.mxu1 %v8538_v41  ;;  %v1062_v40 = vld [vmem:[%s11292_s20 + $0x1d0] sm:$0xff]  ;;  %v1055_v41 = vld [vmem:[%s11292_s20 + $0x198] sm:$0xff] }
 0x17f   : > { %2562 = vmatprep.subr.bf16.mxu0 %v8553_v42  ;;  %2603 = vmatprep.subr.bf16.mxu1 %v8555_v43  ;;  %v1063_v42 = vld [vmem:[%s11292_s20 + $0x1d8] sm:$0xff]  ;;  %v8412_v43 = vcombine.low %v1038_v31, %v1046_v32  ;;  %v8429_v45 = vcombine.high %v1054_v39, %v1062_v40 }
 0x180   : > { %v8431_v46 = vcombine.high %v1055_v41, %v1063_v42  ;;  %v8430_v53 = vcombine.low %v1055_v41, %v1063_v42  ;;  %v1182_v42 = vld [vmem:[%s11292_s20 + $0x590] sm:$0xff] }
 0x182   : > { %2563 = vmatpush1.bf16.msra.mxu0 %v8552_v49  ;;  %2604 = vmatpush1.bf16.msra.mxu1 %v8554_v50  ;;  %v1078_v49 = vld [vmem:[%s11292_s20 + $0x250] sm:$0xff]  ;;  %v1071_v50 = vld [vmem:[%s11292_s20 + $0x218] sm:$0xff] }
 0x183   : > { %2564 = vmatprep.subr.bf16.mxu0 %v8569_v51  ;;  %2605 = vmatprep.subr.bf16.mxu1 %v8571_v52  ;;  %v1079_v51 = vld [vmem:[%s11292_s20 + $0x258] sm:$0xff]  ;;  %v8428_v52 = vcombine.low %v1054_v39, %v1062_v40  ;;  %v8445_v54 = vcombine.high %v1070_v48, %v1078_v49 }
 0x184   : > { %v8447_v55 = vcombine.high %v1071_v50, %v1079_v51  ;;  %v8446_v62 = vcombine.low %v1071_v50, %v1079_v51  ;;  %v1198_v51 = vld [vmem:[%s11292_s20 + $0x610] sm:$0xff] }
 0x186   : > { %2565 = vmatpush1.bf16.msra.mxu0 %v8568_v57  ;;  %2606 = vmatpush1.bf16.msra.mxu1 %v8570_v58  ;;  %v1094_v57 = vld [vmem:[%s11292_s20 + $0x2d0] sm:$0xff]  ;;  %v1087_v58 = vld [vmem:[%s11292_s20 + $0x298] sm:$0xff] }
 0x187   : > { %2566 = vmatprep.subr.bf16.mxu0 %v8585_v60  ;;  %2607 = vmatprep.subr.bf16.mxu1 %v8587_v61  ;;  %v1095_v60 = vld [vmem:[%s11292_s20 + $0x2d8] sm:$0xff]  ;;  %v8444_v61 = vcombine.low %v1070_v48, %v1078_v49  ;;  %v8461_v63 = vcombine.high %v1086_v56, %v1094_v57 }
 0x188   : > { %v8463_v0 = vcombine.high %v1087_v58, %v1095_v60  ;;  %v8462_v6 = vcombine.low %v1087_v58, %v1095_v60  ;;  %v1214_v60 = vld [vmem:[%s11292_s20 + $0x690] sm:$0xff] }
 0x18a   : > { %2567 = vmatpush1.bf16.msra.mxu0 %v8584_v2  ;;  %2608 = vmatpush1.bf16.msra.mxu1 %v8586_v3  ;;  %v1110_v2 = vld [vmem:[%s11292_s20 + $0x350] sm:$0xff]  ;;  %v1103_v3 = vld [vmem:[%s11292_s20 + $0x318] sm:$0xff] }
 0x18b   : > { %2568 = vmatprep.subr.bf16.mxu0 %v8601_v4  ;;  %2609 = vmatprep.subr.bf16.mxu1 %v8603_v5  ;;  %v1111_v4 = vld [vmem:[%s11292_s20 + $0x358] sm:$0xff]  ;;  %v8460_v5 = vcombine.low %v1086_v56, %v1094_v57  ;;  %v8477_v7 = vcombine.high %v1102_v1, %v1110_v2 }
 0x18c   : > { %v8479_v8 = vcombine.high %v1103_v3, %v1111_v4  ;;  %v8478_v14 = vcombine.low %v1103_v3, %v1111_v4  ;;  %v1230_v4 = vld [vmem:[%s11292_s20 + $0x710] sm:$0xff] }
 0x18e   : > { %2569 = vmatpush1.bf16.msra.mxu0 %v8600_v10  ;;  %2610 = vmatpush1.bf16.msra.mxu1 %v8602_v11  ;;  %v1126_v10 = vld [vmem:[%s11292_s20 + $0x3d0] sm:$0xff]  ;;  %v1119_v11 = vld [vmem:[%s11292_s20 + $0x398] sm:$0xff] }
 0x18f   : > { %2570 = vmatprep.subr.bf16.mxu0 %v8617_v12  ;;  %2611 = vmatprep.subr.bf16.mxu1 %v8619_v13  ;;  %v1127_v12 = vld [vmem:[%s11292_s20 + $0x3d8] sm:$0xff]  ;;  %v8476_v13 = vcombine.low %v1102_v1, %v1110_v2  ;;  %v8493_v15 = vcombine.high %v1118_v9, %v1126_v10 }
 0x190   : > { %v8495_v16 = vcombine.high %v1119_v11, %v1127_v12  ;;  %v8494_v23 = vcombine.low %v1119_v11, %v1127_v12  ;;  %v1246_v12 = vld [vmem:[%s11292_s20 + $0x790] sm:$0xff] }
 0x192   : > { %2571 = vmatpush1.bf16.msra.mxu0 %v8616_v18  ;;  %2612 = vmatpush1.bf16.msra.mxu1 %v8618_v19  ;;  %v1142_v18 = vld [vmem:[%s11292_s20 + $0x450] sm:$0xff]  ;;  %v1135_v19 = vld [vmem:[%s11292_s20 + $0x418] sm:$0xff] }
 0x193   : > { %2622 = vmatprep.subr.bf16.mxu0 %v8381_v21  ;;  %2663 = vmatprep.subr.bf16.mxu1 %v8383_v22  ;;  %v1143_v21 = vld [vmem:[%s11292_s20 + $0x458] sm:$0xff]  ;;  %v8492_v22 = vcombine.low %v1118_v9, %v1126_v10  ;;  %v8509_v24 = vcombine.high %v1134_v17, %v1142_v18 }
 0x194   : > { %v8511_v25 = vcombine.high %v1135_v19, %v1143_v21  ;;  %v8510_v31 = vcombine.low %v1135_v19, %v1143_v21  ;;  %v1008_v21 = vld [vmem:[%s11292_s20 + $0x20] sm:$0xff] }
 0x195   : > { %2573 = vmatmul.mubr.bf16.vlgmr.msra.gmra.mrb[4].mxu0 %v11330_v20  ;;  %2614 = vmatmul.mubr.bf16.vlgmr.msra.gmra.mrb[4].mxu1 %v11330_v20 }
 0x196   : > { %2623 = vmatpush1.bf16.msra.mxu0 %v8380_v27  ;;  %2664 = vmatpush1.bf16.msra.mxu1 %v8382_v28  ;;  %v1158_v27 = vld [vmem:[%s11292_s20 + $0x4d0] sm:$0xff]  ;;  %v1151_v28 = vld [vmem:[%s11292_s20 + $0x498] sm:$0xff] }
 0x197   : > { %2624 = vmatprep.subr.bf16.mxu0 %v8397_v29  ;;  %2665 = vmatprep.subr.bf16.mxu1 %v8399_v30  ;;  %v1159_v29 = vld [vmem:[%s11292_s20 + $0x4d8] sm:$0xff]  ;;  %v8508_v30 = vcombine.low %v1134_v17, %v1142_v18  ;;  %v8525_v32 = vcombine.high %v1150_v26, %v1158_v27 }
 0x198   : > { %2654 = vmatprep.mubr.bf16.mxu0 %v11318_v59  ;;  %2695 = vmatprep.mubr.bf16.mxu1 %v11318_v59  ;;  %v8527_v33 = vcombine.high %v1151_v28, %v1159_v29  ;;  %v8526_v39 = vcombine.low %v1151_v28, %v1159_v29  ;;  %v1024_v29 = vld [vmem:[%s11292_s20 + $0xa0] sm:$0xff] }
 0x19a   : > { %2625 = vmatpush1.bf16.msra.mxu0 %v8396_v35  ;;  %2666 = vmatpush1.bf16.msra.mxu1 %v8398_v36  ;;  %v1174_v35 = vld [vmem:[%s11292_s20 + $0x550] sm:$0xff]  ;;  %v1167_v36 = vld [vmem:[%s11292_s20 + $0x518] sm:$0xff] }
 0x19b   : > { %2626 = vmatprep.subr.bf16.mxu0 %v8413_v37  ;;  %2667 = vmatprep.subr.bf16.mxu1 %v8415_v38  ;;  %v1175_v37 = vld [vmem:[%s11292_s20 + $0x558] sm:$0xff]  ;;  %v8524_v38 = vcombine.low %v1150_v26, %v1158_v27  ;;  %v8541_v40 = vcombine.high %v1166_v34, %v1174_v35 }
 0x19c   : > { %v8543_v41 = vcombine.high %v1167_v36, %v1175_v37  ;;  %v8542_v48 = vcombine.low %v1167_v36, %v1175_v37  ;;  %v1040_v37 = vld [vmem:[%s11292_s20 + $0x120] sm:$0xff] }
 0x19e   : > { %2627 = vmatpush1.bf16.msra.mxu0 %v8412_v43  ;;  %2668 = vmatpush1.bf16.msra.mxu1 %v8414_v44  ;;  %v1190_v43 = vld [vmem:[%s11292_s20 + $0x5d0] sm:$0xff]  ;;  %v1183_v44 = vld [vmem:[%s11292_s20 + $0x598] sm:$0xff] }
 0x19f   : > { %2628 = vmatprep.subr.bf16.mxu0 %v8429_v45  ;;  %2669 = vmatprep.subr.bf16.mxu1 %v8431_v46  ;;  %v1191_v45 = vld [vmem:[%s11292_s20 + $0x5d8] sm:$0xff]  ;;  %v8540_v46 = vcombine.low %v1166_v34, %v1174_v35  ;;  %v8557_v49 = vcombine.high %v1182_v42, %v1190_v43 }
 0x1a0   : > { %v8559_v50 = vcombine.high %v1183_v44, %v1191_v45  ;;  %v8558_v56 = vcombine.low %v1183_v44, %v1191_v45  ;;  %v1056_v45 = vld [vmem:[%s11292_s20 + $0x1a0] sm:$0xff] }
 0x1a2   : > { %2629 = vmatpush1.bf16.msra.mxu0 %v8428_v52  ;;  %2670 = vmatpush1.bf16.msra.mxu1 %v8430_v53  ;;  %v1206_v52 = vld [vmem:[%s11292_s20 + $0x650] sm:$0xff]  ;;  %v1199_v53 = vld [vmem:[%s11292_s20 + $0x618] sm:$0xff] }
 0x1a3   : > { %2630 = vmatprep.subr.bf16.mxu0 %v8445_v54  ;;  %2671 = vmatprep.subr.bf16.mxu1 %v8447_v55  ;;  %v1207_v54 = vld [vmem:[%s11292_s20 + $0x658] sm:$0xff]  ;;  %v8556_v55 = vcombine.low %v1182_v42, %v1190_v43  ;;  %v8573_v57 = vcombine.high %v1198_v51, %v1206_v52 }
 0x1a4   : > { %v8575_v58 = vcombine.high %v1199_v53, %v1207_v54  ;;  %v8574_v1 = vcombine.low %v1199_v53, %v1207_v54  ;;  %v1072_v54 = vld [vmem:[%s11292_s20 + $0x220] sm:$0xff] }
 0x1a6   : > { %2631 = vmatpush1.bf16.msra.mxu0 %v8444_v61  ;;  %2672 = vmatpush1.bf16.msra.mxu1 %v8446_v62  ;;  %v1222_v61 = vld [vmem:[%s11292_s20 + $0x6d0] sm:$0xff]  ;;  %v1215_v62 = vld [vmem:[%s11292_s20 + $0x698] sm:$0xff] }
 0x1a7   : > { %2632 = vmatprep.subr.bf16.mxu0 %v8461_v63  ;;  %2673 = vmatprep.subr.bf16.mxu1 %v8463_v0  ;;  %v1223_v63 = vld [vmem:[%s11292_s20 + $0x6d8] sm:$0xff]  ;;  %v8572_v0 = vcombine.low %v1198_v51, %v1206_v52  ;;  %v8589_v2 = vcombine.high %v1214_v60, %v1222_v61 }
 0x1a8   : > { %v8591_v3 = vcombine.high %v1215_v62, %v1223_v63  ;;  %v8590_v9 = vcombine.low %v1215_v62, %v1223_v63  ;;  %v1088_v63 = vld [vmem:[%s11292_s20 + $0x2a0] sm:$0xff] }
 0x1aa   : > { %2633 = vmatpush1.bf16.msra.mxu0 %v8460_v5  ;;  %2674 = vmatpush1.bf16.msra.mxu1 %v8462_v6  ;;  %v1238_v5 = vld [vmem:[%s11292_s20 + $0x750] sm:$0xff]  ;;  %v1231_v6 = vld [vmem:[%s11292_s20 + $0x718] sm:$0xff] }
 0x1ab   : > { %2634 = vmatprep.subr.bf16.mxu0 %v8477_v7  ;;  %2675 = vmatprep.subr.bf16.mxu1 %v8479_v8  ;;  %v1239_v7 = vld [vmem:[%s11292_s20 + $0x758] sm:$0xff]  ;;  %v8588_v8 = vcombine.low %v1214_v60, %v1222_v61  ;;  %v8605_v10 = vcombine.high %v1230_v4, %v1238_v5 }
 0x1ac   : > { %v8607_v11 = vcombine.high %v1231_v6, %v1239_v7  ;;  %v8606_v17 = vcombine.low %v1231_v6, %v1239_v7  ;;  %v1104_v7 = vld [vmem:[%s11292_s20 + $0x320] sm:$0xff] }
 0x1ae   : > { %2635 = vmatpush1.bf16.msra.mxu0 %v8476_v13  ;;  %2676 = vmatpush1.bf16.msra.mxu1 %v8478_v14  ;;  %v1254_v13 = vld [vmem:[%s11292_s20 + $0x7d0] sm:$0xff]  ;;  %v1247_v14 = vld [vmem:[%s11292_s20 + $0x798] sm:$0xff] }
 0x1af   : > { %2636 = vmatprep.subr.bf16.mxu0 %v8493_v15  ;;  %2677 = vmatprep.subr.bf16.mxu1 %v8495_v16  ;;  %v1255_v15 = vld [vmem:[%s11292_s20 + $0x7d8] sm:$0xff]  ;;  %v8604_v16 = vcombine.low %v1230_v4, %v1238_v5  ;;  %v8621_v18 = vcombine.high %v1246_v12, %v1254_v13 }
 0x1b0   : > { %v8623_v19 = vcombine.high %v1247_v14, %v1255_v15  ;;  %v8622_v26 = vcombine.low %v1247_v14, %v1255_v15  ;;  %v1120_v15 = vld [vmem:[%s11292_s20 + $0x3a0] sm:$0xff] }
 0x1b2   : > { %2637 = vmatpush1.bf16.msra.mxu0 %v8492_v22  ;;  %2678 = vmatpush1.bf16.msra.mxu1 %v8494_v23  ;;  %v1016_v22 = vld [vmem:[%s11292_s20 + $0x60] sm:$0xff]  ;;  %v1009_v23 = vld [vmem:[%s11292_s20 + $0x28] sm:$0xff] }
 0x1b3   : > { %2638 = vmatprep.subr.bf16.mxu0 %v8509_v24  ;;  %2679 = vmatprep.subr.bf16.mxu1 %v8511_v25  ;;  %v1017_v24 = vld [vmem:[%s11292_s20 + $0x68] sm:$0xff]  ;;  %v8620_v25 = vcombine.low %v1246_v12, %v1254_v13  ;;  %v8385_v27 = vcombine.high %v1008_v21, %v1016_v22 }
 0x1b4   : > { %v8387_v28 = vcombine.high %v1009_v23, %v1017_v24  ;;  %v8386_v34 = vcombine.low %v1009_v23, %v1017_v24  ;;  %v1136_v24 = vld [vmem:[%s11292_s20 + $0x420] sm:$0xff] }
 0x1b6   : > { %2639 = vmatpush1.bf16.msra.mxu0 %v8508_v30  ;;  %2680 = vmatpush1.bf16.msra.mxu1 %v8510_v31  ;;  %v1032_v30 = vld [vmem:[%s11292_s20 + $0xe0] sm:$0xff]  ;;  %v1025_v31 = vld [vmem:[%s11292_s20 + $0xa8] sm:$0xff] }
 0x1b7   : > { %2640 = vmatprep.subr.bf16.mxu0 %v8525_v32  ;;  %2681 = vmatprep.subr.bf16.mxu1 %v8527_v33  ;;  %v1033_v32 = vld [vmem:[%s11292_s20 + $0xe8] sm:$0xff]  ;;  %v8384_v33 = vcombine.low %v1008_v21, %v1016_v22  ;;  %v8401_v35 = vcombine.high %v1024_v29, %v1032_v30 }
 0x1b8   : > { %v8403_v36 = vcombine.high %v1025_v31, %v1033_v32  ;;  %v8402_v42 = vcombine.low %v1025_v31, %v1033_v32  ;;  %v1152_v32 = vld [vmem:[%s11292_s20 + $0x4a0] sm:$0xff] }
 0x1ba   : > { %2641 = vmatpush1.bf16.msra.mxu0 %v8524_v38  ;;  %2682 = vmatpush1.bf16.msra.mxu1 %v8526_v39  ;;  %v1048_v38 = vld [vmem:[%s11292_s20 + $0x160] sm:$0xff]  ;;  %v1041_v39 = vld [vmem:[%s11292_s20 + $0x128] sm:$0xff] }
 0x1bb   : > { %2642 = vmatprep.subr.bf16.mxu0 %v8541_v40  ;;  %2683 = vmatprep.subr.bf16.mxu1 %v8543_v41  ;;  %v1049_v40 = vld [vmem:[%s11292_s20 + $0x168] sm:$0xff]  ;;  %v8400_v41 = vcombine.low %v1024_v29, %v1032_v30  ;;  %v8417_v43 = vcombine.high %v1040_v37, %v1048_v38 }
 0x1bc   : > { %v8419_v44 = vcombine.high %v1041_v39, %v1049_v40  ;;  %v8418_v51 = vcombine.low %v1041_v39, %v1049_v40  ;;  %v1168_v40 = vld [vmem:[%s11292_s20 + $0x520] sm:$0xff] }
 0x1be   : > { %2643 = vmatpush1.bf16.msra.mxu0 %v8540_v46  ;;  %2684 = vmatpush1.bf16.msra.mxu1 %v8542_v48  ;;  %v1064_v46 = vld [vmem:[%s11292_s20 + $0x1e0] sm:$0xff]  ;;  %v1057_v48 = vld [vmem:[%s11292_s20 + $0x1a8] sm:$0xff] }
 0x1bf   : > { %2644 = vmatprep.subr.bf16.mxu0 %v8557_v49  ;;  %2685 = vmatprep.subr.bf16.mxu1 %v8559_v50  ;;  %v1065_v49 = vld [vmem:[%s11292_s20 + $0x1e8] sm:$0xff]  ;;  %v8416_v50 = vcombine.low %v1040_v37, %v1048_v38  ;;  %v8433_v52 = vcombine.high %v1056_v45, %v1064_v46 }
 0x1c0   : > { %v8435_v53 = vcombine.high %v1057_v48, %v1065_v49  ;;  %v8434_v60 = vcombine.low %v1057_v48, %v1065_v49  ;;  %v1184_v49 = vld [vmem:[%s11292_s20 + $0x5a0] sm:$0xff] }
 0x1c2   : > { %2645 = vmatpush1.bf16.msra.mxu0 %v8556_v55  ;;  %2686 = vmatpush1.bf16.msra.mxu1 %v8558_v56  ;;  %v1080_v55 = vld [vmem:[%s11292_s20 + $0x260] sm:$0xff]  ;;  %v1073_v56 = vld [vmem:[%s11292_s20 + $0x228] sm:$0xff] }
 0x1c3   : > { %2646 = vmatprep.subr.bf16.mxu0 %v8573_v57  ;;  %2687 = vmatprep.subr.bf16.mxu1 %v8575_v58  ;;  %v1081_v57 = vld [vmem:[%s11292_s20 + $0x268] sm:$0xff]  ;;  %v8432_v58 = vcombine.low %v1056_v45, %v1064_v46  ;;  %v8449_v61 = vcombine.high %v1072_v54, %v1080_v55 }
 0x1c4   : > { %v8451_v62 = vcombine.high %v1073_v56, %v1081_v57  ;;  %v8450_v4 = vcombine.low %v1073_v56, %v1081_v57  ;;  %v1200_v57 = vld [vmem:[%s11292_s20 + $0x620] sm:$0xff] }
 0x1c6   : > { %2647 = vmatpush1.bf16.msra.mxu0 %v8572_v0  ;;  %2688 = vmatpush1.bf16.msra.mxu1 %v8574_v1  ;;  %v1096_v0 = vld [vmem:[%s11292_s20 + $0x2e0] sm:$0xff]  ;;  %v1089_v1 = vld [vmem:[%s11292_s20 + $0x2a8] sm:$0xff] }
 0x1c7   : > { %2648 = vmatprep.subr.bf16.mxu0 %v8589_v2  ;;  %2689 = vmatprep.subr.bf16.mxu1 %v8591_v3  ;;  %v1097_v2 = vld [vmem:[%s11292_s20 + $0x2e8] sm:$0xff]  ;;  %v8448_v3 = vcombine.low %v1072_v54, %v1080_v55  ;;  %v8465_v5 = vcombine.high %v1088_v63, %v1096_v0 }
 0x1c8   : > { %v8467_v6 = vcombine.high %v1089_v1, %v1097_v2  ;;  %v8466_v12 = vcombine.low %v1089_v1, %v1097_v2  ;;  %v1216_v2 = vld [vmem:[%s11292_s20 + $0x6a0] sm:$0xff] }
 0x1ca   : > { %2649 = vmatpush1.bf16.msra.mxu0 %v8588_v8  ;;  %2690 = vmatpush1.bf16.msra.mxu1 %v8590_v9  ;;  %v1112_v8 = vld [vmem:[%s11292_s20 + $0x360] sm:$0xff]  ;;  %v1105_v9 = vld [vmem:[%s11292_s20 + $0x328] sm:$0xff] }
 0x1cb   : > { %2650 = vmatprep.subr.bf16.mxu0 %v8605_v10  ;;  %2691 = vmatprep.subr.bf16.mxu1 %v8607_v11  ;;  %v1113_v10 = vld [vmem:[%s11292_s20 + $0x368] sm:$0xff]  ;;  %v8464_v11 = vcombine.low %v1088_v63, %v1096_v0  ;;  %v8481_v13 = vcombine.high %v1104_v7, %v1112_v8 }
 0x1cc   : > { %v8483_v14 = vcombine.high %v1105_v9, %v1113_v10  ;;  %v8482_v21 = vcombine.low %v1105_v9, %v1113_v10  ;;  %v1232_v10 = vld [vmem:[%s11292_s20 + $0x720] sm:$0xff] }
 0x1ce   : > { %2651 = vmatpush1.bf16.msra.mxu0 %v8604_v16  ;;  %2692 = vmatpush1.bf16.msra.mxu1 %v8606_v17  ;;  %v1128_v16 = vld [vmem:[%s11292_s20 + $0x3e0] sm:$0xff]  ;;  %v1121_v17 = vld [vmem:[%s11292_s20 + $0x3a8] sm:$0xff] }
 0x1cf   : > { %2652 = vmatprep.subr.bf16.mxu0 %v8621_v18  ;;  %2693 = vmatprep.subr.bf16.mxu1 %v8623_v19  ;;  %v1129_v18 = vld [vmem:[%s11292_s20 + $0x3e8] sm:$0xff]  ;;  %v8480_v19 = vcombine.low %v1104_v7, %v1112_v8  ;;  %v8497_v22 = vcombine.high %v1120_v15, %v1128_v16 }
 0x1d0   : > { %v8499_v23 = vcombine.high %v1121_v17, %v1129_v18  ;;  %v8498_v29 = vcombine.low %v1121_v17, %v1129_v18  ;;  %v1248_v18 = vld [vmem:[%s11292_s20 + $0x7a0] sm:$0xff] }
 0x1d2   : > { %2653 = vmatpush1.bf16.msra.mxu0 %v8620_v25  ;;  %2694 = vmatpush1.bf16.msra.mxu1 %v8622_v26  ;;  %v1144_v25 = vld [vmem:[%s11292_s20 + $0x460] sm:$0xff]  ;;  %v1137_v26 = vld [vmem:[%s11292_s20 + $0x428] sm:$0xff] }
 0x1d3   : > { %2704 = vmatprep.subr.bf16.mxu0 %v8385_v27  ;;  %2745 = vmatprep.subr.bf16.mxu1 %v8387_v28  ;;  %v1145_v27 = vld [vmem:[%s11292_s20 + $0x468] sm:$0xff]  ;;  %v8496_v28 = vcombine.low %v1120_v15, %v1128_v16  ;;  %v8513_v30 = vcombine.high %v1136_v24, %v1144_v25 }
 0x1d4   : > { %v8515_v31 = vcombine.high %v1137_v26, %v1145_v27  ;;  %v8514_v37 = vcombine.low %v1137_v26, %v1145_v27  ;;  %v1010_v27 = vld [vmem:[%s11292_s20 + $0x30] sm:$0xff] }
 0x1d5   : > { %2655 = vmatmul.mubr.bf16.vlgmr.msra.gmra.mrb[8].mxu0 %v11330_v20  ;;  %2696 = vmatmul.mubr.bf16.vlgmr.msra.gmra.mrb[8].mxu1 %v11330_v20 }
 0x1d6   : > { %2705 = vmatpush1.bf16.msra.mxu0 %v8384_v33  ;;  %2746 = vmatpush1.bf16.msra.mxu1 %v8386_v34  ;;  %v1160_v33 = vld [vmem:[%s11292_s20 + $0x4e0] sm:$0xff]  ;;  %v1153_v34 = vld [vmem:[%s11292_s20 + $0x4a8] sm:$0xff] }
 0x1d7   : > { %2706 = vmatprep.subr.bf16.mxu0 %v8401_v35  ;;  %2747 = vmatprep.subr.bf16.mxu1 %v8403_v36  ;;  %v1161_v35 = vld [vmem:[%s11292_s20 + $0x4e8] sm:$0xff]  ;;  %v8512_v36 = vcombine.low %v1136_v24, %v1144_v25  ;;  %v8529_v38 = vcombine.high %v1152_v32, %v1160_v33 }
 0x1d8   : > { %2736 = vmatprep.mubr.bf16.mxu0 %v11318_v59  ;;  %2777 = vmatprep.mubr.bf16.mxu1 %v11318_v59  ;;  %v8531_v39 = vcombine.high %v1153_v34, %v1161_v35  ;;  %v8530_v45 = vcombine.low %v1153_v34, %v1161_v35  ;;  %v1026_v35 = vld [vmem:[%s11292_s20 + $0xb0] sm:$0xff] }
 0x1da   : > { %2707 = vmatpush1.bf16.msra.mxu0 %v8400_v41  ;;  %2748 = vmatpush1.bf16.msra.mxu1 %v8402_v42  ;;  %v1176_v41 = vld [vmem:[%s11292_s20 + $0x560] sm:$0xff]  ;;  %v1169_v42 = vld [vmem:[%s11292_s20 + $0x528] sm:$0xff] }
 0x1db   : > { %2708 = vmatprep.subr.bf16.mxu0 %v8417_v43  ;;  %2749 = vmatprep.subr.bf16.mxu1 %v8419_v44  ;;  %v1177_v43 = vld [vmem:[%s11292_s20 + $0x568] sm:$0xff]  ;;  %v8528_v44 = vcombine.low %v1152_v32, %v1160_v33  ;;  %v8545_v46 = vcombine.high %v1168_v40, %v1176_v41 }
 0x1dc   : > { %v8547_v48 = vcombine.high %v1169_v42, %v1177_v43  ;;  %v8546_v54 = vcombine.low %v1169_v42, %v1177_v43  ;;  %v1042_v43 = vld [vmem:[%s11292_s20 + $0x130] sm:$0xff] }
 0x1de   : > { %2709 = vmatpush1.bf16.msra.mxu0 %v8416_v50  ;;  %2750 = vmatpush1.bf16.msra.mxu1 %v8418_v51  ;;  %v1192_v50 = vld [vmem:[%s11292_s20 + $0x5e0] sm:$0xff]  ;;  %v1185_v51 = vld [vmem:[%s11292_s20 + $0x5a8] sm:$0xff] }
 0x1df   : > { %2710 = vmatprep.subr.bf16.mxu0 %v8433_v52  ;;  %2751 = vmatprep.subr.bf16.mxu1 %v8435_v53  ;;  %v1193_v52 = vld [vmem:[%s11292_s20 + $0x5e8] sm:$0xff]  ;;  %v8544_v53 = vcombine.low %v1168_v40, %v1176_v41  ;;  %v8561_v55 = vcombine.high %v1184_v49, %v1192_v50 }
 0x1e0   : > { %v8563_v56 = vcombine.high %v1185_v51, %v1193_v52  ;;  %v8562_v63 = vcombine.low %v1185_v51, %v1193_v52  ;;  %v1058_v52 = vld [vmem:[%s11292_s20 + $0x1b0] sm:$0xff] }
 0x1e2   : > { %2711 = vmatpush1.bf16.msra.mxu0 %v8432_v58  ;;  %2752 = vmatpush1.bf16.msra.mxu1 %v8434_v60  ;;  %v1208_v58 = vld [vmem:[%s11292_s20 + $0x660] sm:$0xff]  ;;  %v1201_v60 = vld [vmem:[%s11292_s20 + $0x628] sm:$0xff] }
 0x1e3   : > { %2712 = vmatprep.subr.bf16.mxu0 %v8449_v61  ;;  %2753 = vmatprep.subr.bf16.mxu1 %v8451_v62  ;;  %v1209_v61 = vld [vmem:[%s11292_s20 + $0x668] sm:$0xff]  ;;  %v8560_v62 = vcombine.low %v1184_v49, %v1192_v50  ;;  %v8577_v0 = vcombine.high %v1200_v57, %v1208_v58 }
 0x1e4   : > { %v8579_v1 = vcombine.high %v1201_v60, %v1209_v61  ;;  %v8578_v7 = vcombine.low %v1201_v60, %v1209_v61  ;;  %v1074_v61 = vld [vmem:[%s11292_s20 + $0x230] sm:$0xff] }
 0x1e6   : > { %2713 = vmatpush1.bf16.msra.mxu0 %v8448_v3  ;;  %2754 = vmatpush1.bf16.msra.mxu1 %v8450_v4  ;;  %v1224_v3 = vld [vmem:[%s11292_s20 + $0x6e0] sm:$0xff]  ;;  %v1217_v4 = vld [vmem:[%s11292_s20 + $0x6a8] sm:$0xff] }
 0x1e7   : > { %2714 = vmatprep.subr.bf16.mxu0 %v8465_v5  ;;  %2755 = vmatprep.subr.bf16.mxu1 %v8467_v6  ;;  %v1225_v5 = vld [vmem:[%s11292_s20 + $0x6e8] sm:$0xff]  ;;  %v8576_v6 = vcombine.low %v1200_v57, %v1208_v58  ;;  %v8593_v8 = vcombine.high %v1216_v2, %v1224_v3 }
 0x1e8   : > { %v8595_v9 = vcombine.high %v1217_v4, %v1225_v5  ;;  %v8594_v15 = vcombine.low %v1217_v4, %v1225_v5  ;;  %v1090_v4 = vld [vmem:[%s11292_s20 + $0x2b0] sm:$0xff] }
 0x1e9   : > { %v1098_v5 = vld [vmem:[%s11292_s20 + $0x2f0] sm:$0xff] }
 0x1ea   : > { %2715 = vmatpush1.bf16.msra.mxu0 %v8464_v11  ;;  %2756 = vmatpush1.bf16.msra.mxu1 %v8466_v12  ;;  %v1240_v11 = vld [vmem:[%s11292_s20 + $0x760] sm:$0xff]  ;;  %v1233_v12 = vld [vmem:[%s11292_s20 + $0x728] sm:$0xff] }
 0x1eb   : > { %2716 = vmatprep.subr.bf16.mxu0 %v8481_v13  ;;  %2757 = vmatprep.subr.bf16.mxu1 %v8483_v14  ;;  %v1241_v13 = vld [vmem:[%s11292_s20 + $0x768] sm:$0xff]  ;;  %v8592_v14 = vcombine.low %v1216_v2, %v1224_v3  ;;  %v8609_v16 = vcombine.high %v1232_v10, %v1240_v11 }
 0x1ec   : > { %v8611_v17 = vcombine.high %v1233_v12, %v1241_v13  ;;  %v8610_v24 = vcombine.low %v1233_v12, %v1241_v13  ;;  %v8469_v12 = vcombine.high %v1090_v4, %v1098_v5 }
 0x1ee   : > { %2717 = vmatpush1.bf16.msra.mxu0 %v8480_v19  ;;  %2758 = vmatpush1.bf16.msra.mxu1 %v8482_v21  ;;  %v1256_v19 = vld [vmem:[%s11292_s20 + $0x7e0] sm:$0xff]  ;;  %v1249_v21 = vld [vmem:[%s11292_s20 + $0x7a8] sm:$0xff] }
 0x1ef   : > { %2718 = vmatprep.subr.bf16.mxu0 %v8497_v22  ;;  %2759 = vmatprep.subr.bf16.mxu1 %v8499_v23  ;;  %v1257_v22 = vld [vmem:[%s11292_s20 + $0x7e8] sm:$0xff]  ;;  %v8608_v23 = vcombine.low %v1232_v10, %v1240_v11  ;;  %v8625_v25 = vcombine.high %v1248_v18, %v1256_v19 }
 0x1f0   : > { %v8627_v26 = vcombine.high %v1249_v21, %v1257_v22  ;;  %v8626_v32 = vcombine.low %v1249_v21, %v1257_v22  ;;  %v8468_v21 = vcombine.low %v1090_v4, %v1098_v5 }
 0x1f2   : > { %2719 = vmatpush1.bf16.msra.mxu0 %v8496_v28  ;;  %2760 = vmatpush1.bf16.msra.mxu1 %v8498_v29  ;;  %v1018_v28 = vld [vmem:[%s11292_s20 + $0x70] sm:$0xff]  ;;  %v1011_v29 = vld [vmem:[%s11292_s20 + $0x38] sm:$0xff] }
 0x1f3   : > { %2720 = vmatprep.subr.bf16.mxu0 %v8513_v30  ;;  %2761 = vmatprep.subr.bf16.mxu1 %v8515_v31  ;;  %v1019_v30 = vld [vmem:[%s11292_s20 + $0x78] sm:$0xff]  ;;  %v8624_v31 = vcombine.low %v1248_v18, %v1256_v19  ;;  %v8389_v33 = vcombine.high %v1010_v27, %v1018_v28  ;;  %v971_v19 = vstv %s11910_s21 }
 0x1f4   : > { %v8391_v34 = vcombine.high %v1011_v29, %v1019_v30  ;;  %v8390_v40 = vcombine.low %v1011_v29, %v1019_v30  ;;  %v1123_v29 = vld [vmem:[%s11292_s20 + $0x3b8] sm:$0xff] }
 0x1f5   : > { %v1131_v30 = vld [vmem:[%s11292_s20 + $0x3f8] sm:$0xff] }
 0x1f6   : > { %2721 = vmatpush1.bf16.msra.mxu0 %v8512_v36  ;;  %2762 = vmatpush1.bf16.msra.mxu1 %v8514_v37  ;;  %v1034_v36 = vld [vmem:[%s11292_s20 + $0xf0] sm:$0xff]  ;;  %v1027_v37 = vld [vmem:[%s11292_s20 + $0xb8] sm:$0xff] }
 0x1f7   : > { %2722 = vmatprep.subr.bf16.mxu0 %v8529_v38  ;;  %2763 = vmatprep.subr.bf16.mxu1 %v8531_v39  ;;  %v1035_v38 = vld [vmem:[%s11292_s20 + $0xf8] sm:$0xff]  ;;  %v8388_v39 = vcombine.low %v1010_v27, %v1018_v28  ;;  %v8405_v41 = vcombine.high %v1026_v35, %v1034_v36  ;;  %v1130_v28 = vld [vmem:[%s11292_s20 + $0x3f0] sm:$0xff] }
 0x1f8   : > { %v8407_v42 = vcombine.high %v1027_v37, %v1035_v38  ;;  %v8406_v49 = vcombine.low %v1027_v37, %v1035_v38 }
 0x1fa   : > { %2723 = vmatpush1.bf16.msra.mxu0 %v8528_v44  ;;  %2764 = vmatpush1.bf16.msra.mxu1 %v8530_v45  ;;  %v1050_v44 = vld [vmem:[%s11292_s20 + $0x170] sm:$0xff]  ;;  %v1043_v45 = vld [vmem:[%s11292_s20 + $0x138] sm:$0xff] }
 0x1fb   : > { %2724 = vmatprep.subr.bf16.mxu0 %v8545_v46  ;;  %2765 = vmatprep.subr.bf16.mxu1 %v8547_v48  ;;  %v1051_v46 = vld [vmem:[%s11292_s20 + $0x178] sm:$0xff]  ;;  %v8404_v48 = vcombine.low %v1026_v35, %v1034_v36  ;;  %v8421_v50 = vcombine.high %v1042_v43, %v1050_v44 }
 0x1fc   : > { %v8423_v51 = vcombine.high %v1043_v45, %v1051_v46  ;;  %v8422_v57 = vcombine.low %v1043_v45, %v1051_v46  ;;  %v8503_v45 = vcombine.high %v1123_v29, %v1131_v30  ;;  %v1138_v46 = vld [vmem:[%s11292_s20 + $0x430] sm:$0xff] }
 0x1fe   : > { %2725 = vmatpush1.bf16.msra.mxu0 %v8544_v53  ;;  %2766 = vmatpush1.bf16.msra.mxu1 %v8546_v54  ;;  %v1066_v53 = vld [vmem:[%s11292_s20 + $0x1f0] sm:$0xff]  ;;  %v1059_v54 = vld [vmem:[%s11292_s20 + $0x1b8] sm:$0xff] }
 0x1ff   : > { %2726 = vmatprep.subr.bf16.mxu0 %v8561_v55  ;;  %2767 = vmatprep.subr.bf16.mxu1 %v8563_v56  ;;  %v1067_v55 = vld [vmem:[%s11292_s20 + $0x1f8] sm:$0xff]  ;;  %v8420_v56 = vcombine.low %v1042_v43, %v1050_v44  ;;  %v8437_v58 = vcombine.high %v1058_v52, %v1066_v53 }
 0x200   : > { %v8439_v60 = vcombine.high %v1059_v54, %v1067_v55 }
 0x202   : > { %2727 = vmatpush1.bf16.msra.mxu0 %v8560_v62  ;;  %2768 = vmatpush1.bf16.msra.mxu1 %v8562_v63  ;;  %v1082_v62 = vld [vmem:[%s11292_s20 + $0x270] sm:$0xff]  ;;  %v1075_v63 = vld [vmem:[%s11292_s20 + $0x238] sm:$0xff] }
 0x203   : > { %2728 = vmatprep.subr.bf16.mxu0 %v8577_v0  ;;  %2769 = vmatprep.subr.bf16.mxu1 %v8579_v1  ;;  %v1083_v0 = vld [vmem:[%s11292_s20 + $0x278] sm:$0xff]  ;;  %v8438_v1 = vcombine.low %v1059_v54, %v1067_v55  ;;  %v8453_v2 = vcombine.high %v1074_v61, %v1082_v62  ;;  %v8452_v10 = vcombine.low %v1074_v61, %v1082_v62  ;;  %v1154_v61 = vld [vmem:[%s11292_s20 + $0x4b0] sm:$0xff] }
 0x204   : > { %v8455_v3 = vcombine.high %v1075_v63, %v1083_v0  ;;  %v8454_v11 = vcombine.low %v1075_v63, %v1083_v0  ;;  %v1162_v63 = vld [vmem:[%s11292_s20 + $0x4f0] sm:$0xff]  ;;  %v1155_v0 = vld [vmem:[%s11292_s20 + $0x4b8] sm:$0xff] }
 0x205   : > { %v8533_v4 = vcombine.high %v1154_v61, %v1162_v63 }
 0x206   : > { %2729 = vmatpush1.bf16.msra.mxu0 %v8576_v6  ;;  %2770 = vmatpush1.bf16.msra.mxu1 %v8578_v7  ;;  %v1091_v6 = vld [vmem:[%s11292_s20 + $0x2b8] sm:$0xff] }
 0x207   : > { %2730 = vmatprep.subr.bf16.mxu0 %v8593_v8  ;;  %2771 = vmatprep.subr.bf16.mxu1 %v8595_v9  ;;  %v1099_v7 = vld [vmem:[%s11292_s20 + $0x2f8] sm:$0xff]  ;;  %v10933_v8 = vmov 1983009808  }
 0x208   : > { %v983_v9 = vunpack.c.l.s4 %v10933_v8  ;;  %v8471_v13 = vcombine.high %v1091_v6, %v1099_v7  ;;  %v8470_v22 = vcombine.low %v1091_v6, %v1099_v7  ;;  %v1170_v6 = vld [vmem:[%s11292_s20 + $0x530] sm:$0xff]  ;;  %v1171_v8 = vld [vmem:[%s11292_s20 + $0x538] sm:$0xff] }
 0x209   : > { %v1178_v7 = vld [vmem:[%s11292_s20 + $0x570] sm:$0xff] }
 0x20a   : > { %2731 = vmatpush1.bf16.msra.mxu0 %v8592_v14  ;;  %2772 = vmatpush1.bf16.msra.mxu1 %v8594_v15  ;;  %v1106_v14 = vld [vmem:[%s11292_s20 + $0x330] sm:$0xff]  ;;  %v984_v18 = vunpack.c.0.s8 %v983_v9  ;;  %v1179_v9 = vld [vmem:[%s11292_s20 + $0x578] sm:$0xff] }
 0x20b   : > { %2732 = vmatprep.subr.bf16.mxu0 %v8609_v16  ;;  %2773 = vmatprep.subr.bf16.mxu1 %v8611_v17  ;;  %v1114_v15 = vld [vmem:[%s11292_s20 + $0x370] sm:$0xff]  ;;  %v1107_v16 = vld [vmem:[%s11292_s20 + $0x338] sm:$0xff] }
 0x20c   : > { %v1115_v17 = vld [vmem:[%s11292_s20 + $0x378] sm:$0xff]  ;;  %v8484_v36 = vcombine.low %v1106_v14, %v1114_v15 }
 0x20e   : > { %2733 = vmatpush1.bf16.msra.mxu0 %v8608_v23  ;;  %2774 = vmatpush1.bf16.msra.mxu1 %v8610_v24  ;;  %v8485_v23 = vcombine.high %v1106_v14, %v1114_v15  ;;  %v8487_v24 = vcombine.high %v1107_v16, %v1115_v17  ;;  %v1186_v14 = vld [vmem:[%s11292_s20 + $0x5b0] sm:$0xff] }
 0x20f   : > { %2734 = vmatprep.subr.bf16.mxu0 %v8625_v25  ;;  %2775 = vmatprep.subr.bf16.mxu1 %v8627_v26  ;;  %v1122_v25 = vld [vmem:[%s11292_s20 + $0x3b0] sm:$0xff] }
 0x210   : > { %v8501_v44 = vcombine.high %v1122_v25, %v1130_v28  ;;  %v1194_v15 = vld [vmem:[%s11292_s20 + $0x5f0] sm:$0xff] }
 0x212   : > { %2735 = vmatpush1.bf16.msra.mxu0 %v8624_v31  ;;  %2776 = vmatpush1.bf16.msra.mxu1 %v8626_v32 }
 0x213   : > { %2786 = vmatprep.subr.bf16.mxu0 %v8389_v33  ;;  %2827 = vmatprep.subr.bf16.mxu1 %v8391_v34  ;;  %v11568_v34 = vsub.s32 %v984_v18, %v11313_v47  ;;  %v8548_v18 = vcombine.low %v1170_v6, %v1178_v7 }
 0x215   : > { %2737 = vmatmul.mubr.bf16.vlgmr.msra.gmra.mrb[12].mxu0 %v11330_v20  ;;  %2778 = vmatmul.mubr.bf16.vlgmr.msra.gmra.mrb[12].mxu1 %v11330_v20 }
 0x216   : > { %2787 = vmatpush1.bf16.msra.mxu0 %v8388_v39  ;;  %2828 = vmatpush1.bf16.msra.mxu1 %v8390_v40 }
 0x217   : > { %2788 = vmatprep.subr.bf16.mxu0 %v8405_v41  ;;  %2829 = vmatprep.subr.bf16.mxu1 %v8407_v42  ;;  %v8486_v41 = vcombine.low %v1107_v16, %v1115_v17  ;;  %v1187_v16 = vld [vmem:[%s11292_s20 + $0x5b8] sm:$0xff] }
 0x218   : > { %2818 = vmatprep.mubr.bf16.mxu0 %v11318_v59  ;;  %2859 = vmatprep.mubr.bf16.mxu1 %v11318_v59  ;;  %v8436_v59 = vcombine.low %v1058_v52, %v1066_v53  ;;  %v1147_v52 = vld [vmem:[%s11292_s20 + $0x478] sm:$0xff]  ;;  %v8500_v53 = vcombine.low %v1122_v25, %v1130_v28 }
 0x219   : > { %v1195_v17 = vld [vmem:[%s11292_s20 + $0x5f8] sm:$0xff] }
 0x21a   : > { %2789 = vmatpush1.bf16.msra.mxu0 %v8404_v48  ;;  %2830 = vmatpush1.bf16.msra.mxu1 %v8406_v49  ;;  %v1203_v25 = vld [vmem:[%s11292_s20 + $0x638] sm:$0xff]  ;;  %v8566_v28 = vcombine.low %v1187_v16, %v1195_v17 }
 0x21b   : > { %2790 = vmatprep.subr.bf16.mxu0 %v8421_v50  ;;  %2831 = vmatprep.subr.bf16.mxu1 %v8423_v51  ;;  %v1146_v50 = vld [vmem:[%s11292_s20 + $0x470] sm:$0xff]  ;;  %v1139_v51 = vld [vmem:[%s11292_s20 + $0x438] sm:$0xff] }
 0x21e   : > { %2791 = vmatpush1.bf16.msra.mxu0 %v8420_v56  ;;  %2832 = vmatpush1.bf16.msra.mxu1 %v8422_v57  ;;  %v8502_v56 = vcombine.low %v1123_v29, %v1131_v30  ;;  %v479_v57 = vld [vmem:[#allocation2] sm:$0xff] }
 0x21f   : > { %2792 = vmatprep.subr.bf16.mxu0 %v8437_v58  ;;  %2833 = vmatprep.subr.bf16.mxu1 %v8439_v60  ;;  %v8517_v58 = vcombine.high %v1138_v46, %v1146_v50  ;;  %v8519_v60 = vcombine.high %v1139_v51, %v1147_v52 }
 0x222   : > { %2793 = vmatpush1.bf16.msra.mxu0 %v8436_v59  ;;  %2834 = vmatpush1.bf16.msra.mxu1 %v8438_v1  ;;  %v1163_v59 = vld [vmem:[%s11292_s20 + $0x4f8] sm:$0xff] }
 0x223   : > { %2794 = vmatprep.subr.bf16.mxu0 %v8453_v2  ;;  %2835 = vmatprep.subr.bf16.mxu1 %v8455_v3  ;;  %v8516_v2 = vcombine.low %v1138_v46, %v1146_v50  ;;  %v8518_v3 = vcombine.low %v1139_v51, %v1147_v52  ;;  %v8535_v5 = vcombine.high %v1155_v0, %v1163_v59  ;;  %v1258_v50 = vld [vmem:[%s11292_s20 + $0x7f0] sm:$0xff]  ;;  %v1251_v51 = vld [vmem:[%s11292_s20 + $0x7b8] sm:$0xff] }
 0x224   : > { %v1259_v52 = vld [vmem:[%s11292_s20 + $0x7f8] sm:$0xff] }
 0x226   : > { %2795 = vmatpush1.bf16.msra.mxu0 %v8452_v10  ;;  %2836 = vmatpush1.bf16.msra.mxu1 %v8454_v11  ;;  %v8532_v10 = vcombine.low %v1154_v61, %v1162_v63  ;;  %v8534_v11 = vcombine.low %v1155_v0, %v1163_v59 }
 0x227   : > { %2796 = vmatprep.subr.bf16.mxu0 %v8469_v12  ;;  %2837 = vmatprep.subr.bf16.mxu1 %v8471_v13  ;;  %v8549_v12 = vcombine.high %v1170_v6, %v1178_v7  ;;  %v8551_v13 = vcombine.high %v1171_v8, %v1179_v9  ;;  %v1000_v7 = vld [vmem:[#allocation3] sm:$0xff] }
 0x228   : > { %v923_v26 = vpop.f32.mrb[0].mxu0  ;;  %v964_v27 = vpop.f32.mrb[0].mxu1 }
 0x229   : > { %v972_v31 = vmul.f32 %v971_v19, %v923_v26  ;;  %v974_v32 = vmul.f32 %v971_v19, %v964_v27  ;;  %v925_v33 = vpop.f32.mrb[1].mxu0  ;;  %v966_v35 = vpop.f32.mrb[1].mxu1  ;;  %v1211_v26 = vld [vmem:[%s11292_s20 + $0x678] sm:$0xff]  ;;  %v8564_v27 = vcombine.low %v1186_v14, %v1194_v15 }
 0x22a   : > { %v973_v37 = vmul.f32 %v971_v19, %v925_v33  ;;  %v975_v38 = vmul.f32 %v971_v19, %v966_v35  ;;  %v927_v39 = vpop.f32.mrb[2].mxu0  ;;  %v968_v40 = vpop.f32.mrb[2].mxu1  ;;  %2797 = vmatpush1.bf16.msra.mxu0 %v8468_v21  ;;  %2838 = vmatpush1.bf16.msra.mxu1 %v8470_v22  ;;  %v8550_v19 = vcombine.low %v1171_v8, %v1179_v9  ;;  %v1219_v33 = vld [vmem:[%s11292_s20 + $0x6b8] sm:$0xff] }
 0x22b   : > { %v928_v42 = vpop.f32.mrb[3].mxu0  ;;  %v969_v43 = vpop.f32.mrb[3].mxu1  ;;  %2798 = vmatprep.subr.bf16.mxu0 %v8485_v23  ;;  %2839 = vmatprep.subr.bf16.mxu1 %v8487_v24  ;;  %v8565_v21 = vcombine.high %v1186_v14, %v1194_v15  ;;  %v8567_v22 = vcombine.high %v1187_v16, %v1195_v17  ;;  %v1202_v23 = vld [vmem:[%s11292_s20 + $0x630] sm:$0xff]  ;;  %v8583_v30 = vcombine.high %v1203_v25, %v1211_v26  ;;  %v1227_v35 = vld [vmem:[%s11292_s20 + $0x6f8] sm:$0xff] }
 0x22c   : > { %v980_v48 = vcombine.low %v972_v31, %v973_v37  ;;  %v981_v49 = vcombine.low %v974_v32, %v975_v38  ;;  %v1210_v24 = vld [vmem:[%s11292_s20 + $0x670] sm:$0xff]  ;;  %v8582_v37 = vcombine.low %v1203_v25, %v1211_v26  ;;  %v8599_v39 = vcombine.high %v1219_v33, %v1227_v35  ;;  %v1235_v42 = vld [vmem:[%s11292_s20 + $0x738] sm:$0xff] }
 0x22d   : > { %v8581_v29 = vcombine.high %v1202_v23, %v1210_v24  ;;  %v1218_v31 = vld [vmem:[%s11292_s20 + $0x6b0] sm:$0xff]  ;;  %v1243_v43 = vld [vmem:[%s11292_s20 + $0x778] sm:$0xff] }
 0x22e   : > { %v988_v54 = vrot.slane %v980_v48, %v11568_v34  ;;  %v995_v55 = vrot.slane %v981_v49, %v11568_v34  ;;  %2799 = vmatpush1.bf16.msra.mxu0 %v8484_v36  ;;  %2840 = vmatpush1.bf16.msra.mxu1 %v8486_v41  ;;  %v1226_v32 = vld [vmem:[%s11292_s20 + $0x6f0] sm:$0xff]  ;;  %v8580_v36 = vcombine.low %v1202_v23, %v1210_v24 }
 0x22f   : > { %2800 = vmatprep.subr.bf16.mxu0 %v8501_v44  ;;  %2841 = vmatprep.subr.bf16.mxu1 %v8503_v45  ;;  %v8597_v38 = vcombine.high %v1218_v31, %v1226_v32  ;;  %v1234_v40 = vld [vmem:[%s11292_s20 + $0x730] sm:$0xff]  ;;  %v8596_v44 = vcombine.low %v1218_v31, %v1226_v32  ;;  %v8598_v45 = vcombine.low %v1219_v33, %v1227_v35 }
 0x230   : > { %v996_v62 = vcombine.low %v988_v54, %v995_v55  ;;  %v1242_v41 = vld [vmem:[%s11292_s20 + $0x770] sm:$0xff]  ;;  %v8615_v48 = vcombine.high %v1235_v42, %v1243_v43  ;;  %v8614_v54 = vcombine.low %v1235_v42, %v1243_v43 }
 0x231   : > { %v8613_v46 = vcombine.high %v1234_v40, %v1242_v41  ;;  %v1250_v49 = vld [vmem:[%s11292_s20 + $0x7b0] sm:$0xff] }
 0x232   : > { %v998_v1 = vadd.f32 %v996_v62, %v479_v57  ;;  %2801 = vmatpush1.bf16.msra.mxu0 %v8500_v53  ;;  %2842 = vmatpush1.bf16.msra.mxu1 %v8502_v56  ;;  %v8612_v53 = vcombine.low %v1234_v40, %v1242_v41  ;;  %v8629_v55 = vcombine.high %v1250_v49, %v1258_v50 }
 0x233   : > { %2802 = vmatprep.subr.bf16.mxu0 %v8517_v58  ;;  %2843 = vmatprep.subr.bf16.mxu1 %v8519_v60  ;;  %v8631_v56 = vcombine.high %v1251_v51, %v1259_v52  ;;  %v8628_v57 = vcombine.low %v1250_v49, %v1258_v50  ;;  %v8630_v58 = vcombine.low %v1251_v51, %v1259_v52 }
 0x234   : > { %999 = vst [vmem:[#allocation2] sm:$0xff] %v998_v1 }
 0x236   : > { %2803 = vmatpush1.bf16.msra.mxu0 %v8516_v2  ;;  %2844 = vmatpush1.bf16.msra.mxu1 %v8518_v3 }
 0x237   : > { %2804 = vmatprep.subr.bf16.mxu0 %v8533_v4  ;;  %2845 = vmatprep.subr.bf16.mxu1 %v8535_v5 }
 0x23a   : > { %2805 = vmatpush1.bf16.msra.mxu0 %v8532_v10  ;;  %2846 = vmatpush1.bf16.msra.mxu1 %v8534_v11 }
 0x23b   : > { %2806 = vmatprep.subr.bf16.mxu0 %v8549_v12  ;;  %2847 = vmatprep.subr.bf16.mxu1 %v8551_v13 }
 0x23e   : > { %2807 = vmatpush1.bf16.msra.mxu0 %v8548_v18  ;;  %2848 = vmatpush1.bf16.msra.mxu1 %v8550_v19 }
 0x23f   : > { %2808 = vmatprep.subr.bf16.mxu0 %v8565_v21  ;;  %2849 = vmatprep.subr.bf16.mxu1 %v8567_v22  ;;  %v1001_v22 = vld [vmem:[#allocation3 + $0x8] sm:$0xff] }
 0x242   : > { %2809 = vmatpush1.bf16.msra.mxu0 %v8564_v27  ;;  %2850 = vmatpush1.bf16.msra.mxu1 %v8566_v28 }
 0x243   : > { %2810 = vmatprep.subr.bf16.mxu0 %v8581_v29  ;;  %2851 = vmatprep.subr.bf16.mxu1 %v8583_v30 }
 0x246   : > { %2811 = vmatpush1.bf16.msra.mxu0 %v8580_v36  ;;  %2852 = vmatpush1.bf16.msra.mxu1 %v8582_v37 }
 0x247   : > { %2812 = vmatprep.subr.bf16.mxu0 %v8597_v38  ;;  %2853 = vmatprep.subr.bf16.mxu1 %v8599_v39  ;;  %v1002_v38 = vld [vmem:[#allocation3 + $0x10] sm:$0xff] }
 0x24a   : > { %2813 = vmatpush1.bf16.msra.mxu0 %v8596_v44  ;;  %2854 = vmatpush1.bf16.msra.mxu1 %v8598_v45 }
 0x24b   : > { %2814 = vmatprep.subr.bf16.mxu0 %v8613_v46  ;;  %2855 = vmatprep.subr.bf16.mxu1 %v8615_v48 }
 0x24e   : > { %2815 = vmatpush1.bf16.msra.mxu0 %v8612_v53  ;;  %2856 = vmatpush1.bf16.msra.mxu1 %v8614_v54  ;;  %v1003_v54 = vld [vmem:[#allocation3 + $0x18] sm:$0xff] }
 0x24f   : > { %2816 = vmatprep.subr.bf16.mxu0 %v8629_v55  ;;  %2857 = vmatprep.subr.bf16.mxu1 %v8631_v56 }
 0x252   : > { %2817 = vmatpush1.bf16.msra.mxu0 %v8628_v57  ;;  %2858 = vmatpush1.bf16.msra.mxu1 %v8630_v58  ;;  %v9591_v57 = vld [vmem:[#allocation11 + $0x4] ss:$16 sps:$4 sm:$0xff] (%p2964_p0)  }
 0x253   : > { %v9593_v58 = vld [vmem:[#allocation11 + $0x204] ss:$16 sps:$4 sm:$0xff] (%p2964_p0)   ;;  %6304 = vmatprep.subr.bf16.mxu0 (%p2964_p0), %v9591_v57  ;;  %v9673_v57 = vld [vmem:[#allocation11 + $0x1a0] ss:$16 sps:$4 sm:$0xff] (%p2964_p0)  }
 0x254   : > { %6345 = vmatprep.subr.bf16.mxu1 (%p2964_p0), %v9593_v58  ;;  %v9674_v58 = vld [vmem:[#allocation11 + $0x3a0] ss:$16 sps:$4 sm:$0xff] (%p2964_p0)  }
 0x255   : > { %2819 = vmatmul.mubr.bf16.vlgmr.msra.gmra.mrb[16].mxu0 %v11330_v20  ;;  %2860 = vmatmul.mubr.bf16.vlgmr.msra.gmra.mrb[16].mxu1 %v11330_v20 }
 0x268   : > { %v2574_v60 = vpop.f32.mrb[4].mxu0  ;;  %v2615_v61 = vpop.f32.mrb[4].mxu1 }
 0x269   : > { %v2576_v62 = vpop.f32.mrb[5].mxu0  ;;  %v2617_v63 = vpop.f32.mrb[5].mxu1 }
 0x26a   : > { %v2884_v0 = vcombine.low %v2574_v60, %v2576_v62  ;;  %v2885_v59 = vcombine.low %v2615_v61, %v2617_v63  ;;  %v2578_v1 = vpop.f32.mrb[6].mxu0  ;;  %v2619_v2 = vpop.f32.mrb[6].mxu1  ;;  %v9595_v60 = vld [vmem:[#allocation11] ss:$16 sps:$4 sm:$0xff] (%p2964_p0)   ;;  %v9597_v62 = vld [vmem:[#allocation11 + $0x24] ss:$16 sps:$4 sm:$0xff] (%p2964_p0)  }
 0x26b   : > { %v2579_v3 = vpop.f32.mrb[7].mxu0  ;;  %v2620_v4 = vpop.f32.mrb[7].mxu1  ;;  %v9596_v61 = vld [vmem:[#allocation11 + $0x200] ss:$16 sps:$4 sm:$0xff] (%p2964_p0)   ;;  %6305 = vmatpush1.bf16.msra.mxu0 (%p2964_p0), %v9595_v60  ;;  %v9599_v63 = vld [vmem:[#allocation11 + $0x224] ss:$16 sps:$4 sm:$0xff] (%p2964_p0)  }
 0x26c   : > { %v2892_v5 = vrot.slane %v2884_v0, %v11568_v34  ;;  %v2899_v6 = vrot.slane %v2885_v59, %v11568_v34  ;;  %6346 = vmatpush1.bf16.msra.mxu1 (%p2964_p0), %v9596_v61  ;;  %v9601_v0 = vld [vmem:[#allocation11 + $0x20] ss:$16 sps:$4 sm:$0xff] (%p2964_p0)   ;;  %6306 = vmatprep.subr.bf16.mxu0 (%p2964_p0), %v9597_v62  ;;  %v9603_v1 = vld [vmem:[#allocation11 + $0x44] ss:$16 sps:$4 sm:$0xff] (%p2964_p0)  }
 0x26d   : > { %v9602_v59 = vld [vmem:[#allocation11 + $0x220] ss:$16 sps:$4 sm:$0xff] (%p2964_p0)   ;;  %6347 = vmatprep.subr.bf16.mxu1 (%p2964_p0), %v9599_v63  ;;  %v9605_v2 = vld [vmem:[#allocation11 + $0x244] ss:$16 sps:$4 sm:$0xff] (%p2964_p0)  }
 0x26e   : > { %v2900_v8 = vcombine.low %v2892_v5, %v2899_v6  ;;  %v9607_v3 = vld [vmem:[#allocation11 + $0x40] ss:$16 sps:$4 sm:$0xff] (%p2964_p0)   ;;  %v9609_v5 = vld [vmem:[#allocation11 + $0x64] ss:$16 sps:$4 sm:$0xff] (%p2964_p0)  }
 0x26f   : > { %v9608_v4 = vld [vmem:[#allocation11 + $0x240] ss:$16 sps:$4 sm:$0xff] (%p2964_p0)   ;;  %6307 = vmatpush1.bf16.msra.mxu0 (%p2964_p0), %v9601_v0  ;;  %v9611_v6 = vld [vmem:[#allocation11 + $0x264] ss:$16 sps:$4 sm:$0xff] (%p2964_p0)  }
 0x270   : > { %v2956_v9 = vadd.f32 %v2900_v8, %v1000_v7  ;;  %6348 = vmatpush1.bf16.msra.mxu1 (%p2964_p0), %v9602_v59  ;;  %6308 = vmatprep.subr.bf16.mxu0 (%p2964_p0), %v9603_v1  ;;  %v9613_v7 = vld [vmem:[#allocation11 + $0x60] ss:$16 sps:$4 sm:$0xff] (%p2964_p0)   ;;  %v9675_v60 = vld [vmem:[#allocation11 + $0x1c4] ss:$16 sps:$4 sm:$0xff] (%p2964_p0)  }
 0x271   : > { %6349 = vmatprep.subr.bf16.mxu1 (%p2964_p0), %v9605_v2  ;;  %v9614_v8 = vld [vmem:[#allocation11 + $0x260] ss:$16 sps:$4 sm:$0xff] (%p2964_p0)   ;;  %v9677_v61 = vld [vmem:[#allocation11 + $0x3c4] ss:$16 sps:$4 sm:$0xff] (%p2964_p0)  }
 0x272   : > { %2960 = vst [vmem:[#allocation3] sm:$0xff] %v2956_v9  ;;  %v9615_v9 = vld [vmem:[#allocation11 + $0x84] ss:$16 sps:$4 sm:$0xff] (%p2964_p0)   ;;  %v9679_v62 = vld [vmem:[#allocation11 + $0x1c0] ss:$16 sps:$4 sm:$0xff] (%p2964_p0)  }
 0x273   : > { %6309 = vmatpush1.bf16.msra.mxu0 (%p2964_p0), %v9607_v3  ;;  %v9680_v63 = vld [vmem:[#allocation11 + $0x3c0] ss:$16 sps:$4 sm:$0xff] (%p2964_p0)   ;;  %v9681_v0 = vld [vmem:[#allocation11 + $0x1e4] ss:$16 sps:$4 sm:$0xff] (%p2964_p0)  }
 0x274   : > { %6350 = vmatpush1.bf16.msra.mxu1 (%p2964_p0), %v9608_v4  ;;  %6310 = vmatprep.subr.bf16.mxu0 (%p2964_p0), %v9609_v5  ;;  %v9683_v59 = vld [vmem:[#allocation11 + $0x3e4] ss:$16 sps:$4 sm:$0xff] (%p2964_p0)   ;;  %v9685_v1 = vld [vmem:[#allocation11 + $0x1e0] ss:$16 sps:$4 sm:$0xff] (%p2964_p0)  }
 0x275   : > { %6351 = vmatprep.subr.bf16.mxu1 (%p2964_p0), %v9611_v6  ;;  %v9686_v2 = vld [vmem:[#allocation11 + $0x3e0] ss:$16 sps:$4 sm:$0xff] (%p2964_p0)   ;;  %v9690_v3 = vld [vmem:[#allocation11 + $0x404] ss:$16 sps:$4 sm:$0xff] (%p2964_p0)  }
 0x276   : > { %v9693_v4 = vld [vmem:[#allocation11 + $0x604] ss:$16 sps:$4 sm:$0xff] (%p2964_p0)  }
 0x277   : > { %6311 = vmatpush1.bf16.msra.mxu0 (%p2964_p0), %v9613_v7  ;;  %v9688_v7 = vld [vmem:[#allocation11 + $0x400] ss:$16 sps:$4 sm:$0xff] (%p2964_p0)  }
 0x278   : > { %6352 = vmatpush1.bf16.msra.mxu1 (%p2964_p0), %v9614_v8  ;;  %6312 = vmatprep.subr.bf16.mxu0 (%p2964_p0), %v9615_v9  ;;  %v9691_v8 = vld [vmem:[#allocation11 + $0x600] ss:$16 sps:$4 sm:$0xff] (%p2964_p0)   ;;  %v9696_v9 = vld [vmem:[#allocation11 + $0x424] ss:$16 sps:$4 sm:$0xff] (%p2964_p0)  }
 0x2a8   : > { %v2656_v10 = vpop.f32.mrb[8].mxu0  ;;  %v2697_v20 = vpop.f32.mrb[8].mxu1 }
 0x2a9   : > { %v2658_v11 = vpop.f32.mrb[9].mxu0  ;;  %v2699_v12 = vpop.f32.mrb[9].mxu1 }
 0x2aa   : > { %v2901_v13 = vcombine.low %v2656_v10, %v2658_v11  ;;  %v2902_v14 = vcombine.low %v2697_v20, %v2699_v12  ;;  %v2660_v15 = vpop.f32.mrb[10].mxu0  ;;  %v2701_v16 = vpop.f32.mrb[10].mxu1  ;;  %v9617_v10 = vld [vmem:[#allocation11 + $0x284] ss:$16 sps:$4 sm:$0xff] (%p2964_p0)   ;;  %v9619_v20 = vld [vmem:[#allocation11 + $0x80] ss:$16 sps:$4 sm:$0xff] (%p2964_p0)  }
 0x2ab   : > { %v2661_v17 = vpop.f32.mrb[11].mxu0  ;;  %v2702_v18 = vpop.f32.mrb[11].mxu1  ;;  %v9620_v11 = vld [vmem:[#allocation11 + $0x280] ss:$16 sps:$4 sm:$0xff] (%p2964_p0)   ;;  %v9621_v12 = vld [vmem:[#allocation11 + $0xa4] ss:$16 sps:$4 sm:$0xff] (%p2964_p0)   ;;  %6353 = vmatprep.subr.bf16.mxu1 (%p2964_p0), %v9617_v10  ;;  %6313 = vmatpush1.bf16.msra.mxu0 (%p2964_p0), %v9619_v20 }
 0x2ac   : > { %v2909_v19 = vrot.slane %v2901_v13, %v11568_v34  ;;  %v2916_v21 = vrot.slane %v2902_v14, %v11568_v34  ;;  %v9623_v13 = vld [vmem:[#allocation11 + $0x2a4] ss:$16 sps:$4 sm:$0xff] (%p2964_p0)   ;;  %v9625_v14 = vld [vmem:[#allocation11 + $0xa0] ss:$16 sps:$4 sm:$0xff] (%p2964_p0)   ;;  %6354 = vmatpush1.bf16.msra.mxu1 (%p2964_p0), %v9620_v11  ;;  %6314 = vmatprep.subr.bf16.mxu0 (%p2964_p0), %v9621_v12 }
 0x2ad   : > { %v9626_v15 = vld [vmem:[#allocation11 + $0x2a0] ss:$16 sps:$4 sm:$0xff] (%p2964_p0)   ;;  %v9627_v16 = vld [vmem:[#allocation11 + $0xc4] ss:$16 sps:$4 sm:$0xff] (%p2964_p0)   ;;  %6355 = vmatprep.subr.bf16.mxu1 (%p2964_p0), %v9623_v13 }
 0x2ae   : > { %v2917_v23 = vcombine.low %v2909_v19, %v2916_v21  ;;  %v9629_v17 = vld [vmem:[#allocation11 + $0x2c4] ss:$16 sps:$4 sm:$0xff] (%p2964_p0)   ;;  %v9631_v18 = vld [vmem:[#allocation11 + $0xc0] ss:$16 sps:$4 sm:$0xff] (%p2964_p0)  }
 0x2af   : > { %v9632_v19 = vld [vmem:[#allocation11 + $0x2c0] ss:$16 sps:$4 sm:$0xff] (%p2964_p0)   ;;  %6315 = vmatpush1.bf16.msra.mxu0 (%p2964_p0), %v9625_v14  ;;  %v9633_v21 = vld [vmem:[#allocation11 + $0xe4] ss:$16 sps:$4 sm:$0xff] (%p2964_p0)  }
 0x2b0   : > { %v2957_v24 = vadd.f32 %v2917_v23, %v1001_v22  ;;  %6356 = vmatpush1.bf16.msra.mxu1 (%p2964_p0), %v9626_v15  ;;  %6316 = vmatprep.subr.bf16.mxu0 (%p2964_p0), %v9627_v16  ;;  %v9635_v22 = vld [vmem:[#allocation11 + $0x2e4] ss:$16 sps:$4 sm:$0xff] (%p2964_p0)   ;;  %v9637_v23 = vld [vmem:[#allocation11 + $0xe0] ss:$16 sps:$4 sm:$0xff] (%p2964_p0)  }
 0x2b1   : > { %6357 = vmatprep.subr.bf16.mxu1 (%p2964_p0), %v9629_v17  ;;  %v9699_v10 = vld [vmem:[#allocation11 + $0x624] ss:$16 sps:$4 sm:$0xff] (%p2964_p0)   ;;  %v9694_v20 = vld [vmem:[#allocation11 + $0x420] ss:$16 sps:$4 sm:$0xff] (%p2964_p0)  }
 0x2b2   : > { %2961 = vst [vmem:[#allocation3 + $0x8] sm:$0xff] %v2957_v24  ;;  %v9638_v24 = vld [vmem:[#allocation11 + $0x2e0] ss:$16 sps:$4 sm:$0xff] (%p2964_p0)   ;;  %v9702_v12 = vld [vmem:[#allocation11 + $0x444] ss:$16 sps:$4 sm:$0xff] (%p2964_p0)  }
 0x2b3   : > { %6317 = vmatpush1.bf16.msra.mxu0 (%p2964_p0), %v9631_v18  ;;  %v9697_v11 = vld [vmem:[#allocation11 + $0x620] ss:$16 sps:$4 sm:$0xff] (%p2964_p0)   ;;  %v9705_v13 = vld [vmem:[#allocation11 + $0x644] ss:$16 sps:$4 sm:$0xff] (%p2964_p0)  }
 0x2b4   : > { %6358 = vmatpush1.bf16.msra.mxu1 (%p2964_p0), %v9632_v19  ;;  %6318 = vmatprep.subr.bf16.mxu0 (%p2964_p0), %v9633_v21  ;;  %v9700_v14 = vld [vmem:[#allocation11 + $0x440] ss:$16 sps:$4 sm:$0xff] (%p2964_p0)   ;;  %v9708_v16 = vld [vmem:[#allocation11 + $0x464] ss:$16 sps:$4 sm:$0xff] (%p2964_p0)  }
 0x2b5   : > { %6359 = vmatprep.subr.bf16.mxu1 (%p2964_p0), %v9635_v22  ;;  %v9703_v15 = vld [vmem:[#allocation11 + $0x640] ss:$16 sps:$4 sm:$0xff] (%p2964_p0)   ;;  %v9711_v17 = vld [vmem:[#allocation11 + $0x664] ss:$16 sps:$4 sm:$0xff] (%p2964_p0)  }
 0x2b6   : > { %v9706_v18 = vld [vmem:[#allocation11 + $0x460] ss:$16 sps:$4 sm:$0xff] (%p2964_p0)   ;;  %v9714_v21 = vld [vmem:[#allocation11 + $0x484] ss:$16 sps:$4 sm:$0xff] (%p2964_p0)  }
 0x2b7   : > { %6319 = vmatpush1.bf16.msra.mxu0 (%p2964_p0), %v9637_v23  ;;  %v9709_v19 = vld [vmem:[#allocation11 + $0x660] ss:$16 sps:$4 sm:$0xff] (%p2964_p0)   ;;  %v9717_v22 = vld [vmem:[#allocation11 + $0x684] ss:$16 sps:$4 sm:$0xff] (%p2964_p0)  }
 0x2b8   : > { %6360 = vmatpush1.bf16.msra.mxu1 (%p2964_p0), %v9638_v24  ;;  %v9712_v23 = vld [vmem:[#allocation11 + $0x480] ss:$16 sps:$4 sm:$0xff] (%p2964_p0)  }
 0x2b9   : > { %v9715_v24 = vld [vmem:[#allocation11 + $0x680] ss:$16 sps:$4 sm:$0xff] (%p2964_p0)  }
 0x2e8   : > { %v2738_v25 = vpop.f32.mrb[12].mxu0  ;;  %v2779_v26 = vpop.f32.mrb[12].mxu1 }
 0x2e9   : > { %v2740_v27 = vpop.f32.mrb[13].mxu0  ;;  %v2781_v28 = vpop.f32.mrb[13].mxu1 }
 0x2ea   : > { %v2918_v29 = vcombine.low %v2738_v25, %v2740_v27  ;;  %v2919_v30 = vcombine.low %v2779_v26, %v2781_v28  ;;  %v2742_v31 = vpop.f32.mrb[14].mxu0  ;;  %v2783_v32 = vpop.f32.mrb[14].mxu1  ;;  %v9639_v25 = vld [vmem:[#allocation11 + $0x104] ss:$16 sps:$4 sm:$0xff] (%p2964_p0)   ;;  %v9643_v27 = vld [vmem:[#allocation11 + $0x100] ss:$16 sps:$4 sm:$0xff] (%p2964_p0)  }
 0x2eb   : > { %v2743_v33 = vpop.f32.mrb[15].mxu0  ;;  %v2784_v35 = vpop.f32.mrb[15].mxu1  ;;  %v9641_v26 = vld [vmem:[#allocation11 + $0x304] ss:$16 sps:$4 sm:$0xff] (%p2964_p0)   ;;  %v9644_v28 = vld [vmem:[#allocation11 + $0x300] ss:$16 sps:$4 sm:$0xff] (%p2964_p0)   ;;  %6320 = vmatprep.subr.bf16.mxu0 (%p2964_p0), %v9639_v25 }
 0x2ec   : > { %v2926_v36 = vrot.slane %v2918_v29, %v11568_v34  ;;  %v2933_v37 = vrot.slane %v2919_v30, %v11568_v34  ;;  %v9645_v29 = vld [vmem:[#allocation11 + $0x124] ss:$16 sps:$4 sm:$0xff] (%p2964_p0)   ;;  %6361 = vmatprep.subr.bf16.mxu1 (%p2964_p0), %v9641_v26  ;;  %v9649_v31 = vld [vmem:[#allocation11 + $0x120] ss:$16 sps:$4 sm:$0xff] (%p2964_p0)   ;;  %6321 = vmatpush1.bf16.msra.mxu0 (%p2964_p0), %v9643_v27 }
 0x2ed   : > { %v9647_v30 = vld [vmem:[#allocation11 + $0x324] ss:$16 sps:$4 sm:$0xff] (%p2964_p0)   ;;  %6362 = vmatpush1.bf16.msra.mxu1 (%p2964_p0), %v9644_v28  ;;  %v9650_v32 = vld [vmem:[#allocation11 + $0x320] ss:$16 sps:$4 sm:$0xff] (%p2964_p0)   ;;  %6322 = vmatprep.subr.bf16.mxu0 (%p2964_p0), %v9645_v29 }
 0x2ee   : > { %v2934_v39 = vcombine.low %v2926_v36, %v2933_v37  ;;  %v9651_v33 = vld [vmem:[#allocation11 + $0x144] ss:$16 sps:$4 sm:$0xff] (%p2964_p0)   ;;  %6363 = vmatprep.subr.bf16.mxu1 (%p2964_p0), %v9647_v30  ;;  %v9655_v36 = vld [vmem:[#allocation11 + $0x140] ss:$16 sps:$4 sm:$0xff] (%p2964_p0)  }
 0x2ef   : > { %v9653_v35 = vld [vmem:[#allocation11 + $0x344] ss:$16 sps:$4 sm:$0xff] (%p2964_p0)   ;;  %v9656_v37 = vld [vmem:[#allocation11 + $0x340] ss:$16 sps:$4 sm:$0xff] (%p2964_p0)  }
 0x2f0   : > { %v2958_v40 = vadd.f32 %v2934_v39, %v1002_v38  ;;  %6323 = vmatpush1.bf16.msra.mxu0 (%p2964_p0), %v9649_v31  ;;  %v9657_v38 = vld [vmem:[#allocation11 + $0x164] ss:$16 sps:$4 sm:$0xff] (%p2964_p0)   ;;  %v9718_v27 = vld [vmem:[#allocation11 + $0x4a0] ss:$16 sps:$4 sm:$0xff] (%p2964_p0)  }
 0x2f1   : > { %6364 = vmatpush1.bf16.msra.mxu1 (%p2964_p0), %v9650_v32  ;;  %6324 = vmatprep.subr.bf16.mxu0 (%p2964_p0), %v9651_v33  ;;  %v9659_v39 = vld [vmem:[#allocation11 + $0x364] ss:$16 sps:$4 sm:$0xff] (%p2964_p0)   ;;  %v9721_v28 = vld [vmem:[#allocation11 + $0x6a0] ss:$16 sps:$4 sm:$0xff] (%p2964_p0)  }
 0x2f2   : > { %2962 = vst [vmem:[#allocation3 + $0x10] sm:$0xff] %v2958_v40  ;;  %6365 = vmatprep.subr.bf16.mxu1 (%p2964_p0), %v9653_v35  ;;  %v2996_v40 = vld [vmem:[#allocation3] sm:$0xff] (%p2964_p0)  ;;  %v9720_v25 = vld [vmem:[#allocation11 + $0x4a4] ss:$16 sps:$4 sm:$0xff] (%p2964_p0)  }
 0x2f3   : > { %v9723_v26 = vld [vmem:[#allocation11 + $0x6a4] ss:$16 sps:$4 sm:$0xff] (%p2964_p0)   ;;  %v9724_v35 = vld [vmem:[#allocation11 + $0x4c0] ss:$16 sps:$4 sm:$0xff] (%p2964_p0)  }
 0x2f4   : > { %6325 = vmatpush1.bf16.msra.mxu0 (%p2964_p0), %v9655_v36  ;;  %v9726_v29 = vld [vmem:[#allocation11 + $0x4c4] ss:$16 sps:$4 sm:$0xff] (%p2964_p0)   ;;  %v9727_v36 = vld [vmem:[#allocation11 + $0x6c0] ss:$16 sps:$4 sm:$0xff] (%p2964_p0)  }
 0x2f5   : > { %6366 = vmatpush1.bf16.msra.mxu1 (%p2964_p0), %v9656_v37  ;;  %6326 = vmatprep.subr.bf16.mxu0 (%p2964_p0), %v9657_v38  ;;  %v9729_v30 = vld [vmem:[#allocation11 + $0x6c4] ss:$16 sps:$4 sm:$0xff] (%p2964_p0)  }
 0x2f6   : > { %6367 = vmatprep.subr.bf16.mxu1 (%p2964_p0), %v9659_v39  ;;  %v2997_v31 = vld [vmem:[#allocation3 + $0x8] sm:$0xff] (%p2964_p0) }
 0x2f7   : > { %v11632_v32 = vrot.slane (%p2964_p0), %v2997_v31, %v11568_v34  ;;  %v3021_v33 = vcombine.high (%p2964_p0), %v2997_v31, %v2997_v31  ;;  %v9732_v39 = vld [vmem:[#allocation11 + $0x4e4] ss:$16 sps:$4 sm:$0xff] (%p2964_p0)  }
 0x2f9   : > { %v3036_v37 = vcombine.high (%p2964_p0), %v11632_v32, %v11632_v32  ;;  %v11637_v38 = vrot.slane (%p2964_p0), %v3021_v33, %v11568_v34  ;;  %v9794_v33 = vld [vmem:[#allocation11 + $0xa20] ss:$16 sps:$4 sm:$0xff] (%p2964_p0)  }
 0x328   : > { %v2820_v41 = vpop.f32.mrb[16].mxu0  ;;  %v2861_v42 = vpop.f32.mrb[16].mxu1 }
 0x329   : > { %v2822_v43 = vpop.f32.mrb[17].mxu0  ;;  %v2863_v44 = vpop.f32.mrb[17].mxu1 }
 0x32a   : > { %v2935_v45 = vcombine.low %v2820_v41, %v2822_v43  ;;  %v2936_v46 = vcombine.low %v2861_v42, %v2863_v44  ;;  %v2824_v48 = vpop.f32.mrb[18].mxu0  ;;  %v2865_v49 = vpop.f32.mrb[18].mxu1  ;;  %v9661_v41 = vld [vmem:[#allocation11 + $0x160] ss:$16 sps:$4 sm:$0xff] (%p2964_p0)   ;;  %v3011_v42 = vrot.slane (%p2964_p0), %v2996_v40, %v11568_v34  ;;  %v3004_v43 = vcombine.high (%p2964_p0), %v2996_v40, %v2996_v40  ;;  %v9735_v40 = vld [vmem:[#allocation11 + $0x6e4] ss:$16 sps:$4 sm:$0xff] (%p2964_p0)  }
 0x32b   : > { %v2825_v50 = vpop.f32.mrb[19].mxu0  ;;  %v2866_v51 = vpop.f32.mrb[19].mxu1  ;;  %v9662_v44 = vld [vmem:[#allocation11 + $0x360] ss:$16 sps:$4 sm:$0xff] (%p2964_p0)   ;;  %6327 = vmatpush1.bf16.msra.mxu0 (%p2964_p0), %v9661_v41  ;;  %v11639_v41 = vpack.c.bf16 (%p2964_p0), %v3036_v37, %v3036_v37 }
 0x32c   : > { %v2943_v52 = vrot.slane %v2935_v45, %v11568_v34  ;;  %v2950_v53 = vrot.slane %v2936_v46, %v11568_v34  ;;  %2968 = sbr.rel (!%p2964_p0) target bundleno = 1846 (0x736), region = 92  ;;  %v9663_v45 = vld [vmem:[#allocation11 + $0x184] ss:$16 sps:$4 sm:$0xff] (%p2964_p0)   ;;  %v3019_v48 = vcombine.high (%p2964_p0), %v3011_v42, %v3011_v42  ;;  %v3018_v49 = vrot.slane (%p2964_p0), %v3004_v43, %v11568_v34  ;;  %v9667_v50 = vld [vmem:[#allocation11 + $0x180] ss:$16 sps:$4 sm:$0xff] (%p2964_p0)   ;;  %6368 = vmatpush1.bf16.msra.mxu1 (%p2964_p0), %v9662_v44 }
 0x32d   : > { %v9665_v46 = vld [vmem:[#allocation11 + $0x384] ss:$16 sps:$4 sm:$0xff] (%p2964_p0)   ;;  %6328 = vmatprep.subr.bf16.mxu0 (%p2964_p0), %v9663_v45  ;;  %v11625_v5 = vpack.c.bf16 (%p2964_p0), %v3011_v42, %v3011_v42  ;;  %v3037_v42 = vcombine.high (%p2964_p0), %v11637_v38, %v11637_v38  ;;  %v9730_v43 = vld [vmem:[#allocation11 + $0x4e0] ss:$16 sps:$4 sm:$0xff] (%p2964_p0)  }
 0x32e   : > { %v2951_v55 = vcombine.low %v2943_v52, %v2950_v53  ;;  %v11619_v51 = vpack.c.bf16 (%p2964_p0), %v3019_v48, %v3019_v48  ;;  %v3020_v52 = vcombine.high (%p2964_p0), %v3018_v49, %v3018_v49  ;;  %v9668_v53 = vld [vmem:[#allocation11 + $0x380] ss:$16 sps:$4 sm:$0xff] (%p2964_p0)   ;;  %6369 = vmatprep.subr.bf16.mxu1 (%p2964_p0), %v9665_v46  ;;  %v11627_v6 = vpack.c.bf16 (%p2964_p0), %v3018_v49, %v3018_v49  ;;  %v9738_v46 = vld [vmem:[#allocation11 + $0x504] ss:$16 sps:$4 sm:$0xff] (%p2964_p0)  }
 0x32f   : > { %6329 = vmatpush1.bf16.msra.mxu0 (%p2964_p0), %v9667_v50  ;;  %v9733_v44 = vld [vmem:[#allocation11 + $0x6e0] ss:$16 sps:$4 sm:$0xff] (%p2964_p0)   ;;  %v11643_v45 = vpack.c.bf16 (%p2964_p0), %v3037_v42, %v3037_v42  ;;  %v9741_v48 = vld [vmem:[#allocation11 + $0x704] ss:$16 sps:$4 sm:$0xff] (%p2964_p0)  }
 0x330   : > { %v2959_v56 = vadd.f32 %v2951_v55, %v1003_v54  ;;  %v9669_v54 = vld [vmem:[#allocation11 + $0x1a4] ss:$16 sps:$4 sm:$0xff] (%p2964_p0)   ;;  %6336 = vmatprep.mubr.bf16.mxu0 (%p2964_p0), %v11619_v51  ;;  %6370 = vmatpush1.bf16.msra.mxu1 (%p2964_p0), %v9668_v53  ;;  %v9736_v49 = vld [vmem:[#allocation11 + $0x500] ss:$16 sps:$4 sm:$0xff] (%p2964_p0)  }
 0x331   : > { %v9671_v55 = vld [vmem:[#allocation11 + $0x3a4] ss:$16 sps:$4 sm:$0xff] (%p2964_p0)   ;;  %6330 = vmatprep.subr.bf16.mxu0 (%p2964_p0), %v9669_v54  ;;  %v9739_v50 = vld [vmem:[#allocation11 + $0x700] ss:$16 sps:$4 sm:$0xff] (%p2964_p0)  }
 0x332   : > { %2963 = vst [vmem:[#allocation3 + $0x18] sm:$0xff] %v2959_v56  ;;  %v11621_v56 = vpack.c.bf16 (%p2964_p0), %v3020_v52, %v3020_v52  ;;  %6371 = vmatprep.subr.bf16.mxu1 (%p2964_p0), %v9671_v55  ;;  %v9744_v52 = vld [vmem:[#allocation11 + $0x524] ss:$16 sps:$4 sm:$0xff] (%p2964_p0)   ;;  %v9742_v54 = vld [vmem:[#allocation11 + $0x520] ss:$16 sps:$4 sm:$0xff] (%p2964_p0)  }
 0x333   : > { %6331 = vmatpush1.bf16.msra.mxu0 %v9673_v57  ;;  %v9747_v53 = vld [vmem:[#allocation11 + $0x724] ss:$16 sps:$4 sm:$0xff]   ;;  %v9745_v55 = vld [vmem:[#allocation11 + $0x720] ss:$16 sps:$4 sm:$0xff]  }
 0x334   : > { %6377 = vmatprep.mubr.bf16.mxu1 %v11621_v56  ;;  %6372 = vmatpush1.bf16.msra.mxu1 %v9674_v58  ;;  %v9750_v57 = vld [vmem:[#allocation11 + $0x544] ss:$16 sps:$4 sm:$0xff]   ;;  %v9800_v42 = vld [vmem:[#allocation11 + $0xa40] ss:$16 sps:$4 sm:$0xff]  }
 0x335   : > { %6332 = vmatprep.subr.bf16.mxu0 %v9675_v60  ;;  %6373 = vmatprep.subr.bf16.mxu1 %v9677_v61  ;;  %v9753_v58 = vld [vmem:[#allocation11 + $0x744] ss:$16 sps:$4 sm:$0xff]   ;;  %v9748_v60 = vld [vmem:[#allocation11 + $0x540] ss:$16 sps:$4 sm:$0xff]  }
 0x336   : > { %v9751_v61 = vld [vmem:[#allocation11 + $0x740] ss:$16 sps:$4 sm:$0xff]  }
 0x337   : > { %6333 = vmatpush1.bf16.msra.mxu0 %v9679_v62  ;;  %v9756_v62 = vld [vmem:[#allocation11 + $0x564] ss:$16 sps:$4 sm:$0xff]  }
 0x338   : > { %6374 = vmatpush1.bf16.msra.mxu1 %v9680_v63  ;;  %6334 = vmatprep.subr.bf16.mxu0 %v9681_v0  ;;  %v9759_v63 = vld [vmem:[#allocation11 + $0x764] ss:$16 sps:$4 sm:$0xff]   ;;  %v9754_v0 = vld [vmem:[#allocation11 + $0x560] ss:$16 sps:$4 sm:$0xff]  }
 0x339   : > { %6375 = vmatprep.subr.bf16.mxu1 %v9683_v59  ;;  %v9757_v59 = vld [vmem:[#allocation11 + $0x760] ss:$16 sps:$4 sm:$0xff]  }
 0x33b   : > { %6335 = vmatpush1.bf16.msra.mxu0 %v9685_v1  ;;  %v9762_v1 = vld [vmem:[#allocation11 + $0x584] ss:$16 sps:$4 sm:$0xff]  }
 0x33c   : > { %6376 = vmatpush1.bf16.msra.mxu1 %v9686_v2  ;;  %6386 = vmatprep.subr.bf16.mxu0 %v9690_v3  ;;  %v9765_v2 = vld [vmem:[#allocation11 + $0x784] ss:$16 sps:$4 sm:$0xff]   ;;  %v9760_v3 = vld [vmem:[#allocation11 + $0x580] ss:$16 sps:$4 sm:$0xff]  }
 0x33d   : > { %6427 = vmatprep.subr.bf16.mxu1 %v9693_v4  ;;  %v9763_v4 = vld [vmem:[#allocation11 + $0x780] ss:$16 sps:$4 sm:$0xff]  }
 0x33e   : > { %6337 = vmatmul.mubr.bf16.vlgmr.msra.gmra.mrb[0].mxu0 %v11625_v5 }
 0x33f   : > { %6378 = vmatmul.mubr.bf16.vlgmr.msra.gmra.mrb[0].mxu1 %v11627_v6  ;;  %6387 = vmatpush1.bf16.msra.mxu0 %v9688_v7  ;;  %v9768_v7 = vld [vmem:[#allocation11 + $0x5a4] ss:$16 sps:$4 sm:$0xff]  }
 0x340   : > { %6428 = vmatpush1.bf16.msra.mxu1 %v9691_v8  ;;  %6388 = vmatprep.subr.bf16.mxu0 %v9696_v9  ;;  %v9771_v8 = vld [vmem:[#allocation11 + $0x7a4] ss:$16 sps:$4 sm:$0xff]   ;;  %v9766_v9 = vld [vmem:[#allocation11 + $0x5a0] ss:$16 sps:$4 sm:$0xff]  }
 0x341   : > { %6429 = vmatprep.subr.bf16.mxu1 %v9699_v10  ;;  %6418 = vmatprep.mubr.bf16.mxu0 %v11639_v41  ;;  %v9769_v10 = vld [vmem:[#allocation11 + $0x7a0] ss:$16 sps:$4 sm:$0xff]  }
 0x342   : > { %6459 = vmatprep.mubr.bf16.mxu1 %v11643_v45 }
 0x343   : > { %6389 = vmatpush1.bf16.msra.mxu0 %v9694_v20  ;;  %v9774_v20 = vld [vmem:[#allocation11 + $0x5c4] ss:$16 sps:$4 sm:$0xff]  }
 0x344   : > { %6430 = vmatpush1.bf16.msra.mxu1 %v9697_v11  ;;  %6390 = vmatprep.subr.bf16.mxu0 %v9702_v12  ;;  %v9777_v11 = vld [vmem:[#allocation11 + $0x7c4] ss:$16 sps:$4 sm:$0xff]   ;;  %v9772_v12 = vld [vmem:[#allocation11 + $0x5c0] ss:$16 sps:$4 sm:$0xff]  }
 0x345   : > { %6431 = vmatprep.subr.bf16.mxu1 %v9705_v13  ;;  %v9775_v13 = vld [vmem:[#allocation11 + $0x7c0] ss:$16 sps:$4 sm:$0xff]  }
 0x347   : > { %6391 = vmatpush1.bf16.msra.mxu0 %v9700_v14  ;;  %v9780_v14 = vld [vmem:[#allocation11 + $0x5e4] ss:$16 sps:$4 sm:$0xff]  }
 0x348   : > { %6432 = vmatpush1.bf16.msra.mxu1 %v9703_v15  ;;  %6392 = vmatprep.subr.bf16.mxu0 %v9708_v16  ;;  %v9783_v15 = vld [vmem:[#allocation11 + $0x7e4] ss:$16 sps:$4 sm:$0xff]   ;;  %v9778_v16 = vld [vmem:[#allocation11 + $0x5e0] ss:$16 sps:$4 sm:$0xff]  }
 0x349   : > { %6433 = vmatprep.subr.bf16.mxu1 %v9711_v17  ;;  %v9781_v17 = vld [vmem:[#allocation11 + $0x7e0] ss:$16 sps:$4 sm:$0xff]  }
 0x34b   : > { %6393 = vmatpush1.bf16.msra.mxu0 %v9706_v18  ;;  %v9787_v18 = vld [vmem:[#allocation11 + $0x804] ss:$16 sps:$4 sm:$0xff]  }
 0x34c   : > { %6434 = vmatpush1.bf16.msra.mxu1 %v9709_v19  ;;  %6394 = vmatprep.subr.bf16.mxu0 %v9714_v21  ;;  %v9790_v19 = vld [vmem:[#allocation11 + $0xa04] ss:$16 sps:$4 sm:$0xff]   ;;  %v11649_v21 = vpack.c.bf16 %v11632_v32, %v11632_v32 }
 0x34d   : > { %6435 = vmatprep.subr.bf16.mxu1 %v9717_v22  ;;  %v11653_v22 = vpack.c.bf16 %v11637_v38, %v11637_v38 }
 0x34f   : > { %6395 = vmatpush1.bf16.msra.mxu0 %v9712_v23  ;;  %v9785_v23 = vld [vmem:[#allocation11 + $0x800] ss:$16 sps:$4 sm:$0xff]  }
 0x350   : > { %6436 = vmatpush1.bf16.msra.mxu1 %v9715_v24  ;;  %6396 = vmatprep.subr.bf16.mxu0 %v9720_v25  ;;  %v9788_v24 = vld [vmem:[#allocation11 + $0xa00] ss:$16 sps:$4 sm:$0xff]   ;;  %v9793_v25 = vld [vmem:[#allocation11 + $0x824] ss:$16 sps:$4 sm:$0xff]  }
 0x351   : > { %6437 = vmatprep.subr.bf16.mxu1 %v9723_v26  ;;  %v2998_v26 = vld [vmem:[#allocation3 + $0x10] sm:$0xff] }
 0x353   : > { %6397 = vmatpush1.bf16.msra.mxu0 %v9718_v27  ;;  %v9796_v27 = vld [vmem:[#allocation11 + $0xa24] ss:$16 sps:$4 sm:$0xff]  }
 0x354   : > { %6438 = vmatpush1.bf16.msra.mxu1 %v9721_v28  ;;  %6398 = vmatprep.subr.bf16.mxu0 %v9726_v29  ;;  %v11656_v28 = vrot.slane %v2998_v26, %v11568_v34  ;;  %v3038_v29 = vcombine.high %v2998_v26, %v2998_v26  ;;  %v9860_v26 = vld [vmem:[#allocation11 + $0xb80] ss:$16 sps:$4 sm:$0xff]  }
 0x355   : > { %6439 = vmatprep.subr.bf16.mxu1 %v9729_v30  ;;  %v9791_v30 = vld [vmem:[#allocation11 + $0x820] ss:$16 sps:$4 sm:$0xff]  }
 0x356   : > { %v3053_v31 = vcombine.high %v11656_v28, %v11656_v28  ;;  %v11663_v32 = vrot.slane %v3038_v29, %v11568_v34  ;;  %v9868_v29 = vld [vmem:[#allocation11 + $0xba4] ss:$16 sps:$4 sm:$0xff]  }
 0x357   : > { %6399 = vmatpush1.bf16.msra.mxu0 %v9724_v35  ;;  %v9799_v35 = vld [vmem:[#allocation11 + $0x844] ss:$16 sps:$4 sm:$0xff]  }
 0x358   : > { %6440 = vmatpush1.bf16.msra.mxu1 %v9727_v36  ;;  %6400 = vmatprep.subr.bf16.mxu0 %v9732_v39  ;;  %v9802_v36 = vld [vmem:[#allocation11 + $0xa44] ss:$16 sps:$4 sm:$0xff]   ;;  %v11665_v37 = vpack.c.bf16 %v3053_v31, %v3053_v31  ;;  %v3054_v38 = vcombine.high %v11663_v32, %v11663_v32  ;;  %v9797_v39 = vld [vmem:[#allocation11 + $0x840] ss:$16 sps:$4 sm:$0xff]  }
 0x359   : > { %6441 = vmatprep.subr.bf16.mxu1 %v9735_v40  ;;  %v9866_v31 = vld [vmem:[#allocation11 + $0xba0] ss:$16 sps:$4 sm:$0xff]  }
 0x35a   : > { %v11670_v40 = vpack.c.bf16 %v3054_v38, %v3054_v38 }
 0x35b   : > { %6401 = vmatpush1.bf16.msra.mxu0 %v9730_v43  ;;  %v9805_v43 = vld [vmem:[#allocation11 + $0x864] ss:$16 sps:$4 sm:$0xff]  }
 0x35c   : > { %6442 = vmatpush1.bf16.msra.mxu1 %v9733_v44  ;;  %6402 = vmatprep.subr.bf16.mxu0 %v9738_v46  ;;  %v9808_v44 = vld [vmem:[#allocation11 + $0xa64] ss:$16 sps:$4 sm:$0xff]   ;;  %v9803_v46 = vld [vmem:[#allocation11 + $0x860] ss:$16 sps:$4 sm:$0xff]  }
 0x35d   : > { %6443 = vmatprep.subr.bf16.mxu1 %v9741_v48  ;;  %v9806_v48 = vld [vmem:[#allocation11 + $0xa60] ss:$16 sps:$4 sm:$0xff]  }
 0x35f   : > { %6403 = vmatpush1.bf16.msra.mxu0 %v9736_v49  ;;  %v9811_v49 = vld [vmem:[#allocation11 + $0x884] ss:$16 sps:$4 sm:$0xff]  }
 0x360   : > { %6444 = vmatpush1.bf16.msra.mxu1 %v9739_v50  ;;  %6404 = vmatprep.subr.bf16.mxu0 %v9744_v52  ;;  %v9814_v50 = vld [vmem:[#allocation11 + $0xa84] ss:$16 sps:$4 sm:$0xff]   ;;  %v9809_v52 = vld [vmem:[#allocation11 + $0x880] ss:$16 sps:$4 sm:$0xff]  }
 0x361   : > { %6445 = vmatprep.subr.bf16.mxu1 %v9747_v53  ;;  %v9812_v53 = vld [vmem:[#allocation11 + $0xa80] ss:$16 sps:$4 sm:$0xff]  }
 0x363   : > { %6405 = vmatpush1.bf16.msra.mxu0 %v9742_v54  ;;  %v9817_v54 = vld [vmem:[#allocation11 + $0x8a4] ss:$16 sps:$4 sm:$0xff]  }
 0x364   : > { %6446 = vmatpush1.bf16.msra.mxu1 %v9745_v55  ;;  %6406 = vmatprep.subr.bf16.mxu0 %v9750_v57  ;;  %v9820_v55 = vld [vmem:[#allocation11 + $0xaa4] ss:$16 sps:$4 sm:$0xff]   ;;  %v9815_v57 = vld [vmem:[#allocation11 + $0x8a0] ss:$16 sps:$4 sm:$0xff]  }
 0x365   : > { %6447 = vmatprep.subr.bf16.mxu1 %v9753_v58  ;;  %v9818_v58 = vld [vmem:[#allocation11 + $0xaa0] ss:$16 sps:$4 sm:$0xff]  }
 0x367   : > { %6407 = vmatpush1.bf16.msra.mxu0 %v9748_v60  ;;  %v9823_v60 = vld [vmem:[#allocation11 + $0x8c4] ss:$16 sps:$4 sm:$0xff]  }
 0x368   : > { %6448 = vmatpush1.bf16.msra.mxu1 %v9751_v61  ;;  %6408 = vmatprep.subr.bf16.mxu0 %v9756_v62  ;;  %v9826_v61 = vld [vmem:[#allocation11 + $0xac4] ss:$16 sps:$4 sm:$0xff]   ;;  %v9821_v62 = vld [vmem:[#allocation11 + $0x8c0] ss:$16 sps:$4 sm:$0xff]  }
 0x369   : > { %6449 = vmatprep.subr.bf16.mxu1 %v9759_v63  ;;  %v9824_v63 = vld [vmem:[#allocation11 + $0xac0] ss:$16 sps:$4 sm:$0xff]  }
 0x36b   : > { %6409 = vmatpush1.bf16.msra.mxu0 %v9754_v0  ;;  %v9829_v0 = vld [vmem:[#allocation11 + $0x8e4] ss:$16 sps:$4 sm:$0xff]  }
 0x36c   : > { %6450 = vmatpush1.bf16.msra.mxu1 %v9757_v59  ;;  %6410 = vmatprep.subr.bf16.mxu0 %v9762_v1  ;;  %v9832_v59 = vld [vmem:[#allocation11 + $0xae4] ss:$16 sps:$4 sm:$0xff]   ;;  %v9827_v1 = vld [vmem:[#allocation11 + $0x8e0] ss:$16 sps:$4 sm:$0xff]  }
 0x36d   : > { %6451 = vmatprep.subr.bf16.mxu1 %v9765_v2  ;;  %v9830_v2 = vld [vmem:[#allocation11 + $0xae0] ss:$16 sps:$4 sm:$0xff]  }
 0x36f   : > { %6411 = vmatpush1.bf16.msra.mxu0 %v9760_v3  ;;  %v9835_v3 = vld [vmem:[#allocation11 + $0x904] ss:$16 sps:$4 sm:$0xff]  }
 0x370   : > { %6452 = vmatpush1.bf16.msra.mxu1 %v9763_v4  ;;  %6412 = vmatprep.subr.bf16.mxu0 %v9768_v7  ;;  %v9838_v4 = vld [vmem:[#allocation11 + $0xb04] ss:$16 sps:$4 sm:$0xff]   ;;  %v9833_v7 = vld [vmem:[#allocation11 + $0x900] ss:$16 sps:$4 sm:$0xff]  }
 0x371   : > { %6453 = vmatprep.subr.bf16.mxu1 %v9771_v8  ;;  %v9836_v8 = vld [vmem:[#allocation11 + $0xb00] ss:$16 sps:$4 sm:$0xff]  }
 0x373   : > { %6413 = vmatpush1.bf16.msra.mxu0 %v9766_v9  ;;  %v9841_v9 = vld [vmem:[#allocation11 + $0x924] ss:$16 sps:$4 sm:$0xff]  }
 0x374   : > { %6454 = vmatpush1.bf16.msra.mxu1 %v9769_v10  ;;  %6414 = vmatprep.subr.bf16.mxu0 %v9774_v20  ;;  %v9844_v10 = vld [vmem:[#allocation11 + $0xb24] ss:$16 sps:$4 sm:$0xff]   ;;  %v9839_v20 = vld [vmem:[#allocation11 + $0x920] ss:$16 sps:$4 sm:$0xff]  }
 0x375   : > { %6455 = vmatprep.subr.bf16.mxu1 %v9777_v11  ;;  %v9842_v11 = vld [vmem:[#allocation11 + $0xb20] ss:$16 sps:$4 sm:$0xff]  }
 0x377   : > { %6415 = vmatpush1.bf16.msra.mxu0 %v9772_v12  ;;  %v9847_v12 = vld [vmem:[#allocation11 + $0x944] ss:$16 sps:$4 sm:$0xff]  }
 0x378   : > { %6456 = vmatpush1.bf16.msra.mxu1 %v9775_v13  ;;  %6416 = vmatprep.subr.bf16.mxu0 %v9780_v14  ;;  %v9850_v13 = vld [vmem:[#allocation11 + $0xb44] ss:$16 sps:$4 sm:$0xff]   ;;  %v9845_v14 = vld [vmem:[#allocation11 + $0x940] ss:$16 sps:$4 sm:$0xff]  }
 0x379   : > { %6457 = vmatprep.subr.bf16.mxu1 %v9783_v15  ;;  %v9848_v15 = vld [vmem:[#allocation11 + $0xb40] ss:$16 sps:$4 sm:$0xff]  }
 0x37b   : > { %6417 = vmatpush1.bf16.msra.mxu0 %v9778_v16  ;;  %v9853_v16 = vld [vmem:[#allocation11 + $0x964] ss:$16 sps:$4 sm:$0xff]  }
 0x37c   : > { %6458 = vmatpush1.bf16.msra.mxu1 %v9781_v17  ;;  %6468 = vmatprep.subr.bf16.mxu0 %v9787_v18  ;;  %v9856_v17 = vld [vmem:[#allocation11 + $0xb64] ss:$16 sps:$4 sm:$0xff]   ;;  %v9851_v18 = vld [vmem:[#allocation11 + $0x960] ss:$16 sps:$4 sm:$0xff]  }
 0x37d   : > { %6509 = vmatprep.subr.bf16.mxu1 %v9790_v19  ;;  %v9854_v19 = vld [vmem:[#allocation11 + $0xb60] ss:$16 sps:$4 sm:$0xff]  }
 0x37e   : > { %6419 = vmatmul.mubr.bf16.vlgmr.msra.gmra.mrb[4].mxu0 %v11649_v21 }
 0x37f   : > { %6460 = vmatmul.mubr.bf16.vlgmr.msra.gmra.mrb[4].mxu1 %v11653_v22  ;;  %6469 = vmatpush1.bf16.msra.mxu0 %v9785_v23  ;;  %v9859_v23 = vld [vmem:[#allocation11 + $0x984] ss:$16 sps:$4 sm:$0xff]  }
 0x380   : > { %6510 = vmatpush1.bf16.msra.mxu1 %v9788_v24  ;;  %6470 = vmatprep.subr.bf16.mxu0 %v9793_v25  ;;  %v9862_v24 = vld [vmem:[#allocation11 + $0xb84] ss:$16 sps:$4 sm:$0xff]   ;;  %v9857_v25 = vld [vmem:[#allocation11 + $0x980] ss:$16 sps:$4 sm:$0xff]  }
 0x381   : > { %6511 = vmatprep.subr.bf16.mxu1 %v9796_v27  ;;  %6500 = vmatprep.mubr.bf16.mxu0 %v11665_v37  ;;  %v9865_v27 = vld [vmem:[#allocation11 + $0x9a4] ss:$16 sps:$4 sm:$0xff]  }
 0x382   : > { %6541 = vmatprep.mubr.bf16.mxu1 %v11670_v40 }
 0x383   : > { %6471 = vmatpush1.bf16.msra.mxu0 %v9791_v30  ;;  %v9863_v30 = vld [vmem:[#allocation11 + $0x9a0] ss:$16 sps:$4 sm:$0xff]  }
 0x384   : > { %6512 = vmatpush1.bf16.msra.mxu1 %v9794_v33  ;;  %6472 = vmatprep.subr.bf16.mxu0 %v9799_v35  ;;  %v2999_v33 = vld [vmem:[#allocation3 + $0x18] sm:$0xff] }
 0x385   : > { %6513 = vmatprep.subr.bf16.mxu1 %v9802_v36  ;;  %v9871_v35 = vld [vmem:[#allocation11 + $0x9c4] ss:$16 sps:$4 sm:$0xff]   ;;  %v3055_v38 = vcombine.high %v2999_v33, %v2999_v33 }
 0x386   : > { %v9874_v36 = vld [vmem:[#allocation11 + $0xbc4] ss:$16 sps:$4 sm:$0xff]  }
 0x387   : > { %6473 = vmatpush1.bf16.msra.mxu0 %v9797_v39  ;;  %v9869_v39 = vld [vmem:[#allocation11 + $0x9c0] ss:$16 sps:$4 sm:$0xff]  }
 0x388   : > { %6514 = vmatpush1.bf16.msra.mxu1 %v9800_v42  ;;  %6474 = vmatprep.subr.bf16.mxu0 %v9805_v43  ;;  %v9872_v42 = vld [vmem:[#allocation11 + $0xbc0] ss:$16 sps:$4 sm:$0xff]   ;;  %v9877_v43 = vld [vmem:[#allocation11 + $0x9e4] ss:$16 sps:$4 sm:$0xff]  }
 0x389   : > { %6515 = vmatprep.subr.bf16.mxu1 %v9808_v44  ;;  %v9880_v44 = vld [vmem:[#allocation11 + $0xbe4] ss:$16 sps:$4 sm:$0xff]  }
 0x38b   : > { %6475 = vmatpush1.bf16.msra.mxu0 %v9803_v46  ;;  %v11674_v46 = vrot.slane %v2999_v33, %v11568_v34  ;;  %v9930_v33 = vld [vmem:[#allocation11 + $0xd00] ss:$16 sps:$4 sm:$0xff]  }
 0x38c   : > { %6516 = vmatpush1.bf16.msra.mxu1 %v9806_v48  ;;  %6476 = vmatprep.subr.bf16.mxu0 %v9811_v49  ;;  %v11677_v48 = vrot.slane %v3055_v38, %v11568_v34  ;;  %v9875_v49 = vld [vmem:[#allocation11 + $0x9e0] ss:$16 sps:$4 sm:$0xff]   ;;  %v9941_v38 = vld [vmem:[#allocation11 + $0xf24] ss:$16 sps:$4 sm:$0xff]  }
 0x38d   : > { %6517 = vmatprep.subr.bf16.mxu1 %v9814_v50  ;;  %v9878_v50 = vld [vmem:[#allocation11 + $0xbe0] ss:$16 sps:$4 sm:$0xff]  }
 0x38f   : > { %6477 = vmatpush1.bf16.msra.mxu0 %v9809_v52  ;;  %v9884_v52 = vld [vmem:[#allocation11 + $0xc04] ss:$16 sps:$4 sm:$0xff]  }
 0x390   : > { %6518 = vmatpush1.bf16.msra.mxu1 %v9812_v53  ;;  %6478 = vmatprep.subr.bf16.mxu0 %v9817_v54  ;;  %v9887_v53 = vld [vmem:[#allocation11 + $0xe04] ss:$16 sps:$4 sm:$0xff]   ;;  %v3070_v54 = vcombine.high %v11674_v46, %v11674_v46 }
 0x391   : > { %6519 = vmatprep.subr.bf16.mxu1 %v9820_v55  ;;  %v3071_v55 = vcombine.high %v11677_v48, %v11677_v48 }
 0x393   : > { %6479 = vmatpush1.bf16.msra.mxu0 %v9815_v57  ;;  %v11685_v57 = vpack.c.bf16 %v11656_v28, %v11656_v28  ;;  %v9888_v28 = vld [vmem:[#allocation11 + $0xc20] ss:$16 sps:$4 sm:$0xff]  }
 0x394   : > { %6520 = vmatpush1.bf16.msra.mxu1 %v9818_v58  ;;  %6480 = vmatprep.subr.bf16.mxu0 %v9823_v60  ;;  %v11689_v58 = vpack.c.bf16 %v11663_v32, %v11663_v32  ;;  %v9882_v60 = vld [vmem:[#allocation11 + $0xc00] ss:$16 sps:$4 sm:$0xff]   ;;  %v9896_v32 = vld [vmem:[#allocation11 + $0xc44] ss:$16 sps:$4 sm:$0xff]  }
 0x395   : > { %6521 = vmatprep.subr.bf16.mxu1 %v9826_v61  ;;  %v9885_v61 = vld [vmem:[#allocation11 + $0xe00] ss:$16 sps:$4 sm:$0xff]  }
 0x397   : > { %6481 = vmatpush1.bf16.msra.mxu0 %v9821_v62  ;;  %v9890_v62 = vld [vmem:[#allocation11 + $0xc24] ss:$16 sps:$4 sm:$0xff]  }
 0x398   : > { %6522 = vmatpush1.bf16.msra.mxu1 %v9824_v63  ;;  %6482 = vmatprep.subr.bf16.mxu0 %v9829_v0  ;;  %v9893_v63 = vld [vmem:[#allocation11 + $0xe24] ss:$16 sps:$4 sm:$0xff]   ;;  %v11691_v0 = vpack.c.bf16 %v3070_v54, %v3070_v54  ;;  %v9948_v54 = vld [vmem:[#allocation11 + $0xd60] ss:$16 sps:$4 sm:$0xff]  }
 0x399   : > { %6523 = vmatprep.subr.bf16.mxu1 %v9832_v59  ;;  %v11693_v59 = vpack.c.bf16 %v3071_v55, %v3071_v55  ;;  %v9951_v55 = vld [vmem:[#allocation11 + $0xf60] ss:$16 sps:$4 sm:$0xff]  }
 0x39b   : > { %6483 = vmatpush1.bf16.msra.mxu0 %v9827_v1  ;;  %v9891_v1 = vld [vmem:[#allocation11 + $0xe20] ss:$16 sps:$4 sm:$0xff]  }
 0x39c   : > { %6524 = vmatpush1.bf16.msra.mxu1 %v9830_v2  ;;  %6484 = vmatprep.subr.bf16.mxu0 %v9835_v3  ;;  %v9899_v2 = vld [vmem:[#allocation11 + $0xe44] ss:$16 sps:$4 sm:$0xff]   ;;  %v9894_v3 = vld [vmem:[#allocation11 + $0xc40] ss:$16 sps:$4 sm:$0xff]  }
 0x39d   : > { %6525 = vmatprep.subr.bf16.mxu1 %v9838_v4  ;;  %v9897_v4 = vld [vmem:[#allocation11 + $0xe40] ss:$16 sps:$4 sm:$0xff]  }
 0x39f   : > { %6485 = vmatpush1.bf16.msra.mxu0 %v9833_v7  ;;  %v9902_v7 = vld [vmem:[#allocation11 + $0xc64] ss:$16 sps:$4 sm:$0xff]  }
 0x3a0   : > { %6526 = vmatpush1.bf16.msra.mxu1 %v9836_v8  ;;  %6486 = vmatprep.subr.bf16.mxu0 %v9841_v9  ;;  %v9905_v8 = vld [vmem:[#allocation11 + $0xe64] ss:$16 sps:$4 sm:$0xff]   ;;  %v9900_v9 = vld [vmem:[#allocation11 + $0xc60] ss:$16 sps:$4 sm:$0xff]  }
 0x3a1   : > { %6527 = vmatprep.subr.bf16.mxu1 %v9844_v10  ;;  %v9903_v10 = vld [vmem:[#allocation11 + $0xe60] ss:$16 sps:$4 sm:$0xff]  }
 0x3a3   : > { %6487 = vmatpush1.bf16.msra.mxu0 %v9839_v20  ;;  %v9908_v20 = vld [vmem:[#allocation11 + $0xc84] ss:$16 sps:$4 sm:$0xff]  }
 0x3a4   : > { %6528 = vmatpush1.bf16.msra.mxu1 %v9842_v11  ;;  %6488 = vmatprep.subr.bf16.mxu0 %v9847_v12  ;;  %v9911_v11 = vld [vmem:[#allocation11 + $0xe84] ss:$16 sps:$4 sm:$0xff]   ;;  %v9906_v12 = vld [vmem:[#allocation11 + $0xc80] ss:$16 sps:$4 sm:$0xff]  }
 0x3a5   : > { %6529 = vmatprep.subr.bf16.mxu1 %v9850_v13  ;;  %v9909_v13 = vld [vmem:[#allocation11 + $0xe80] ss:$16 sps:$4 sm:$0xff]  }
 0x3a7   : > { %6489 = vmatpush1.bf16.msra.mxu0 %v9845_v14  ;;  %v9914_v14 = vld [vmem:[#allocation11 + $0xca4] ss:$16 sps:$4 sm:$0xff]  }
 0x3a8   : > { %6530 = vmatpush1.bf16.msra.mxu1 %v9848_v15  ;;  %6490 = vmatprep.subr.bf16.mxu0 %v9853_v16  ;;  %v9917_v15 = vld [vmem:[#allocation11 + $0xea4] ss:$16 sps:$4 sm:$0xff]   ;;  %v9912_v16 = vld [vmem:[#allocation11 + $0xca0] ss:$16 sps:$4 sm:$0xff]  }
 0x3a9   : > { %6531 = vmatprep.subr.bf16.mxu1 %v9856_v17  ;;  %v9915_v17 = vld [vmem:[#allocation11 + $0xea0] ss:$16 sps:$4 sm:$0xff]  }
 0x3ab   : > { %6491 = vmatpush1.bf16.msra.mxu0 %v9851_v18  ;;  %v9920_v18 = vld [vmem:[#allocation11 + $0xcc4] ss:$16 sps:$4 sm:$0xff]  }
 0x3ac   : > { %6532 = vmatpush1.bf16.msra.mxu1 %v9854_v19  ;;  %6492 = vmatprep.subr.bf16.mxu0 %v9859_v23  ;;  %v9923_v19 = vld [vmem:[#allocation11 + $0xec4] ss:$16 sps:$4 sm:$0xff]   ;;  %v9918_v23 = vld [vmem:[#allocation11 + $0xcc0] ss:$16 sps:$4 sm:$0xff]  }
 0x3ad   : > { %6533 = vmatprep.subr.bf16.mxu1 %v9862_v24  ;;  %v9921_v24 = vld [vmem:[#allocation11 + $0xec0] ss:$16 sps:$4 sm:$0xff]  }
 0x3af   : > { %6493 = vmatpush1.bf16.msra.mxu0 %v9857_v25  ;;  %v9926_v25 = vld [vmem:[#allocation11 + $0xce4] ss:$16 sps:$4 sm:$0xff]  }
 0x3b0   : > { %6534 = vmatpush1.bf16.msra.mxu1 %v9860_v26  ;;  %6494 = vmatprep.subr.bf16.mxu0 %v9865_v27  ;;  %v9929_v26 = vld [vmem:[#allocation11 + $0xee4] ss:$16 sps:$4 sm:$0xff]   ;;  %v9924_v27 = vld [vmem:[#allocation11 + $0xce0] ss:$16 sps:$4 sm:$0xff]  }
 0x3b1   : > { %6535 = vmatprep.subr.bf16.mxu1 %v9868_v29  ;;  %v9927_v29 = vld [vmem:[#allocation11 + $0xee0] ss:$16 sps:$4 sm:$0xff]  }
 0x3b3   : > { %6495 = vmatpush1.bf16.msra.mxu0 %v9863_v30  ;;  %v9932_v30 = vld [vmem:[#allocation11 + $0xd04] ss:$16 sps:$4 sm:$0xff]  }
 0x3b4   : > { %6536 = vmatpush1.bf16.msra.mxu1 %v9866_v31  ;;  %6496 = vmatprep.subr.bf16.mxu0 %v9871_v35  ;;  %v9935_v31 = vld [vmem:[#allocation11 + $0xf04] ss:$16 sps:$4 sm:$0xff]   ;;  %v9933_v35 = vld [vmem:[#allocation11 + $0xf00] ss:$16 sps:$4 sm:$0xff]  }
 0x3b5   : > { %6537 = vmatprep.subr.bf16.mxu1 %v9874_v36  ;;  %v9938_v36 = vld [vmem:[#allocation11 + $0xd24] ss:$16 sps:$4 sm:$0xff]  }
 0x3b7   : > { %6497 = vmatpush1.bf16.msra.mxu0 %v9869_v39  ;;  %v9936_v39 = vld [vmem:[#allocation11 + $0xd20] ss:$16 sps:$4 sm:$0xff]  }
 0x3b8   : > { %6538 = vmatpush1.bf16.msra.mxu1 %v9872_v42  ;;  %6498 = vmatprep.subr.bf16.mxu0 %v9877_v43  ;;  %v9939_v42 = vld [vmem:[#allocation11 + $0xf20] ss:$16 sps:$4 sm:$0xff]   ;;  %v9944_v43 = vld [vmem:[#allocation11 + $0xd44] ss:$16 sps:$4 sm:$0xff]  }
 0x3b9   : > { %6539 = vmatprep.subr.bf16.mxu1 %v9880_v44  ;;  %v9947_v44 = vld [vmem:[#allocation11 + $0xf44] ss:$16 sps:$4 sm:$0xff]  }
 0x3bb   : > { %6499 = vmatpush1.bf16.msra.mxu0 %v9875_v49  ;;  %v9942_v49 = vld [vmem:[#allocation11 + $0xd40] ss:$16 sps:$4 sm:$0xff]  }
 0x3bc   : > { %6540 = vmatpush1.bf16.msra.mxu1 %v9878_v50  ;;  %6550 = vmatprep.subr.bf16.mxu0 %v9884_v52  ;;  %v9945_v50 = vld [vmem:[#allocation11 + $0xf40] ss:$16 sps:$4 sm:$0xff]   ;;  %v9950_v52 = vld [vmem:[#allocation11 + $0xd64] ss:$16 sps:$4 sm:$0xff]  }
 0x3bd   : > { %6591 = vmatprep.subr.bf16.mxu1 %v9887_v53  ;;  %v9953_v53 = vld [vmem:[#allocation11 + $0xf64] ss:$16 sps:$4 sm:$0xff]  }
 0x3be   : > { %6501 = vmatmul.mubr.bf16.vlgmr.msra.gmra.mrb[8].mxu0 %v11685_v57 }
 0x3bf   : > { %6542 = vmatmul.mubr.bf16.vlgmr.msra.gmra.mrb[8].mxu1 %v11689_v58  ;;  %6551 = vmatpush1.bf16.msra.mxu0 %v9882_v60  ;;  %v9956_v60 = vld [vmem:[#allocation11 + $0xd84] ss:$16 sps:$4 sm:$0xff]  }
 0x3c0   : > { %6592 = vmatpush1.bf16.msra.mxu1 %v9885_v61  ;;  %6552 = vmatprep.subr.bf16.mxu0 %v9890_v62  ;;  %v9959_v61 = vld [vmem:[#allocation11 + $0xf84] ss:$16 sps:$4 sm:$0xff]   ;;  %v9954_v62 = vld [vmem:[#allocation11 + $0xd80] ss:$16 sps:$4 sm:$0xff]  }
 0x3c1   : > { %6593 = vmatprep.subr.bf16.mxu1 %v9893_v63  ;;  %6582 = vmatprep.mubr.bf16.mxu0 %v11691_v0  ;;  %v9957_v63 = vld [vmem:[#allocation11 + $0xf80] ss:$16 sps:$4 sm:$0xff]  }
 0x3c2   : > { %6623 = vmatprep.mubr.bf16.mxu1 %v11693_v59 }
 0x3c3   : > { %6553 = vmatpush1.bf16.msra.mxu0 %v9888_v28  ;;  %v9962_v28 = vld [vmem:[#allocation11 + $0xda4] ss:$16 sps:$4 sm:$0xff]  }
 0x3c4   : > { %6594 = vmatpush1.bf16.msra.mxu1 %v9891_v1  ;;  %6554 = vmatprep.subr.bf16.mxu0 %v9896_v32  ;;  %v9965_v1 = vld [vmem:[#allocation11 + $0xfa4] ss:$16 sps:$4 sm:$0xff]   ;;  %v9960_v32 = vld [vmem:[#allocation11 + $0xda0] ss:$16 sps:$4 sm:$0xff]  }
 0x3c5   : > { %6595 = vmatprep.subr.bf16.mxu1 %v9899_v2  ;;  %v9963_v2 = vld [vmem:[#allocation11 + $0xfa0] ss:$16 sps:$4 sm:$0xff]  }
 0x3c7   : > { %6555 = vmatpush1.bf16.msra.mxu0 %v9894_v3  ;;  %v9968_v3 = vld [vmem:[#allocation11 + $0xdc4] ss:$16 sps:$4 sm:$0xff]  }
 0x3c8   : > { %6596 = vmatpush1.bf16.msra.mxu1 %v9897_v4  ;;  %6556 = vmatprep.subr.bf16.mxu0 %v9902_v7  ;;  %v9971_v4 = vld [vmem:[#allocation11 + $0xfc4] ss:$16 sps:$4 sm:$0xff]   ;;  %v9966_v7 = vld [vmem:[#allocation11 + $0xdc0] ss:$16 sps:$4 sm:$0xff]  }
 0x3c9   : > { %6597 = vmatprep.subr.bf16.mxu1 %v9905_v8  ;;  %v9969_v8 = vld [vmem:[#allocation11 + $0xfc0] ss:$16 sps:$4 sm:$0xff]  }
 0x3cb   : > { %6557 = vmatpush1.bf16.msra.mxu0 %v9900_v9  ;;  %v9974_v9 = vld [vmem:[#allocation11 + $0xde4] ss:$16 sps:$4 sm:$0xff]  }
 0x3cc   : > { %6598 = vmatpush1.bf16.msra.mxu1 %v9903_v10  ;;  %6558 = vmatprep.subr.bf16.mxu0 %v9908_v20  ;;  %v9977_v10 = vld [vmem:[#allocation11 + $0xfe4] ss:$16 sps:$4 sm:$0xff]   ;;  %v9972_v20 = vld [vmem:[#allocation11 + $0xde0] ss:$16 sps:$4 sm:$0xff]  }
 0x3cd   : > { %6599 = vmatprep.subr.bf16.mxu1 %v9911_v11  ;;  %v9975_v11 = vld [vmem:[#allocation11 + $0xfe0] ss:$16 sps:$4 sm:$0xff]  }
 0x3cf   : > { %6559 = vmatpush1.bf16.msra.mxu0 %v9906_v12  ;;  %v9981_v12 = vld [vmem:[#allocation11 + $0xc] ss:$16 sps:$4 sm:$0xff]  }
 0x3d0   : > { %6600 = vmatpush1.bf16.msra.mxu1 %v9909_v13  ;;  %6560 = vmatprep.subr.bf16.mxu0 %v9914_v14  ;;  %v9984_v13 = vld [vmem:[#allocation11 + $0x20c] ss:$16 sps:$4 sm:$0xff]   ;;  %v11701_v14 = vpack.c.bf16 %v11674_v46, %v11674_v46 }
 0x3d1   : > { %6601 = vmatprep.subr.bf16.mxu1 %v9917_v15  ;;  %v11705_v15 = vpack.c.bf16 %v11677_v48, %v11677_v48  ;;  %v9993_v46 = vld [vmem:[#allocation11 + $0x4c] ss:$16 sps:$4 sm:$0xff]  }
 0x3d2   : > { %v9996_v48 = vld [vmem:[#allocation11 + $0x24c] ss:$16 sps:$4 sm:$0xff]  }
 0x3d3   : > { %6561 = vmatpush1.bf16.msra.mxu0 %v9912_v16  ;;  %v9979_v16 = vld [vmem:[#allocation11 + $0x8] ss:$16 sps:$4 sm:$0xff]  }
 0x3d4   : > { %6602 = vmatpush1.bf16.msra.mxu1 %v9915_v17  ;;  %6562 = vmatprep.subr.bf16.mxu0 %v9920_v18  ;;  %v9982_v17 = vld [vmem:[#allocation11 + $0x208] ss:$16 sps:$4 sm:$0xff]   ;;  %v9987_v18 = vld [vmem:[#allocation11 + $0x2c] ss:$16 sps:$4 sm:$0xff]  }
 0x3d5   : > { %6603 = vmatprep.subr.bf16.mxu1 %v9923_v19  ;;  %v9990_v19 = vld [vmem:[#allocation11 + $0x22c] ss:$16 sps:$4 sm:$0xff]  }
 0x3d7   : > { %6563 = vmatpush1.bf16.msra.mxu0 %v9918_v23  ;;  %v9985_v23 = vld [vmem:[#allocation11 + $0x28] ss:$16 sps:$4 sm:$0xff]  }
 0x3d8   : > { %6604 = vmatpush1.bf16.msra.mxu1 %v9921_v24  ;;  %6564 = vmatprep.subr.bf16.mxu0 %v9926_v25  ;;  %v9988_v24 = vld [vmem:[#allocation11 + $0x228] ss:$16 sps:$4 sm:$0xff]  }
 0x3d9   : > { %6605 = vmatprep.subr.bf16.mxu1 %v9929_v26  ;;  %v9991_v25 = vld [vmem:[#allocation11 + $0x48] ss:$16 sps:$4 sm:$0xff]  }
 0x3da   : > { %v9994_v26 = vld [vmem:[#allocation11 + $0x248] ss:$16 sps:$4 sm:$0xff]  }
 0x3db   : > { %6565 = vmatpush1.bf16.msra.mxu0 %v9924_v27  ;;  %v9999_v27 = vld [vmem:[#allocation11 + $0x6c] ss:$16 sps:$4 sm:$0xff]  }
 0x3dc   : > { %6606 = vmatpush1.bf16.msra.mxu1 %v9927_v29  ;;  %6566 = vmatprep.subr.bf16.mxu0 %v9932_v30  ;;  %v10002_v29 = vld [vmem:[#allocation11 + $0x26c] ss:$16 sps:$4 sm:$0xff]   ;;  %v9997_v30 = vld [vmem:[#allocation11 + $0x68] ss:$16 sps:$4 sm:$0xff]  }
 0x3dd   : > { %6607 = vmatprep.subr.bf16.mxu1 %v9935_v31  ;;  %v10000_v31 = vld [vmem:[#allocation11 + $0x268] ss:$16 sps:$4 sm:$0xff]  }
 0x3df   : > { %6567 = vmatpush1.bf16.msra.mxu0 %v9930_v33  ;;  %v10005_v33 = vld [vmem:[#allocation11 + $0x8c] ss:$16 sps:$4 sm:$0xff]  }
 0x3e0   : > { %6608 = vmatpush1.bf16.msra.mxu1 %v9933_v35  ;;  %6568 = vmatprep.subr.bf16.mxu0 %v9938_v36  ;;  %v10008_v35 = vld [vmem:[#allocation11 + $0x28c] ss:$16 sps:$4 sm:$0xff]  }
 0x3e1   : > { %6609 = vmatprep.subr.bf16.mxu1 %v9941_v38  ;;  %v10011_v36 = vld [vmem:[#allocation11 + $0xac] ss:$16 sps:$4 sm:$0xff]  }
 0x3e2   : > { %v10014_v38 = vld [vmem:[#allocation11 + $0x2ac] ss:$16 sps:$4 sm:$0xff]  }
 0x3e3   : > { %6569 = vmatpush1.bf16.msra.mxu0 %v9936_v39  ;;  %v10009_v39 = vld [vmem:[#allocation11 + $0xa8] ss:$16 sps:$4 sm:$0xff]  }
 0x3e4   : > { %6610 = vmatpush1.bf16.msra.mxu1 %v9939_v42  ;;  %6570 = vmatprep.subr.bf16.mxu0 %v9944_v43  ;;  %v10012_v42 = vld [vmem:[#allocation11 + $0x2a8] ss:$16 sps:$4 sm:$0xff]   ;;  %v10017_v43 = vld [vmem:[#allocation11 + $0xcc] ss:$16 sps:$4 sm:$0xff]  }
 0x3e5   : > { %6611 = vmatprep.subr.bf16.mxu1 %v9947_v44  ;;  %v10020_v44 = vld [vmem:[#allocation11 + $0x2cc] ss:$16 sps:$4 sm:$0xff]  }
 0x3e7   : > { %6571 = vmatpush1.bf16.msra.mxu0 %v9942_v49 }
 0x3e8   : > { %6612 = vmatpush1.bf16.msra.mxu1 %v9945_v50  ;;  %6572 = vmatprep.subr.bf16.mxu0 %v9950_v52  ;;  %v10015_v52 = vld [vmem:[#allocation11 + $0xc8] ss:$16 sps:$4 sm:$0xff]  }
 0x3e9   : > { %6613 = vmatprep.subr.bf16.mxu1 %v9953_v53  ;;  %v10018_v53 = vld [vmem:[#allocation11 + $0x2c8] ss:$16 sps:$4 sm:$0xff]  }
 0x3eb   : > { %6573 = vmatpush1.bf16.msra.mxu0 %v9948_v54 }
 0x3ec   : > { %6614 = vmatpush1.bf16.msra.mxu1 %v9951_v55  ;;  %6574 = vmatprep.subr.bf16.mxu0 %v9956_v60 }
 0x3ed   : > { %6615 = vmatprep.subr.bf16.mxu1 %v9959_v61 }
 0x3ef   : > { %6575 = vmatpush1.bf16.msra.mxu0 %v9954_v62 }
 0x3f0   : > { %6616 = vmatpush1.bf16.msra.mxu1 %v9957_v63  ;;  %6576 = vmatprep.subr.bf16.mxu0 %v9962_v28 }
 0x3f1   : > { %6617 = vmatprep.subr.bf16.mxu1 %v9965_v1 }
 0x3f3   : > { %6577 = vmatpush1.bf16.msra.mxu0 %v9960_v32  ;;  %v10023_v32 = vld [vmem:[#allocation11 + $0xec] ss:$16 sps:$4 sm:$0xff]  }
 0x3f4   : > { %6618 = vmatpush1.bf16.msra.mxu1 %v9963_v2  ;;  %6578 = vmatprep.subr.bf16.mxu0 %v9968_v3  ;;  %v10026_v2 = vld [vmem:[#allocation11 + $0x2ec] ss:$16 sps:$4 sm:$0xff]   ;;  %v10021_v3 = vld [vmem:[#allocation11 + $0xe8] ss:$16 sps:$4 sm:$0xff]  }
 0x3f5   : > { %6619 = vmatprep.subr.bf16.mxu1 %v9971_v4  ;;  %v10024_v4 = vld [vmem:[#allocation11 + $0x2e8] ss:$16 sps:$4 sm:$0xff]  }
 0x3f7   : > { %6579 = vmatpush1.bf16.msra.mxu0 %v9966_v7  ;;  %v10029_v7 = vld [vmem:[#allocation11 + $0x10c] ss:$16 sps:$4 sm:$0xff]  }
 0x3f8   : > { %6620 = vmatpush1.bf16.msra.mxu1 %v9969_v8  ;;  %6580 = vmatprep.subr.bf16.mxu0 %v9974_v9  ;;  %v10032_v8 = vld [vmem:[#allocation11 + $0x30c] ss:$16 sps:$4 sm:$0xff]   ;;  %v10027_v9 = vld [vmem:[#allocation11 + $0x108] ss:$16 sps:$4 sm:$0xff]  }
 0x3f9   : > { %6621 = vmatprep.subr.bf16.mxu1 %v9977_v10  ;;  %v10030_v10 = vld [vmem:[#allocation11 + $0x308] ss:$16 sps:$4 sm:$0xff]  }
 0x3fb   : > { %6581 = vmatpush1.bf16.msra.mxu0 %v9972_v20  ;;  %v10035_v20 = vld [vmem:[#allocation11 + $0x12c] ss:$16 sps:$4 sm:$0xff]  }
 0x3fc   : > { %6622 = vmatpush1.bf16.msra.mxu1 %v9975_v11  ;;  %6632 = vmatprep.subr.bf16.mxu0 %v9981_v12  ;;  %v10038_v11 = vld [vmem:[#allocation11 + $0x32c] ss:$16 sps:$4 sm:$0xff]   ;;  %v10033_v12 = vld [vmem:[#allocation11 + $0x128] ss:$16 sps:$4 sm:$0xff]  }
 0x3fd   : > { %6673 = vmatprep.subr.bf16.mxu1 %v9984_v13  ;;  %v10036_v13 = vld [vmem:[#allocation11 + $0x328] ss:$16 sps:$4 sm:$0xff]  }
 0x3fe   : > { %6583 = vmatmul.mubr.bf16.vlgmr.msra.gmra.mrb[12].mxu0 %v11701_v14 }
 0x3ff   : > { %6624 = vmatmul.mubr.bf16.vlgmr.msra.gmra.mrb[12].mxu1 %v11705_v15  ;;  %6633 = vmatpush1.bf16.msra.mxu0 %v9979_v16  ;;  %v10041_v16 = vld [vmem:[#allocation11 + $0x14c] ss:$16 sps:$4 sm:$0xff]  }
 0x400   : > { %6674 = vmatpush1.bf16.msra.mxu1 %v9982_v17  ;;  %6634 = vmatprep.subr.bf16.mxu0 %v9987_v18  ;;  %v10044_v17 = vld [vmem:[#allocation11 + $0x34c] ss:$16 sps:$4 sm:$0xff]   ;;  %v10039_v18 = vld [vmem:[#allocation11 + $0x148] ss:$16 sps:$4 sm:$0xff]  }
 0x401   : > { %6675 = vmatprep.subr.bf16.mxu1 %v9990_v19  ;;  %6664 = vmatprep.mubr.bf16.mxu0 %v11619_v51  ;;  %v10003_v51 = vld [vmem:[#allocation11 + $0x88] ss:$16 sps:$4 sm:$0xff]  }
 0x402   : > { %6705 = vmatprep.mubr.bf16.mxu1 %v11621_v56  ;;  %v10006_v56 = vld [vmem:[#allocation11 + $0x288] ss:$16 sps:$4 sm:$0xff]  }
 0x403   : > { %6635 = vmatpush1.bf16.msra.mxu0 %v9985_v23  ;;  %v10042_v19 = vld [vmem:[#allocation11 + $0x348] ss:$16 sps:$4 sm:$0xff]   ;;  %v10047_v23 = vld [vmem:[#allocation11 + $0x16c] ss:$16 sps:$4 sm:$0xff]  }
 0x404   : > { %6676 = vmatpush1.bf16.msra.mxu1 %v9988_v24  ;;  %6636 = vmatprep.subr.bf16.mxu0 %v9993_v46  ;;  %v10050_v24 = vld [vmem:[#allocation11 + $0x36c] ss:$16 sps:$4 sm:$0xff]   ;;  %v10045_v46 = vld [vmem:[#allocation11 + $0x168] ss:$16 sps:$4 sm:$0xff]  }
 0x405   : > { %6677 = vmatprep.subr.bf16.mxu1 %v9996_v48  ;;  %v10048_v48 = vld [vmem:[#allocation11 + $0x368] ss:$16 sps:$4 sm:$0xff]  }
 0x407   : > { %6637 = vmatpush1.bf16.msra.mxu0 %v9991_v25  ;;  %v10053_v25 = vld [vmem:[#allocation11 + $0x18c] ss:$16 sps:$4 sm:$0xff]  }
 0x408   : > { %6678 = vmatpush1.bf16.msra.mxu1 %v9994_v26  ;;  %6638 = vmatprep.subr.bf16.mxu0 %v9999_v27  ;;  %v10056_v26 = vld [vmem:[#allocation11 + $0x38c] ss:$16 sps:$4 sm:$0xff]   ;;  %v10051_v27 = vld [vmem:[#allocation11 + $0x188] ss:$16 sps:$4 sm:$0xff]  }
 0x409   : > { %6679 = vmatprep.subr.bf16.mxu1 %v10002_v29  ;;  %v10054_v29 = vld [vmem:[#allocation11 + $0x388] ss:$16 sps:$4 sm:$0xff]  }
 0x40b   : > { %6639 = vmatpush1.bf16.msra.mxu0 %v9997_v30  ;;  %v10059_v30 = vld [vmem:[#allocation11 + $0x1ac] ss:$16 sps:$4 sm:$0xff]  }
 0x40c   : > { %6680 = vmatpush1.bf16.msra.mxu1 %v10000_v31  ;;  %6640 = vmatprep.subr.bf16.mxu0 %v10005_v33  ;;  %v10062_v31 = vld [vmem:[#allocation11 + $0x3ac] ss:$16 sps:$4 sm:$0xff]   ;;  %v10057_v33 = vld [vmem:[#allocation11 + $0x1a8] ss:$16 sps:$4 sm:$0xff]  }
 0x40d   : > { %6681 = vmatprep.subr.bf16.mxu1 %v10008_v35  ;;  %v10060_v35 = vld [vmem:[#allocation11 + $0x3a8] ss:$16 sps:$4 sm:$0xff]  }
 0x40f   : > { %6641 = vmatpush1.bf16.msra.mxu0 %v10003_v51  ;;  %v10065_v51 = vld [vmem:[#allocation11 + $0x1cc] ss:$16 sps:$4 sm:$0xff]  }
 0x410   : > { %6682 = vmatpush1.bf16.msra.mxu1 %v10006_v56  ;;  %6642 = vmatprep.subr.bf16.mxu0 %v10011_v36  ;;  %v10068_v56 = vld [vmem:[#allocation11 + $0x3cc] ss:$16 sps:$4 sm:$0xff]   ;;  %v10063_v36 = vld [vmem:[#allocation11 + $0x1c8] ss:$16 sps:$4 sm:$0xff]  }
 0x411   : > { %6683 = vmatprep.subr.bf16.mxu1 %v10014_v38  ;;  %v6338_v49 = vpop.f32.mrb[0].mxu0  ;;  %v10066_v38 = vld [vmem:[#allocation11 + $0x3c8] ss:$16 sps:$4 sm:$0xff]  }
 0x412   : > { %v6379_v50 = vpop.f32.mrb[0].mxu1  ;;  %v6340_v55 = vpop.f32.mrb[1].mxu0 }
 0x413   : > { %v11711_v54 = vadd.f32 %v6379_v50, %v6338_v49  ;;  %v6381_v60 = vpop.f32.mrb[1].mxu1  ;;  %v6342_v62 = vpop.f32.mrb[2].mxu0  ;;  %6643 = vmatpush1.bf16.msra.mxu0 %v10009_v39  ;;  %v10071_v39 = vld [vmem:[#allocation11 + $0x1ec] ss:$16 sps:$4 sm:$0xff]  }
 0x414   : > { %v11713_v61 = vadd.f32 %v6381_v60, %v6340_v55  ;;  %v6383_v63 = vpop.f32.mrb[2].mxu1  ;;  %6684 = vmatpush1.bf16.msra.mxu1 %v10012_v42  ;;  %v6343_v28 = vpop.f32.mrb[3].mxu0  ;;  %6644 = vmatprep.subr.bf16.mxu0 %v10017_v43  ;;  %v10074_v42 = vld [vmem:[#allocation11 + $0x3ec] ss:$16 sps:$4 sm:$0xff]   ;;  %v10069_v43 = vld [vmem:[#allocation11 + $0x1e8] ss:$16 sps:$4 sm:$0xff]  }
 0x415   : > { %v6384_v1 = vpop.f32.mrb[3].mxu1  ;;  %6685 = vmatprep.subr.bf16.mxu1 %v10020_v44  ;;  %v10072_v44 = vld [vmem:[#allocation11 + $0x3e8] ss:$16 sps:$4 sm:$0xff]   ;;  %v10077_v49 = vld [vmem:[#allocation11 + $0x40c] ss:$16 sps:$4 sm:$0xff]  }
 0x416   : > { %v10080_v50 = vld [vmem:[#allocation11 + $0x60c] ss:$16 sps:$4 sm:$0xff]   ;;  %v10081_v62 = vld [vmem:[#allocation11 + $0x428] ss:$16 sps:$4 sm:$0xff]  }
 0x417   : > { %6645 = vmatpush1.bf16.msra.mxu0 %v10015_v52  ;;  %v10075_v52 = vld [vmem:[#allocation11 + $0x408] ss:$16 sps:$4 sm:$0xff]   ;;  %v10083_v55 = vld [vmem:[#allocation11 + $0x42c] ss:$16 sps:$4 sm:$0xff]  }
 0x418   : > { %6686 = vmatpush1.bf16.msra.mxu1 %v10018_v53  ;;  %6646 = vmatprep.subr.bf16.mxu0 %v10023_v32  ;;  %v10078_v53 = vld [vmem:[#allocation11 + $0x608] ss:$16 sps:$4 sm:$0xff]   ;;  %v10086_v60 = vld [vmem:[#allocation11 + $0x62c] ss:$16 sps:$4 sm:$0xff]  }
 0x419   : > { %6687 = vmatprep.subr.bf16.mxu1 %v10026_v2  ;;  %v10084_v63 = vld [vmem:[#allocation11 + $0x628] ss:$16 sps:$4 sm:$0xff]   ;;  %v10089_v28 = vld [vmem:[#allocation11 + $0x44c] ss:$16 sps:$4 sm:$0xff]  }
 0x41a   : > { %v10092_v1 = vld [vmem:[#allocation11 + $0x64c] ss:$16 sps:$4 sm:$0xff]   ;;  %v10087_v32 = vld [vmem:[#allocation11 + $0x448] ss:$16 sps:$4 sm:$0xff]  }
 0x41b   : > { %6647 = vmatpush1.bf16.msra.mxu0 %v10021_v3  ;;  %v10090_v2 = vld [vmem:[#allocation11 + $0x648] ss:$16 sps:$4 sm:$0xff]  }
 0x41c   : > { %6688 = vmatpush1.bf16.msra.mxu1 %v10024_v4  ;;  %6648 = vmatprep.subr.bf16.mxu0 %v10029_v7  ;;  %v10093_v3 = vld [vmem:[#allocation11 + $0x468] ss:$16 sps:$4 sm:$0xff]   ;;  %v10101_v7 = vld [vmem:[#allocation11 + $0x48c] ss:$16 sps:$4 sm:$0xff]  }
 0x41d   : > { %6689 = vmatprep.subr.bf16.mxu1 %v10032_v8  ;;  %v10096_v4 = vld [vmem:[#allocation11 + $0x668] ss:$16 sps:$4 sm:$0xff]   ;;  %v10104_v8 = vld [vmem:[#allocation11 + $0x68c] ss:$16 sps:$4 sm:$0xff]  }
 0x41f   : > { %6649 = vmatpush1.bf16.msra.mxu0 %v10027_v9  ;;  %v10107_v9 = vld [vmem:[#allocation11 + $0x4ac] ss:$16 sps:$4 sm:$0xff]  }
 0x420   : > { %6690 = vmatpush1.bf16.msra.mxu1 %v10030_v10  ;;  %6650 = vmatprep.subr.bf16.mxu0 %v10035_v20  ;;  %v10110_v10 = vld [vmem:[#allocation11 + $0x6ac] ss:$16 sps:$4 sm:$0xff]   ;;  %v10105_v20 = vld [vmem:[#allocation11 + $0x4a8] ss:$16 sps:$4 sm:$0xff]  }
 0x421   : > { %6691 = vmatprep.subr.bf16.mxu1 %v10038_v11  ;;  %v10108_v11 = vld [vmem:[#allocation11 + $0x6a8] ss:$16 sps:$4 sm:$0xff]  }
 0x423   : > { %6651 = vmatpush1.bf16.msra.mxu0 %v10033_v12  ;;  %v10113_v12 = vld [vmem:[#allocation11 + $0x4cc] ss:$16 sps:$4 sm:$0xff]  }
 0x424   : > { %6692 = vmatpush1.bf16.msra.mxu1 %v10036_v13  ;;  %6652 = vmatprep.subr.bf16.mxu0 %v10041_v16  ;;  %v10116_v13 = vld [vmem:[#allocation11 + $0x6cc] ss:$16 sps:$4 sm:$0xff]  }
 0x425   : > { %6693 = vmatprep.subr.bf16.mxu1 %v10044_v17 }
 0x427   : > { %6653 = vmatpush1.bf16.msra.mxu0 %v10039_v18  ;;  %v10111_v18 = vld [vmem:[#allocation11 + $0x4c8] ss:$16 sps:$4 sm:$0xff]  }
 0x428   : > { %6694 = vmatpush1.bf16.msra.mxu1 %v10042_v19  ;;  %6654 = vmatprep.subr.bf16.mxu0 %v10047_v23  ;;  %v10114_v19 = vld [vmem:[#allocation11 + $0x6c8] ss:$16 sps:$4 sm:$0xff]  }
 0x429   : > { %6695 = vmatprep.subr.bf16.mxu1 %v10050_v24 }
 0x42b   : > { %6655 = vmatpush1.bf16.msra.mxu0 %v10045_v46 }
 0x42c   : > { %6696 = vmatpush1.bf16.msra.mxu1 %v10048_v48  ;;  %6656 = vmatprep.subr.bf16.mxu0 %v10053_v25 }
 0x42d   : > { %6697 = vmatprep.subr.bf16.mxu1 %v10056_v26 }
 0x42f   : > { %6657 = vmatpush1.bf16.msra.mxu0 %v10051_v27 }
 0x430   : > { %6698 = vmatpush1.bf16.msra.mxu1 %v10054_v29  ;;  %6658 = vmatprep.subr.bf16.mxu0 %v10059_v30 }
 0x431   : > { %6699 = vmatprep.subr.bf16.mxu1 %v10062_v31  ;;  %v10119_v31 = vld [vmem:[#allocation11 + $0x4ec] ss:$16 sps:$4 sm:$0xff]  }
 0x433   : > { %6659 = vmatpush1.bf16.msra.mxu0 %v10057_v33  ;;  %v10122_v33 = vld [vmem:[#allocation11 + $0x6ec] ss:$16 sps:$4 sm:$0xff]  }
 0x434   : > { %6700 = vmatpush1.bf16.msra.mxu1 %v10060_v35  ;;  %6660 = vmatprep.subr.bf16.mxu0 %v10065_v51  ;;  %v10120_v51 = vld [vmem:[#allocation11 + $0x6e8] ss:$16 sps:$4 sm:$0xff]  }
 0x435   : > { %6701 = vmatprep.subr.bf16.mxu1 %v10068_v56  ;;  %v10128_v56 = vld [vmem:[#allocation11 + $0x70c] ss:$16 sps:$4 sm:$0xff]  }
 0x437   : > { %6661 = vmatpush1.bf16.msra.mxu0 %v10063_v36  ;;  %v10123_v36 = vld [vmem:[#allocation11 + $0x508] ss:$16 sps:$4 sm:$0xff]  }
 0x438   : > { %6702 = vmatpush1.bf16.msra.mxu1 %v10066_v38  ;;  %6662 = vmatprep.subr.bf16.mxu0 %v10071_v39  ;;  %v10126_v38 = vld [vmem:[#allocation11 + $0x708] ss:$16 sps:$4 sm:$0xff]   ;;  %v10131_v39 = vld [vmem:[#allocation11 + $0x52c] ss:$16 sps:$4 sm:$0xff]  }
 0x439   : > { %6703 = vmatprep.subr.bf16.mxu1 %v10074_v42  ;;  %v10134_v42 = vld [vmem:[#allocation11 + $0x72c] ss:$16 sps:$4 sm:$0xff]  }
 0x43b   : > { %6663 = vmatpush1.bf16.msra.mxu0 %v10069_v43  ;;  %v10129_v43 = vld [vmem:[#allocation11 + $0x528] ss:$16 sps:$4 sm:$0xff]  }
 0x43c   : > { %6704 = vmatpush1.bf16.msra.mxu1 %v10072_v44  ;;  %6714 = vmatprep.subr.bf16.mxu0 %v10077_v49  ;;  %v10132_v44 = vld [vmem:[#allocation11 + $0x728] ss:$16 sps:$4 sm:$0xff]   ;;  %v10137_v49 = vld [vmem:[#allocation11 + $0x54c] ss:$16 sps:$4 sm:$0xff]  }
 0x43d   : > { %6755 = vmatprep.subr.bf16.mxu1 %v10080_v50  ;;  %v10140_v50 = vld [vmem:[#allocation11 + $0x74c] ss:$16 sps:$4 sm:$0xff]  }
 0x43e   : > { %6665 = vmatmul.mubr.bf16.vlgmr.msra.gmra.mrb[16].mxu0 %v11625_v5  ;;  %v10095_v5 = vld [vmem:[#allocation11 + $0x46c] ss:$16 sps:$4 sm:$0xff]  }
 0x43f   : > { %6706 = vmatmul.mubr.bf16.vlgmr.msra.gmra.mrb[16].mxu1 %v11627_v6  ;;  %6715 = vmatpush1.bf16.msra.mxu0 %v10075_v52  ;;  %v10098_v6 = vld [vmem:[#allocation11 + $0x66c] ss:$16 sps:$4 sm:$0xff]   ;;  %v10135_v52 = vld [vmem:[#allocation11 + $0x548] ss:$16 sps:$4 sm:$0xff]  }
 0x440   : > { %6756 = vmatpush1.bf16.msra.mxu1 %v10078_v53  ;;  %6716 = vmatprep.subr.bf16.mxu0 %v10083_v55  ;;  %v10138_v53 = vld [vmem:[#allocation11 + $0x748] ss:$16 sps:$4 sm:$0xff]   ;;  %v10143_v55 = vld [vmem:[#allocation11 + $0x56c] ss:$16 sps:$4 sm:$0xff]  }
 0x441   : > { %6757 = vmatprep.subr.bf16.mxu1 %v10086_v60  ;;  %6746 = vmatprep.mubr.bf16.mxu0 %v11639_v41  ;;  %v10099_v41 = vld [vmem:[#allocation11 + $0x488] ss:$16 sps:$4 sm:$0xff]   ;;  %v10146_v60 = vld [vmem:[#allocation11 + $0x76c] ss:$16 sps:$4 sm:$0xff]  }
 0x442   : > { %6787 = vmatprep.mubr.bf16.mxu1 %v11643_v45  ;;  %v10102_v45 = vld [vmem:[#allocation11 + $0x688] ss:$16 sps:$4 sm:$0xff]  }
 0x443   : > { %6717 = vmatpush1.bf16.msra.mxu0 %v10081_v62  ;;  %v10141_v62 = vld [vmem:[#allocation11 + $0x568] ss:$16 sps:$4 sm:$0xff]  }
 0x444   : > { %6758 = vmatpush1.bf16.msra.mxu1 %v10084_v63  ;;  %6718 = vmatprep.subr.bf16.mxu0 %v10089_v28  ;;  %v10144_v63 = vld [vmem:[#allocation11 + $0x768] ss:$16 sps:$4 sm:$0xff]   ;;  %v10149_v28 = vld [vmem:[#allocation11 + $0x58c] ss:$16 sps:$4 sm:$0xff]  }
 0x445   : > { %6759 = vmatprep.subr.bf16.mxu1 %v10092_v1  ;;  %v10152_v1 = vld [vmem:[#allocation11 + $0x78c] ss:$16 sps:$4 sm:$0xff]  }
 0x447   : > { %6719 = vmatpush1.bf16.msra.mxu0 %v10087_v32  ;;  %v10147_v32 = vld [vmem:[#allocation11 + $0x588] ss:$16 sps:$4 sm:$0xff]  }
 0x448   : > { %6760 = vmatpush1.bf16.msra.mxu1 %v10090_v2  ;;  %6720 = vmatprep.subr.bf16.mxu0 %v10095_v5  ;;  %v10150_v2 = vld [vmem:[#allocation11 + $0x788] ss:$16 sps:$4 sm:$0xff]   ;;  %v10155_v5 = vld [vmem:[#allocation11 + $0x5ac] ss:$16 sps:$4 sm:$0xff]  }
 0x449   : > { %6761 = vmatprep.subr.bf16.mxu1 %v10098_v6  ;;  %v10158_v6 = vld [vmem:[#allocation11 + $0x7ac] ss:$16 sps:$4 sm:$0xff]  }
 0x44b   : > { %6721 = vmatpush1.bf16.msra.mxu0 %v10093_v3  ;;  %v10153_v3 = vld [vmem:[#allocation11 + $0x5a8] ss:$16 sps:$4 sm:$0xff]  }
 0x44c   : > { %6762 = vmatpush1.bf16.msra.mxu1 %v10096_v4  ;;  %6722 = vmatprep.subr.bf16.mxu0 %v10101_v7  ;;  %v10156_v4 = vld [vmem:[#allocation11 + $0x7a8] ss:$16 sps:$4 sm:$0xff]   ;;  %v10161_v7 = vld [vmem:[#allocation11 + $0x5cc] ss:$16 sps:$4 sm:$0xff]  }
 0x44d   : > { %6763 = vmatprep.subr.bf16.mxu1 %v10104_v8  ;;  %v10164_v8 = vld [vmem:[#allocation11 + $0x7cc] ss:$16 sps:$4 sm:$0xff]  }
 0x44f   : > { %6723 = vmatpush1.bf16.msra.mxu0 %v10099_v41  ;;  %v10159_v41 = vld [vmem:[#allocation11 + $0x5c8] ss:$16 sps:$4 sm:$0xff]  }
 0x450   : > { %6764 = vmatpush1.bf16.msra.mxu1 %v10102_v45  ;;  %6724 = vmatprep.subr.bf16.mxu0 %v10107_v9  ;;  %v10162_v45 = vld [vmem:[#allocation11 + $0x7c8] ss:$16 sps:$4 sm:$0xff]   ;;  %v10167_v9 = vld [vmem:[#allocation11 + $0x5ec] ss:$16 sps:$4 sm:$0xff]  }
 0x451   : > { %6765 = vmatprep.subr.bf16.mxu1 %v10110_v10  ;;  %v6420_v16 = vpop.f32.mrb[4].mxu0  ;;  %v10170_v10 = vld [vmem:[#allocation11 + $0x7ec] ss:$16 sps:$4 sm:$0xff]  }
 0x452   : > { %v6461_v17 = vpop.f32.mrb[4].mxu1  ;;  %v6421_v23 = vadd.f32 %v6420_v16, %v11711_v54  ;;  %v6422_v24 = vpop.f32.mrb[5].mxu0  ;;  %v10117_v54 = vld [vmem:[#allocation11 + $0x4e8] ss:$16 sps:$4 sm:$0xff]  }
 0x453   : > { %v6463_v46 = vpop.f32.mrb[5].mxu1  ;;  %v6423_v48 = vadd.f32 %v6422_v24, %v11713_v61  ;;  %v6424_v25 = vpop.f32.mrb[6].mxu0  ;;  %6725 = vmatpush1.bf16.msra.mxu0 %v10105_v20  ;;  %v10125_v61 = vld [vmem:[#allocation11 + $0x50c] ss:$16 sps:$4 sm:$0xff]   ;;  %v10165_v20 = vld [vmem:[#allocation11 + $0x5e8] ss:$16 sps:$4 sm:$0xff]  }
 0x454   : > { %v6465_v26 = vpop.f32.mrb[6].mxu1  ;;  %6766 = vmatpush1.bf16.msra.mxu1 %v10108_v11  ;;  %v11721_v27 = vadd.f32 %v6461_v17, %v6421_v23  ;;  %v6425_v29 = vpop.f32.mrb[7].mxu0  ;;  %6726 = vmatprep.subr.bf16.mxu0 %v10113_v12  ;;  %v10168_v11 = vld [vmem:[#allocation11 + $0x7e8] ss:$16 sps:$4 sm:$0xff]   ;;  %v10173_v12 = vld [vmem:[#allocation11 + $0x80c] ss:$16 sps:$4 sm:$0xff]  }
 0x455   : > { %v6466_v30 = vpop.f32.mrb[7].mxu1  ;;  %6767 = vmatprep.subr.bf16.mxu1 %v10116_v13  ;;  %v11723_v35 = vadd.f32 %v6463_v46, %v6423_v48  ;;  %v10176_v13 = vld [vmem:[#allocation11 + $0xa0c] ss:$16 sps:$4 sm:$0xff]   ;;  %v10171_v16 = vld [vmem:[#allocation11 + $0x808] ss:$16 sps:$4 sm:$0xff]  }
 0x456   : > { %v10174_v17 = vld [vmem:[#allocation11 + $0xa08] ss:$16 sps:$4 sm:$0xff]   ;;  %v10185_v46 = vld [vmem:[#allocation11 + $0x84c] ss:$16 sps:$4 sm:$0xff]  }
 0x457   : > { %6727 = vmatpush1.bf16.msra.mxu0 %v10111_v18  ;;  %v10179_v18 = vld [vmem:[#allocation11 + $0x82c] ss:$16 sps:$4 sm:$0xff]   ;;  %v10177_v23 = vld [vmem:[#allocation11 + $0x828] ss:$16 sps:$4 sm:$0xff]  }
 0x458   : > { %6768 = vmatpush1.bf16.msra.mxu1 %v10114_v19  ;;  %6728 = vmatprep.subr.bf16.mxu0 %v10119_v31  ;;  %v10182_v19 = vld [vmem:[#allocation11 + $0xa2c] ss:$16 sps:$4 sm:$0xff]   ;;  %v10180_v24 = vld [vmem:[#allocation11 + $0xa28] ss:$16 sps:$4 sm:$0xff]  }
 0x459   : > { %6769 = vmatprep.subr.bf16.mxu1 %v10122_v33  ;;  %v10188_v48 = vld [vmem:[#allocation11 + $0xa4c] ss:$16 sps:$4 sm:$0xff]   ;;  %v10183_v25 = vld [vmem:[#allocation11 + $0x848] ss:$16 sps:$4 sm:$0xff]  }
 0x45a   : > { %v10186_v26 = vld [vmem:[#allocation11 + $0xa48] ss:$16 sps:$4 sm:$0xff]   ;;  %v10197_v31 = vld [vmem:[#allocation11 + $0x88c] ss:$16 sps:$4 sm:$0xff]  }
 0x45b   : > { %6729 = vmatpush1.bf16.msra.mxu0 %v10117_v54  ;;  %v10189_v29 = vld [vmem:[#allocation11 + $0x868] ss:$16 sps:$4 sm:$0xff]   ;;  %v10200_v33 = vld [vmem:[#allocation11 + $0xa8c] ss:$16 sps:$4 sm:$0xff]  }
 0x45c   : > { %6770 = vmatpush1.bf16.msra.mxu1 %v10120_v51  ;;  %6730 = vmatprep.subr.bf16.mxu0 %v10125_v61  ;;  %v10192_v30 = vld [vmem:[#allocation11 + $0xa68] ss:$16 sps:$4 sm:$0xff]   ;;  %v10203_v54 = vld [vmem:[#allocation11 + $0x8ac] ss:$16 sps:$4 sm:$0xff]  }
 0x45d   : > { %6771 = vmatprep.subr.bf16.mxu1 %v10128_v56  ;;  %v10206_v51 = vld [vmem:[#allocation11 + $0xaac] ss:$16 sps:$4 sm:$0xff]   ;;  %v10201_v61 = vld [vmem:[#allocation11 + $0x8a8] ss:$16 sps:$4 sm:$0xff]  }
 0x45e   : > { %v10204_v56 = vld [vmem:[#allocation11 + $0xaa8] ss:$16 sps:$4 sm:$0xff]  }
 0x45f   : > { %6731 = vmatpush1.bf16.msra.mxu0 %v10123_v36  ;;  %v10209_v36 = vld [vmem:[#allocation11 + $0x8cc] ss:$16 sps:$4 sm:$0xff]  }
 0x460   : > { %6772 = vmatpush1.bf16.msra.mxu1 %v10126_v38  ;;  %6732 = vmatprep.subr.bf16.mxu0 %v10131_v39  ;;  %v10212_v38 = vld [vmem:[#allocation11 + $0xacc] ss:$16 sps:$4 sm:$0xff]  }
 0x461   : > { %6773 = vmatprep.subr.bf16.mxu1 %v10134_v42 }
 0x463   : > { %6733 = vmatpush1.bf16.msra.mxu0 %v10129_v43  ;;  %v10207_v43 = vld [vmem:[#allocation11 + $0x8c8] ss:$16 sps:$4 sm:$0xff]  }
 0x464   : > { %6774 = vmatpush1.bf16.msra.mxu1 %v10132_v44  ;;  %6734 = vmatprep.subr.bf16.mxu0 %v10137_v49  ;;  %v10210_v44 = vld [vmem:[#allocation11 + $0xac8] ss:$16 sps:$4 sm:$0xff]  }
 0x465   : > { %6775 = vmatprep.subr.bf16.mxu1 %v10140_v50 }
 0x467   : > { %6735 = vmatpush1.bf16.msra.mxu0 %v10135_v52 }
 0x468   : > { %6776 = vmatpush1.bf16.msra.mxu1 %v10138_v53  ;;  %6736 = vmatprep.subr.bf16.mxu0 %v10143_v55 }
 0x469   : > { %6777 = vmatprep.subr.bf16.mxu1 %v10146_v60 }
 0x46b   : > { %6737 = vmatpush1.bf16.msra.mxu0 %v10141_v62 }
 0x46c   : > { %6778 = vmatpush1.bf16.msra.mxu1 %v10144_v63  ;;  %6738 = vmatprep.subr.bf16.mxu0 %v10149_v28 }
 0x46d   : > { %6779 = vmatprep.subr.bf16.mxu1 %v10152_v1  ;;  %v10215_v1 = vld [vmem:[#allocation11 + $0x8ec] ss:$16 sps:$4 sm:$0xff]  }
 0x46f   : > { %6739 = vmatpush1.bf16.msra.mxu0 %v10147_v32  ;;  %v10218_v32 = vld [vmem:[#allocation11 + $0xaec] ss:$16 sps:$4 sm:$0xff]  }
 0x470   : > { %6780 = vmatpush1.bf16.msra.mxu1 %v10150_v2  ;;  %6740 = vmatprep.subr.bf16.mxu0 %v10155_v5  ;;  %v10216_v5 = vld [vmem:[#allocation11 + $0xae8] ss:$16 sps:$4 sm:$0xff]  }
 0x471   : > { %6781 = vmatprep.subr.bf16.mxu1 %v10158_v6  ;;  %v10224_v6 = vld [vmem:[#allocation11 + $0xb0c] ss:$16 sps:$4 sm:$0xff]  }
 0x473   : > { %6741 = vmatpush1.bf16.msra.mxu0 %v10153_v3  ;;  %v10219_v3 = vld [vmem:[#allocation11 + $0x908] ss:$16 sps:$4 sm:$0xff]  }
 0x474   : > { %6782 = vmatpush1.bf16.msra.mxu1 %v10156_v4  ;;  %6742 = vmatprep.subr.bf16.mxu0 %v10161_v7  ;;  %v10222_v4 = vld [vmem:[#allocation11 + $0xb08] ss:$16 sps:$4 sm:$0xff]   ;;  %v10227_v7 = vld [vmem:[#allocation11 + $0x92c] ss:$16 sps:$4 sm:$0xff]  }
 0x475   : > { %6783 = vmatprep.subr.bf16.mxu1 %v10164_v8  ;;  %v10230_v8 = vld [vmem:[#allocation11 + $0xb2c] ss:$16 sps:$4 sm:$0xff]  }
 0x477   : > { %6743 = vmatpush1.bf16.msra.mxu0 %v10159_v41  ;;  %v10225_v41 = vld [vmem:[#allocation11 + $0x928] ss:$16 sps:$4 sm:$0xff]  }
 0x478   : > { %6784 = vmatpush1.bf16.msra.mxu1 %v10162_v45  ;;  %6744 = vmatprep.subr.bf16.mxu0 %v10167_v9  ;;  %v10228_v45 = vld [vmem:[#allocation11 + $0xb28] ss:$16 sps:$4 sm:$0xff]   ;;  %v10233_v9 = vld [vmem:[#allocation11 + $0x94c] ss:$16 sps:$4 sm:$0xff]  }
 0x479   : > { %6785 = vmatprep.subr.bf16.mxu1 %v10170_v10  ;;  %v10236_v10 = vld [vmem:[#allocation11 + $0xb4c] ss:$16 sps:$4 sm:$0xff]  }
 0x47b   : > { %6745 = vmatpush1.bf16.msra.mxu0 %v10165_v20  ;;  %v10231_v20 = vld [vmem:[#allocation11 + $0x948] ss:$16 sps:$4 sm:$0xff]  }
 0x47c   : > { %6786 = vmatpush1.bf16.msra.mxu1 %v10168_v11  ;;  %6796 = vmatprep.subr.bf16.mxu0 %v10173_v12  ;;  %v10234_v11 = vld [vmem:[#allocation11 + $0xb48] ss:$16 sps:$4 sm:$0xff]   ;;  %v10239_v12 = vld [vmem:[#allocation11 + $0x96c] ss:$16 sps:$4 sm:$0xff]  }
 0x47d   : > { %6837 = vmatprep.subr.bf16.mxu1 %v10176_v13  ;;  %v10242_v13 = vld [vmem:[#allocation11 + $0xb6c] ss:$16 sps:$4 sm:$0xff]  }
 0x47e   : > { %6747 = vmatmul.mubr.bf16.vlgmr.msra.gmra.mrb[20].mxu0 %v11649_v21  ;;  %v10191_v21 = vld [vmem:[#allocation11 + $0x86c] ss:$16 sps:$4 sm:$0xff]  }
 0x47f   : > { %6788 = vmatmul.mubr.bf16.vlgmr.msra.gmra.mrb[20].mxu1 %v11653_v22  ;;  %6797 = vmatpush1.bf16.msra.mxu0 %v10171_v16  ;;  %v10194_v22 = vld [vmem:[#allocation11 + $0xa6c] ss:$16 sps:$4 sm:$0xff]   ;;  %v10237_v16 = vld [vmem:[#allocation11 + $0x968] ss:$16 sps:$4 sm:$0xff]  }
 0x480   : > { %6838 = vmatpush1.bf16.msra.mxu1 %v10174_v17  ;;  %6798 = vmatprep.subr.bf16.mxu0 %v10179_v18  ;;  %v10240_v17 = vld [vmem:[#allocation11 + $0xb68] ss:$16 sps:$4 sm:$0xff]   ;;  %v10245_v18 = vld [vmem:[#allocation11 + $0x98c] ss:$16 sps:$4 sm:$0xff]  }
 0x481   : > { %6839 = vmatprep.subr.bf16.mxu1 %v10182_v19  ;;  %6828 = vmatprep.mubr.bf16.mxu0 %v11665_v37  ;;  %v10195_v37 = vld [vmem:[#allocation11 + $0x888] ss:$16 sps:$4 sm:$0xff]   ;;  %v10248_v19 = vld [vmem:[#allocation11 + $0xb8c] ss:$16 sps:$4 sm:$0xff]  }
 0x482   : > { %6869 = vmatprep.mubr.bf16.mxu1 %v11670_v40  ;;  %v10198_v40 = vld [vmem:[#allocation11 + $0xa88] ss:$16 sps:$4 sm:$0xff]  }
 0x483   : > { %6799 = vmatpush1.bf16.msra.mxu0 %v10177_v23  ;;  %v10243_v23 = vld [vmem:[#allocation11 + $0x988] ss:$16 sps:$4 sm:$0xff]  }
 0x484   : > { %6840 = vmatpush1.bf16.msra.mxu1 %v10180_v24  ;;  %6800 = vmatprep.subr.bf16.mxu0 %v10185_v46  ;;  %v10246_v24 = vld [vmem:[#allocation11 + $0xb88] ss:$16 sps:$4 sm:$0xff]   ;;  %v10251_v46 = vld [vmem:[#allocation11 + $0x9ac] ss:$16 sps:$4 sm:$0xff]  }
 0x485   : > { %6841 = vmatprep.subr.bf16.mxu1 %v10188_v48  ;;  %v10254_v48 = vld [vmem:[#allocation11 + $0xbac] ss:$16 sps:$4 sm:$0xff]  }
 0x487   : > { %6801 = vmatpush1.bf16.msra.mxu0 %v10183_v25  ;;  %v10249_v25 = vld [vmem:[#allocation11 + $0x9a8] ss:$16 sps:$4 sm:$0xff]  }
 0x488   : > { %6842 = vmatpush1.bf16.msra.mxu1 %v10186_v26  ;;  %6802 = vmatprep.subr.bf16.mxu0 %v10191_v21  ;;  %v10252_v26 = vld [vmem:[#allocation11 + $0xba8] ss:$16 sps:$4 sm:$0xff]   ;;  %v10257_v21 = vld [vmem:[#allocation11 + $0x9cc] ss:$16 sps:$4 sm:$0xff]  }
 0x489   : > { %6843 = vmatprep.subr.bf16.mxu1 %v10194_v22  ;;  %v10260_v22 = vld [vmem:[#allocation11 + $0xbcc] ss:$16 sps:$4 sm:$0xff]  }
 0x48b   : > { %6803 = vmatpush1.bf16.msra.mxu0 %v10189_v29  ;;  %v10255_v29 = vld [vmem:[#allocation11 + $0x9c8] ss:$16 sps:$4 sm:$0xff]  }
 0x48c   : > { %6844 = vmatpush1.bf16.msra.mxu1 %v10192_v30  ;;  %6804 = vmatprep.subr.bf16.mxu0 %v10197_v31  ;;  %v10258_v30 = vld [vmem:[#allocation11 + $0xbc8] ss:$16 sps:$4 sm:$0xff]   ;;  %v10263_v31 = vld [vmem:[#allocation11 + $0x9ec] ss:$16 sps:$4 sm:$0xff]  }
 0x48d   : > { %6845 = vmatprep.subr.bf16.mxu1 %v10200_v33  ;;  %v10266_v33 = vld [vmem:[#allocation11 + $0xbec] ss:$16 sps:$4 sm:$0xff]  }
 0x48f   : > { %6805 = vmatpush1.bf16.msra.mxu0 %v10195_v37  ;;  %v10261_v37 = vld [vmem:[#allocation11 + $0x9e8] ss:$16 sps:$4 sm:$0xff]  }
 0x490   : > { %6846 = vmatpush1.bf16.msra.mxu1 %v10198_v40  ;;  %6806 = vmatprep.subr.bf16.mxu0 %v10203_v54  ;;  %v10264_v40 = vld [vmem:[#allocation11 + $0xbe8] ss:$16 sps:$4 sm:$0xff]   ;;  %v10269_v54 = vld [vmem:[#allocation11 + $0xc0c] ss:$16 sps:$4 sm:$0xff]  }
 0x491   : > { %6847 = vmatprep.subr.bf16.mxu1 %v10206_v51  ;;  %v6502_v39 = vpop.f32.mrb[8].mxu0  ;;  %v10272_v51 = vld [vmem:[#allocation11 + $0xe0c] ss:$16 sps:$4 sm:$0xff]  }
 0x492   : > { %v6543_v42 = vpop.f32.mrb[8].mxu1  ;;  %v6503_v49 = vadd.f32 %v6502_v39, %v11721_v27  ;;  %v6504_v50 = vpop.f32.mrb[9].mxu0  ;;  %v10213_v27 = vld [vmem:[#allocation11 + $0x8e8] ss:$16 sps:$4 sm:$0xff]  }
 0x493   : > { %v6545_v52 = vpop.f32.mrb[9].mxu1  ;;  %v6505_v53 = vadd.f32 %v6504_v50, %v11723_v35  ;;  %v6506_v55 = vpop.f32.mrb[10].mxu0  ;;  %6807 = vmatpush1.bf16.msra.mxu0 %v10201_v61  ;;  %v10221_v35 = vld [vmem:[#allocation11 + $0x90c] ss:$16 sps:$4 sm:$0xff]   ;;  %v10267_v61 = vld [vmem:[#allocation11 + $0xc08] ss:$16 sps:$4 sm:$0xff]  }
 0x494   : > { %v6547_v60 = vpop.f32.mrb[10].mxu1  ;;  %6848 = vmatpush1.bf16.msra.mxu1 %v10204_v56  ;;  %v11731_v62 = vadd.f32 %v6543_v42, %v6503_v49  ;;  %v6507_v63 = vpop.f32.mrb[11].mxu0  ;;  %6808 = vmatprep.subr.bf16.mxu0 %v10209_v36  ;;  %v10270_v56 = vld [vmem:[#allocation11 + $0xe08] ss:$16 sps:$4 sm:$0xff]   ;;  %v10275_v36 = vld [vmem:[#allocation11 + $0xc2c] ss:$16 sps:$4 sm:$0xff]  }
 0x495   : > { %v6548_v28 = vpop.f32.mrb[11].mxu1  ;;  %6849 = vmatprep.subr.bf16.mxu1 %v10212_v38  ;;  %v11733_v2 = vadd.f32 %v6545_v52, %v6505_v53  ;;  %v10278_v38 = vld [vmem:[#allocation11 + $0xe2c] ss:$16 sps:$4 sm:$0xff]   ;;  %v10273_v39 = vld [vmem:[#allocation11 + $0xc28] ss:$16 sps:$4 sm:$0xff]  }
 0x496   : > { %v10276_v42 = vld [vmem:[#allocation11 + $0xe28] ss:$16 sps:$4 sm:$0xff]   ;;  %v10293_v55 = vld [vmem:[#allocation11 + $0xc8c] ss:$16 sps:$4 sm:$0xff]  }
 0x497   : > { %6809 = vmatpush1.bf16.msra.mxu0 %v10207_v43  ;;  %v10281_v43 = vld [vmem:[#allocation11 + $0xc4c] ss:$16 sps:$4 sm:$0xff]   ;;  %v10279_v49 = vld [vmem:[#allocation11 + $0xc48] ss:$16 sps:$4 sm:$0xff]  }
 0x498   : > { %6850 = vmatpush1.bf16.msra.mxu1 %v10210_v44  ;;  %6810 = vmatprep.subr.bf16.mxu0 %v10215_v1  ;;  %v10284_v44 = vld [vmem:[#allocation11 + $0xe4c] ss:$16 sps:$4 sm:$0xff]   ;;  %v10282_v50 = vld [vmem:[#allocation11 + $0xe48] ss:$16 sps:$4 sm:$0xff]  }
 0x499   : > { %6851 = vmatprep.subr.bf16.mxu1 %v10218_v32  ;;  %v10285_v52 = vld [vmem:[#allocation11 + $0xc68] ss:$16 sps:$4 sm:$0xff]   ;;  %v10296_v60 = vld [vmem:[#allocation11 + $0xe8c] ss:$16 sps:$4 sm:$0xff]  }
 0x49a   : > { %v10288_v53 = vld [vmem:[#allocation11 + $0xe68] ss:$16 sps:$4 sm:$0xff]   ;;  %v10299_v63 = vld [vmem:[#allocation11 + $0xcac] ss:$16 sps:$4 sm:$0xff]  }
 0x49b   : > { %6811 = vmatpush1.bf16.msra.mxu0 %v10213_v27  ;;  %v10302_v28 = vld [vmem:[#allocation11 + $0xeac] ss:$16 sps:$4 sm:$0xff]   ;;  %v10297_v1 = vld [vmem:[#allocation11 + $0xca8] ss:$16 sps:$4 sm:$0xff]  }
 0x49c   : > { %6852 = vmatpush1.bf16.msra.mxu1 %v10216_v5  ;;  %6812 = vmatprep.subr.bf16.mxu0 %v10221_v35  ;;  %v10300_v32 = vld [vmem:[#allocation11 + $0xea8] ss:$16 sps:$4 sm:$0xff]   ;;  %v10305_v27 = vld [vmem:[#allocation11 + $0xccc] ss:$16 sps:$4 sm:$0xff]  }
 0x49d   : > { %6853 = vmatprep.subr.bf16.mxu1 %v10224_v6  ;;  %v10308_v5 = vld [vmem:[#allocation11 + $0xecc] ss:$16 sps:$4 sm:$0xff]  }
 0x49f   : > { %6813 = vmatpush1.bf16.msra.mxu0 %v10219_v3 }
 0x4a0   : > { %6854 = vmatpush1.bf16.msra.mxu1 %v10222_v4  ;;  %6814 = vmatprep.subr.bf16.mxu0 %v10227_v7 }
 0x4a1   : > { %6855 = vmatprep.subr.bf16.mxu1 %v10230_v8 }
 0x4a3   : > { %6815 = vmatpush1.bf16.msra.mxu0 %v10225_v41 }
 0x4a4   : > { %6856 = vmatpush1.bf16.msra.mxu1 %v10228_v45  ;;  %6816 = vmatprep.subr.bf16.mxu0 %v10233_v9  ;;  %v10303_v9 = vld [vmem:[#allocation11 + $0xcc8] ss:$16 sps:$4 sm:$0xff]  }
 0x4a5   : > { %6857 = vmatprep.subr.bf16.mxu1 %v10236_v10  ;;  %v10306_v10 = vld [vmem:[#allocation11 + $0xec8] ss:$16 sps:$4 sm:$0xff]  }
 0x4a7   : > { %6817 = vmatpush1.bf16.msra.mxu0 %v10231_v20 }
 0x4a8   : > { %6858 = vmatpush1.bf16.msra.mxu1 %v10234_v11  ;;  %6818 = vmatprep.subr.bf16.mxu0 %v10239_v12 }
 0x4a9   : > { %6859 = vmatprep.subr.bf16.mxu1 %v10242_v13  ;;  %v10311_v13 = vld [vmem:[#allocation11 + $0xcec] ss:$16 sps:$4 sm:$0xff]  }
 0x4ab   : > { %6819 = vmatpush1.bf16.msra.mxu0 %v10237_v16  ;;  %v10314_v16 = vld [vmem:[#allocation11 + $0xeec] ss:$16 sps:$4 sm:$0xff]  }
 0x4ac   : > { %6860 = vmatpush1.bf16.msra.mxu1 %v10240_v17  ;;  %6820 = vmatprep.subr.bf16.mxu0 %v10245_v18  ;;  %v10317_v18 = vld [vmem:[#allocation11 + $0xd0c] ss:$16 sps:$4 sm:$0xff]  }
 0x4ad   : > { %6861 = vmatprep.subr.bf16.mxu1 %v10248_v19  ;;  %v10320_v19 = vld [vmem:[#allocation11 + $0xf0c] ss:$16 sps:$4 sm:$0xff]  }
 0x4af   : > { %6821 = vmatpush1.bf16.msra.mxu0 %v10243_v23  ;;  %v10315_v23 = vld [vmem:[#allocation11 + $0xd08] ss:$16 sps:$4 sm:$0xff]  }
 0x4b0   : > { %6862 = vmatpush1.bf16.msra.mxu1 %v10246_v24  ;;  %6822 = vmatprep.subr.bf16.mxu0 %v10251_v46  ;;  %v10318_v24 = vld [vmem:[#allocation11 + $0xf08] ss:$16 sps:$4 sm:$0xff]   ;;  %v10323_v46 = vld [vmem:[#allocation11 + $0xd2c] ss:$16 sps:$4 sm:$0xff]  }
 0x4b1   : > { %6863 = vmatprep.subr.bf16.mxu1 %v10254_v48  ;;  %v10326_v48 = vld [vmem:[#allocation11 + $0xf2c] ss:$16 sps:$4 sm:$0xff]  }
 0x4b3   : > { %6823 = vmatpush1.bf16.msra.mxu0 %v10249_v25  ;;  %v10321_v25 = vld [vmem:[#allocation11 + $0xd28] ss:$16 sps:$4 sm:$0xff]  }
 0x4b4   : > { %6864 = vmatpush1.bf16.msra.mxu1 %v10252_v26  ;;  %6824 = vmatprep.subr.bf16.mxu0 %v10257_v21  ;;  %v10324_v26 = vld [vmem:[#allocation11 + $0xf28] ss:$16 sps:$4 sm:$0xff]   ;;  %v10329_v21 = vld [vmem:[#allocation11 + $0xd4c] ss:$16 sps:$4 sm:$0xff]  }
 0x4b5   : > { %6865 = vmatprep.subr.bf16.mxu1 %v10260_v22  ;;  %v10332_v22 = vld [vmem:[#allocation11 + $0xf4c] ss:$16 sps:$4 sm:$0xff]  }
 0x4b7   : > { %6825 = vmatpush1.bf16.msra.mxu0 %v10255_v29  ;;  %v10327_v29 = vld [vmem:[#allocation11 + $0xd48] ss:$16 sps:$4 sm:$0xff]  }
 0x4b8   : > { %6866 = vmatpush1.bf16.msra.mxu1 %v10258_v30  ;;  %6826 = vmatprep.subr.bf16.mxu0 %v10263_v31  ;;  %v10330_v30 = vld [vmem:[#allocation11 + $0xf48] ss:$16 sps:$4 sm:$0xff]   ;;  %v10335_v31 = vld [vmem:[#allocation11 + $0xd6c] ss:$16 sps:$4 sm:$0xff]  }
 0x4b9   : > { %6867 = vmatprep.subr.bf16.mxu1 %v10266_v33  ;;  %v10338_v33 = vld [vmem:[#allocation11 + $0xf6c] ss:$16 sps:$4 sm:$0xff]  }
 0x4bb   : > { %6827 = vmatpush1.bf16.msra.mxu0 %v10261_v37  ;;  %v10333_v37 = vld [vmem:[#allocation11 + $0xd68] ss:$16 sps:$4 sm:$0xff]  }
 0x4bc   : > { %6868 = vmatpush1.bf16.msra.mxu1 %v10264_v40  ;;  %6878 = vmatprep.subr.bf16.mxu0 %v10269_v54  ;;  %v10336_v40 = vld [vmem:[#allocation11 + $0xf68] ss:$16 sps:$4 sm:$0xff]   ;;  %v10341_v54 = vld [vmem:[#allocation11 + $0xd8c] ss:$16 sps:$4 sm:$0xff]  }
 0x4bd   : > { %6919 = vmatprep.subr.bf16.mxu1 %v10272_v51  ;;  %v10344_v51 = vld [vmem:[#allocation11 + $0xf8c] ss:$16 sps:$4 sm:$0xff]  }
 0x4be   : > { %6829 = vmatmul.mubr.bf16.vlgmr.msra.gmra.mrb[24].mxu0 %v11685_v57  ;;  %v10287_v57 = vld [vmem:[#allocation11 + $0xc6c] ss:$16 sps:$4 sm:$0xff]  }
 0x4bf   : > { %6870 = vmatmul.mubr.bf16.vlgmr.msra.gmra.mrb[24].mxu1 %v11689_v58  ;;  %6879 = vmatpush1.bf16.msra.mxu0 %v10267_v61  ;;  %v10290_v58 = vld [vmem:[#allocation11 + $0xe6c] ss:$16 sps:$4 sm:$0xff]   ;;  %v10339_v61 = vld [vmem:[#allocation11 + $0xd88] ss:$16 sps:$4 sm:$0xff]  }
 0x4c0   : > { %6920 = vmatpush1.bf16.msra.mxu1 %v10270_v56  ;;  %6880 = vmatprep.subr.bf16.mxu0 %v10275_v36  ;;  %v10342_v56 = vld [vmem:[#allocation11 + $0xf88] ss:$16 sps:$4 sm:$0xff]   ;;  %v10347_v36 = vld [vmem:[#allocation11 + $0xdac] ss:$16 sps:$4 sm:$0xff]  }
 0x4c1   : > { %6921 = vmatprep.subr.bf16.mxu1 %v10278_v38  ;;  %6910 = vmatprep.mubr.bf16.mxu0 %v11691_v0  ;;  %v10291_v0 = vld [vmem:[#allocation11 + $0xc88] ss:$16 sps:$4 sm:$0xff]   ;;  %v10350_v38 = vld [vmem:[#allocation11 + $0xfac] ss:$16 sps:$4 sm:$0xff]  }
 0x4c2   : > { %6951 = vmatprep.mubr.bf16.mxu1 %v11693_v59  ;;  %v10294_v59 = vld [vmem:[#allocation11 + $0xe88] ss:$16 sps:$4 sm:$0xff]  }
 0x4c3   : > { %6881 = vmatpush1.bf16.msra.mxu0 %v10273_v39  ;;  %v2969_v39 = vld [vmem:[#allocation2] sm:$0xff] }
 0x4c4   : > { %6922 = vmatpush1.bf16.msra.mxu1 %v10276_v42  ;;  %6882 = vmatprep.subr.bf16.mxu0 %v10281_v43  ;;  %v10345_v42 = vld [vmem:[#allocation11 + $0xda8] ss:$16 sps:$4 sm:$0xff]  }
 0x4c5   : > { %6923 = vmatprep.subr.bf16.mxu1 %v10284_v44  ;;  %v10348_v43 = vld [vmem:[#allocation11 + $0xfa8] ss:$16 sps:$4 sm:$0xff]   ;;  %v10353_v44 = vld [vmem:[#allocation11 + $0xdcc] ss:$16 sps:$4 sm:$0xff]  }
 0x4c7   : > { %6883 = vmatpush1.bf16.msra.mxu0 %v10279_v49  ;;  %v10356_v49 = vld [vmem:[#allocation11 + $0xfcc] ss:$16 sps:$4 sm:$0xff]  }
 0x4c8   : > { %6924 = vmatpush1.bf16.msra.mxu1 %v10282_v50  ;;  %6884 = vmatprep.subr.bf16.mxu0 %v10287_v57  ;;  %v2971_v50 = vcombine.high %v2969_v39, %v2969_v39  ;;  %v10351_v57 = vld [vmem:[#allocation11 + $0xdc8] ss:$16 sps:$4 sm:$0xff]  }
 0x4c9   : > { %6925 = vmatprep.subr.bf16.mxu1 %v10290_v58  ;;  %v10354_v58 = vld [vmem:[#allocation11 + $0xfc8] ss:$16 sps:$4 sm:$0xff]  }
 0x4cb   : > { %6885 = vmatpush1.bf16.msra.mxu0 %v10285_v52  ;;  %v10359_v52 = vld [vmem:[#allocation11 + $0xdec] ss:$16 sps:$4 sm:$0xff]  }
 0x4cc   : > { %6926 = vmatpush1.bf16.msra.mxu1 %v10288_v53  ;;  %6886 = vmatprep.subr.bf16.mxu0 %v10293_v55  ;;  %v10362_v53 = vld [vmem:[#allocation11 + $0xfec] ss:$16 sps:$4 sm:$0xff]   ;;  %v11746_v55 = vrot.slane %v2969_v39, %v11568_v34  ;;  %v10416_v39 = vld [vmem:[#allocation10 + $0x304] ss:$16 sps:$4 sm:$0xff]  }
 0x4cd   : > { %6927 = vmatprep.subr.bf16.mxu1 %v10296_v60  ;;  %v11749_v60 = vrot.slane %v2971_v50, %v11568_v34  ;;  %v10371_v34 = vld [vmem:[#allocation10 + $0x24] ss:$16 sps:$4 sm:$0xff]   ;;  %v10417_v50 = vld [vmem:[#allocation10 + $0x120] ss:$16 sps:$4 sm:$0xff]  }
 0x4cf   : > { %6887 = vmatpush1.bf16.msra.mxu0 %v10291_v0  ;;  %v10357_v0 = vld [vmem:[#allocation11 + $0xde8] ss:$16 sps:$4 sm:$0xff]  }
 0x4d0   : > { %6928 = vmatpush1.bf16.msra.mxu1 %v10294_v59  ;;  %6888 = vmatprep.subr.bf16.mxu0 %v10299_v63  ;;  %v10360_v59 = vld [vmem:[#allocation11 + $0xfe8] ss:$16 sps:$4 sm:$0xff]   ;;  %v10365_v63 = vld [vmem:[#allocation10 + $0x4] ss:$16 sps:$4 sm:$0xff]  }
 0x4d1   : > { %6929 = vmatprep.subr.bf16.mxu1 %v10302_v28  ;;  %v6584_v35 = vpop.f32.mrb[12].mxu0  ;;  %v10368_v28 = vld [vmem:[#allocation10 + $0x204] ss:$16 sps:$4 sm:$0xff]  }
 0x4d2   : > { %v6625_v6 = vpop.f32.mrb[12].mxu1  ;;  %v6585_v3 = vadd.f32 %v6584_v35, %v11731_v62  ;;  %v6586_v4 = vpop.f32.mrb[13].mxu0  ;;  %v10309_v62 = vld [vmem:[#allocation11 + $0xce8] ss:$16 sps:$4 sm:$0xff]   ;;  %v10374_v35 = vld [vmem:[#allocation10 + $0x224] ss:$16 sps:$4 sm:$0xff]  }
 0x4d3   : > { %v6627_v7 = vpop.f32.mrb[13].mxu1  ;;  %v6587_v8 = vadd.f32 %v6586_v4, %v11733_v2  ;;  %v6588_v41 = vpop.f32.mrb[14].mxu0  ;;  %6889 = vmatpush1.bf16.msra.mxu0 %v10297_v1  ;;  %v10312_v2 = vld [vmem:[#allocation11 + $0xee8] ss:$16 sps:$4 sm:$0xff]   ;;  %v2986_v1 = vcombine.high %v11746_v55, %v11746_v55  ;;  %v10369_v4 = vld [vmem:[#allocation10 + $0x20] ss:$16 sps:$4 sm:$0xff]  }
 0x4d4   : > { %v6629_v45 = vpop.f32.mrb[14].mxu1  ;;  %6930 = vmatpush1.bf16.msra.mxu1 %v10300_v32  ;;  %v11741_v20 = vadd.f32 %v6625_v6, %v6585_v3  ;;  %v6589_v11 = vpop.f32.mrb[15].mxu0  ;;  %6890 = vmatprep.subr.bf16.mxu0 %v10305_v27  ;;  %v2987_v32 = vcombine.high %v11749_v60, %v11749_v60  ;;  %v10363_v27 = vld [vmem:[#allocation10] ss:$16 sps:$4 sm:$0xff]   ;;  %v10380_v41 = vld [vmem:[#allocation10 + $0x244] ss:$16 sps:$4 sm:$0xff]  }
 0x4d5   : > { %v6630_v12 = vpop.f32.mrb[15].mxu1  ;;  %6931 = vmatprep.subr.bf16.mxu1 %v10308_v5  ;;  %v11743_v17 = vadd.f32 %v6627_v7, %v6587_v8  ;;  %v10366_v5 = vld [vmem:[#allocation10 + $0x200] ss:$16 sps:$4 sm:$0xff]   ;;  %v11755_v6 = vpack.c.bf16 %v2986_v1, %v2986_v1  ;;  %v10377_v8 = vld [vmem:[#allocation10 + $0x44] ss:$16 sps:$4 sm:$0xff]  }
 0x4d6   : > { %v11757_v3 = vpack.c.bf16 %v2987_v32, %v2987_v32  ;;  %v10372_v7 = vld [vmem:[#allocation10 + $0x220] ss:$16 sps:$4 sm:$0xff]   ;;  %v10389_v12 = vld [vmem:[#allocation10 + $0x84] ss:$16 sps:$4 sm:$0xff]  }
 0x4d7   : > { %6891 = vmatpush1.bf16.msra.mxu0 %v10303_v9  ;;  %v10375_v45 = vld [vmem:[#allocation10 + $0x40] ss:$16 sps:$4 sm:$0xff]   ;;  %v10437_v32 = vld [vmem:[#allocation10 + $0x184] ss:$16 sps:$4 sm:$0xff]  }
 0x4d8   : > { %6932 = vmatpush1.bf16.msra.mxu1 %v10306_v10  ;;  %6892 = vmatprep.subr.bf16.mxu0 %v10311_v13  ;;  %v10378_v9 = vld [vmem:[#allocation10 + $0x240] ss:$16 sps:$4 sm:$0xff]   ;;  %v10392_v13 = vld [vmem:[#allocation10 + $0x284] ss:$16 sps:$4 sm:$0xff]  }
 0x4d9   : > { %6933 = vmatprep.subr.bf16.mxu1 %v10314_v16  ;;  %v10381_v10 = vld [vmem:[#allocation10 + $0x60] ss:$16 sps:$4 sm:$0xff]  }
 0x4da   : > { %v10384_v11 = vld [vmem:[#allocation10 + $0x260] ss:$16 sps:$4 sm:$0xff]  }
 0x4db   : > { %6893 = vmatpush1.bf16.msra.mxu0 %v10309_v62  ;;  %v10387_v16 = vld [vmem:[#allocation10 + $0x80] ss:$16 sps:$4 sm:$0xff]  }
 0x4dc   : > { %6934 = vmatpush1.bf16.msra.mxu1 %v10312_v2  ;;  %6894 = vmatprep.subr.bf16.mxu0 %v10317_v18  ;;  %v10390_v62 = vld [vmem:[#allocation10 + $0x280] ss:$16 sps:$4 sm:$0xff]   ;;  %v10395_v2 = vld [vmem:[#allocation10 + $0xa4] ss:$16 sps:$4 sm:$0xff]  }
 0x4dd   : > { %6935 = vmatprep.subr.bf16.mxu1 %v10320_v19  ;;  %v10398_v18 = vld [vmem:[#allocation10 + $0x2a4] ss:$16 sps:$4 sm:$0xff]   ;;  %v10393_v19 = vld [vmem:[#allocation10 + $0xa0] ss:$16 sps:$4 sm:$0xff]  }
 0x4de   : > { %v10432_v1 = vld [vmem:[#allocation10 + $0x360] ss:$16 sps:$4 sm:$0xff]  }
 0x4df   : > { %6895 = vmatpush1.bf16.msra.mxu0 %v10315_v23  ;;  %v10396_v23 = vld [vmem:[#allocation10 + $0x2a0] ss:$16 sps:$4 sm:$0xff]  }
 0x4e0   : > { %6936 = vmatpush1.bf16.msra.mxu1 %v10318_v24  ;;  %6896 = vmatprep.subr.bf16.mxu0 %v10323_v46  ;;  %v10401_v24 = vld [vmem:[#allocation10 + $0xc4] ss:$16 sps:$4 sm:$0xff]  }
 0x4e1   : > { %6937 = vmatprep.subr.bf16.mxu1 %v10326_v48  ;;  %v10404_v46 = vld [vmem:[#allocation10 + $0x2c4] ss:$16 sps:$4 sm:$0xff]  }
 0x4e3   : > { %6897 = vmatpush1.bf16.msra.mxu0 %v10321_v25 }
 0x4e4   : > { %6938 = vmatpush1.bf16.msra.mxu1 %v10324_v26  ;;  %6898 = vmatprep.subr.bf16.mxu0 %v10329_v21 }
 0x4e5   : > { %6939 = vmatprep.subr.bf16.mxu1 %v10332_v22 }
 0x4e7   : > { %6899 = vmatpush1.bf16.msra.mxu0 %v10327_v29 }
 0x4e8   : > { %6940 = vmatpush1.bf16.msra.mxu1 %v10330_v30  ;;  %6900 = vmatprep.subr.bf16.mxu0 %v10335_v31 }
 0x4e9   : > { %6941 = vmatprep.subr.bf16.mxu1 %v10338_v33  ;;  %v10399_v33 = vld [vmem:[#allocation10 + $0xc0] ss:$16 sps:$4 sm:$0xff]  }
 0x4eb   : > { %6901 = vmatpush1.bf16.msra.mxu0 %v10333_v37  ;;  %v10402_v37 = vld [vmem:[#allocation10 + $0x2c0] ss:$16 sps:$4 sm:$0xff]  }
 0x4ec   : > { %6942 = vmatpush1.bf16.msra.mxu1 %v10336_v40  ;;  %6902 = vmatprep.subr.bf16.mxu0 %v10341_v54 }
 0x4ed   : > { %6943 = vmatprep.subr.bf16.mxu1 %v10344_v51  ;;  %v10407_v51 = vld [vmem:[#allocation10 + $0xe4] ss:$16 sps:$4 sm:$0xff]  }
 0x4ef   : > { %6903 = vmatpush1.bf16.msra.mxu0 %v10339_v61  ;;  %v10410_v61 = vld [vmem:[#allocation10 + $0x2e4] ss:$16 sps:$4 sm:$0xff]  }
 0x4f0   : > { %6944 = vmatpush1.bf16.msra.mxu1 %v10342_v56  ;;  %6904 = vmatprep.subr.bf16.mxu0 %v10347_v36  ;;  %v10405_v56 = vld [vmem:[#allocation10 + $0xe0] ss:$16 sps:$4 sm:$0xff]  }
 0x4f1   : > { %6945 = vmatprep.subr.bf16.mxu1 %v10350_v38  ;;  %v10408_v36 = vld [vmem:[#allocation10 + $0x2e0] ss:$16 sps:$4 sm:$0xff]   ;;  %v10413_v38 = vld [vmem:[#allocation10 + $0x104] ss:$16 sps:$4 sm:$0xff]  }
 0x4f3   : > { %6905 = vmatpush1.bf16.msra.mxu0 %v10345_v42  ;;  %v10411_v42 = vld [vmem:[#allocation10 + $0x100] ss:$16 sps:$4 sm:$0xff]  }
 0x4f4   : > { %6946 = vmatpush1.bf16.msra.mxu1 %v10348_v43  ;;  %6906 = vmatprep.subr.bf16.mxu0 %v10353_v44  ;;  %v10414_v43 = vld [vmem:[#allocation10 + $0x300] ss:$16 sps:$4 sm:$0xff]   ;;  %v10419_v44 = vld [vmem:[#allocation10 + $0x124] ss:$16 sps:$4 sm:$0xff]  }
 0x4f5   : > { %6947 = vmatprep.subr.bf16.mxu1 %v10356_v49  ;;  %v10422_v49 = vld [vmem:[#allocation10 + $0x324] ss:$16 sps:$4 sm:$0xff]  }
 0x4f7   : > { %6907 = vmatpush1.bf16.msra.mxu0 %v10351_v57  ;;  %v10420_v57 = vld [vmem:[#allocation10 + $0x320] ss:$16 sps:$4 sm:$0xff]  }
 0x4f8   : > { %6948 = vmatpush1.bf16.msra.mxu1 %v10354_v58  ;;  %6908 = vmatprep.subr.bf16.mxu0 %v10359_v52  ;;  %v10425_v58 = vld [vmem:[#allocation10 + $0x144] ss:$16 sps:$4 sm:$0xff]  }
 0x4f9   : > { %6949 = vmatprep.subr.bf16.mxu1 %v10362_v53  ;;  %v10428_v52 = vld [vmem:[#allocation10 + $0x344] ss:$16 sps:$4 sm:$0xff]   ;;  %v10423_v53 = vld [vmem:[#allocation10 + $0x140] ss:$16 sps:$4 sm:$0xff]  }
 0x4fb   : > { %6909 = vmatpush1.bf16.msra.mxu0 %v10357_v0  ;;  %v10426_v0 = vld [vmem:[#allocation10 + $0x340] ss:$16 sps:$4 sm:$0xff]  }
 0x4fc   : > { %6950 = vmatpush1.bf16.msra.mxu1 %v10360_v59  ;;  %7600 = vmatprep.subr.bf16.mxu0 %v10365_v63  ;;  %v10431_v59 = vld [vmem:[#allocation10 + $0x164] ss:$16 sps:$4 sm:$0xff]  }
 0x4fd   : > { %7641 = vmatprep.subr.bf16.mxu1 %v10368_v28  ;;  %v10434_v63 = vld [vmem:[#allocation10 + $0x364] ss:$16 sps:$4 sm:$0xff]   ;;  %v10429_v28 = vld [vmem:[#allocation10 + $0x160] ss:$16 sps:$4 sm:$0xff]  }
 0x4fe   : > { %6911 = vmatmul.mubr.bf16.vlgmr.msra.gmra.mrb[28].mxu0 %v11701_v14  ;;  %v10383_v14 = vld [vmem:[#allocation10 + $0x64] ss:$16 sps:$4 sm:$0xff]  }
 0x4ff   : > { %6952 = vmatmul.mubr.bf16.vlgmr.msra.gmra.mrb[28].mxu1 %v11705_v15  ;;  %7601 = vmatpush1.bf16.msra.mxu0 %v10363_v27  ;;  %v10386_v15 = vld [vmem:[#allocation10 + $0x264] ss:$16 sps:$4 sm:$0xff]  }
 0x500   : > { %7642 = vmatpush1.bf16.msra.mxu1 %v10366_v5  ;;  %7602 = vmatprep.subr.bf16.mxu0 %v10371_v34  ;;  %v10440_v27 = vld [vmem:[#allocation10 + $0x384] ss:$16 sps:$4 sm:$0xff]   ;;  %v10435_v5 = vld [vmem:[#allocation10 + $0x180] ss:$16 sps:$4 sm:$0xff]  }
 0x501   : > { %7643 = vmatprep.subr.bf16.mxu1 %v10374_v35  ;;  %7632 = vmatprep.mubr.bf16.mxu0 %v11755_v6  ;;  %v10438_v34 = vld [vmem:[#allocation10 + $0x380] ss:$16 sps:$4 sm:$0xff]   ;;  %v10443_v35 = vld [vmem:[#allocation10 + $0x1a4] ss:$16 sps:$4 sm:$0xff]  }
 0x502   : > { %7673 = vmatprep.mubr.bf16.mxu1 %v11757_v3 }
 0x503   : > { %7603 = vmatpush1.bf16.msra.mxu0 %v10369_v4  ;;  %v10446_v4 = vld [vmem:[#allocation10 + $0x3a4] ss:$16 sps:$4 sm:$0xff]  }
 0x504   : > { %7644 = vmatpush1.bf16.msra.mxu1 %v10372_v7  ;;  %7604 = vmatprep.subr.bf16.mxu0 %v10377_v8  ;;  %v10441_v7 = vld [vmem:[#allocation10 + $0x1a0] ss:$16 sps:$4 sm:$0xff]  }
 0x505   : > { %7645 = vmatprep.subr.bf16.mxu1 %v10380_v41  ;;  %v10444_v8 = vld [vmem:[#allocation10 + $0x3a0] ss:$16 sps:$4 sm:$0xff]   ;;  %v10449_v41 = vld [vmem:[#allocation10 + $0x1c4] ss:$16 sps:$4 sm:$0xff]  }
 0x507   : > { %7605 = vmatpush1.bf16.msra.mxu0 %v10375_v45  ;;  %v10452_v45 = vld [vmem:[#allocation10 + $0x3c4] ss:$16 sps:$4 sm:$0xff]  }
 0x508   : > { %7646 = vmatpush1.bf16.msra.mxu1 %v10378_v9  ;;  %7606 = vmatprep.subr.bf16.mxu0 %v10383_v14  ;;  %v10447_v9 = vld [vmem:[#allocation10 + $0x1c0] ss:$16 sps:$4 sm:$0xff]  }
 0x509   : > { %7647 = vmatprep.subr.bf16.mxu1 %v10386_v15  ;;  %v10450_v14 = vld [vmem:[#allocation10 + $0x3c0] ss:$16 sps:$4 sm:$0xff]   ;;  %v10455_v15 = vld [vmem:[#allocation10 + $0x1e4] ss:$16 sps:$4 sm:$0xff]  }
 0x50b   : > { %7607 = vmatpush1.bf16.msra.mxu0 %v10381_v10  ;;  %v10458_v10 = vld [vmem:[#allocation10 + $0x3e4] ss:$16 sps:$4 sm:$0xff]  }
 0x50c   : > { %7648 = vmatpush1.bf16.msra.mxu1 %v10384_v11  ;;  %7608 = vmatprep.subr.bf16.mxu0 %v10389_v12  ;;  %v10453_v11 = vld [vmem:[#allocation10 + $0x1e0] ss:$16 sps:$4 sm:$0xff]  }
 0x50d   : > { %7649 = vmatprep.subr.bf16.mxu1 %v10392_v13  ;;  %v10456_v12 = vld [vmem:[#allocation10 + $0x3e0] ss:$16 sps:$4 sm:$0xff]   ;;  %v10462_v13 = vld [vmem:[#allocation10 + $0xc] ss:$16 sps:$4 sm:$0xff]  }
 0x50f   : > { %7609 = vmatpush1.bf16.msra.mxu0 %v10387_v16  ;;  %v10465_v16 = vld [vmem:[#allocation10 + $0x20c] ss:$16 sps:$4 sm:$0xff]  }
 0x510   : > { %7650 = vmatpush1.bf16.msra.mxu1 %v10390_v62  ;;  %7610 = vmatprep.subr.bf16.mxu0 %v10395_v2  ;;  %v11769_v62 = vpack.c.bf16 %v11746_v55, %v11746_v55  ;;  %v11773_v2 = vpack.c.bf16 %v11749_v60, %v11749_v60  ;;  %v10466_v55 = vld [vmem:[#allocation10 + $0x28] ss:$16 sps:$4 sm:$0xff]   ;;  %v10474_v60 = vld [vmem:[#allocation10 + $0x4c] ss:$16 sps:$4 sm:$0xff]  }
 0x511   : > { %7651 = vmatprep.subr.bf16.mxu1 %v10398_v18  ;;  %v6666_v48 = vpop.f32.mrb[16].mxu0  ;;  %v10460_v18 = vld [vmem:[#allocation10 + $0x8] ss:$16 sps:$4 sm:$0xff]  }
 0x512   : > { %v6707_v25 = vpop.f32.mrb[16].mxu1  ;;  %v6668_v21 = vpop.f32.mrb[17].mxu0 }
 0x513   : > { %v11763_v26 = vadd.f32 %v6707_v25, %v6666_v48  ;;  %v6709_v22 = vpop.f32.mrb[17].mxu1  ;;  %v6670_v30 = vpop.f32.mrb[18].mxu0  ;;  %7611 = vmatpush1.bf16.msra.mxu0 %v10393_v19  ;;  %v10463_v19 = vld [vmem:[#allocation10 + $0x208] ss:$16 sps:$4 sm:$0xff]   ;;  %v10477_v48 = vld [vmem:[#allocation10 + $0x24c] ss:$16 sps:$4 sm:$0xff]  }
 0x514   : > { %v11765_v29 = vadd.f32 %v6709_v22, %v6668_v21  ;;  %v6711_v31 = vpop.f32.mrb[18].mxu1  ;;  %7652 = vmatpush1.bf16.msra.mxu1 %v10396_v23  ;;  %v6671_v40 = vpop.f32.mrb[19].mxu0  ;;  %7612 = vmatprep.subr.bf16.mxu0 %v10401_v24  ;;  %v10468_v23 = vld [vmem:[#allocation10 + $0x2c] ss:$16 sps:$4 sm:$0xff]   ;;  %v10472_v25 = vld [vmem:[#allocation10 + $0x48] ss:$16 sps:$4 sm:$0xff]  }
 0x515   : > { %v6712_v54 = vpop.f32.mrb[19].mxu1  ;;  %7653 = vmatprep.subr.bf16.mxu1 %v10404_v46  ;;  %v10471_v24 = vld [vmem:[#allocation10 + $0x22c] ss:$16 sps:$4 sm:$0xff]   ;;  %v10469_v46 = vld [vmem:[#allocation10 + $0x228] ss:$16 sps:$4 sm:$0xff]  }
 0x516   : > { %v10475_v21 = vld [vmem:[#allocation10 + $0x248] ss:$16 sps:$4 sm:$0xff]   ;;  %v10480_v22 = vld [vmem:[#allocation10 + $0x6c] ss:$16 sps:$4 sm:$0xff]  }
 0x517   : > { %7613 = vmatpush1.bf16.msra.mxu0 %v10399_v33  ;;  %v10483_v30 = vld [vmem:[#allocation10 + $0x26c] ss:$16 sps:$4 sm:$0xff]   ;;  %v10478_v31 = vld [vmem:[#allocation10 + $0x68] ss:$16 sps:$4 sm:$0xff]  }
 0x518   : > { %7654 = vmatpush1.bf16.msra.mxu1 %v10402_v37  ;;  %7614 = vmatprep.subr.bf16.mxu0 %v10407_v51  ;;  %v10481_v33 = vld [vmem:[#allocation10 + $0x268] ss:$16 sps:$4 sm:$0xff]   ;;  %v10486_v37 = vld [vmem:[#allocation10 + $0x8c] ss:$16 sps:$4 sm:$0xff]  }
 0x519   : > { %7655 = vmatprep.subr.bf16.mxu1 %v10410_v61  ;;  %v10489_v40 = vld [vmem:[#allocation10 + $0x28c] ss:$16 sps:$4 sm:$0xff]   ;;  %v10490_v61 = vld [vmem:[#allocation10 + $0xa8] ss:$16 sps:$4 sm:$0xff]  }
 0x51a   : > { %v10492_v54 = vld [vmem:[#allocation10 + $0xac] ss:$16 sps:$4 sm:$0xff]  }
 0x51b   : > { %7615 = vmatpush1.bf16.msra.mxu0 %v10405_v56  ;;  %v10495_v51 = vld [vmem:[#allocation10 + $0x2ac] ss:$16 sps:$4 sm:$0xff]   ;;  %v10493_v56 = vld [vmem:[#allocation10 + $0x2a8] ss:$16 sps:$4 sm:$0xff]  }
 0x51c   : > { %7656 = vmatpush1.bf16.msra.mxu1 %v10408_v36  ;;  %7616 = vmatprep.subr.bf16.mxu0 %v10413_v38  ;;  %v10498_v36 = vld [vmem:[#allocation10 + $0xcc] ss:$16 sps:$4 sm:$0xff]  }
 0x51d   : > { %7657 = vmatprep.subr.bf16.mxu1 %v10416_v39  ;;  %v10501_v38 = vld [vmem:[#allocation10 + $0x2cc] ss:$16 sps:$4 sm:$0xff]  }
 0x51f   : > { %7617 = vmatpush1.bf16.msra.mxu0 %v10411_v42 }
 0x520   : > { %7658 = vmatpush1.bf16.msra.mxu1 %v10414_v43  ;;  %7618 = vmatprep.subr.bf16.mxu0 %v10419_v44 }
 0x521   : > { %7659 = vmatprep.subr.bf16.mxu1 %v10422_v49 }
 0x523   : > { %7619 = vmatpush1.bf16.msra.mxu0 %v10417_v50 }
 0x524   : > { %7660 = vmatpush1.bf16.msra.mxu1 %v10420_v57  ;;  %7620 = vmatprep.subr.bf16.mxu0 %v10425_v58 }
 0x525   : > { %7661 = vmatprep.subr.bf16.mxu1 %v10428_v52  ;;  %v10496_v52 = vld [vmem:[#allocation10 + $0xc8] ss:$16 sps:$4 sm:$0xff]  }
 0x527   : > { %7621 = vmatpush1.bf16.msra.mxu0 %v10423_v53  ;;  %v10499_v53 = vld [vmem:[#allocation10 + $0x2c8] ss:$16 sps:$4 sm:$0xff]  }
 0x528   : > { %7662 = vmatpush1.bf16.msra.mxu1 %v10426_v0  ;;  %7622 = vmatprep.subr.bf16.mxu0 %v10431_v59 }
 0x529   : > { %7663 = vmatprep.subr.bf16.mxu1 %v10434_v63 }
 0x52b   : > { %7623 = vmatpush1.bf16.msra.mxu0 %v10429_v28  ;;  %v10504_v28 = vld [vmem:[#allocation10 + $0xec] ss:$16 sps:$4 sm:$0xff]  }
 0x52c   : > { %7664 = vmatpush1.bf16.msra.mxu1 %v10432_v1  ;;  %7624 = vmatprep.subr.bf16.mxu0 %v10437_v32  ;;  %v10507_v1 = vld [vmem:[#allocation10 + $0x2ec] ss:$16 sps:$4 sm:$0xff]  }
 0x52d   : > { %7665 = vmatprep.subr.bf16.mxu1 %v10440_v27  ;;  %v10510_v27 = vld [vmem:[#allocation10 + $0x10c] ss:$16 sps:$4 sm:$0xff]  }
 0x52f   : > { %7625 = vmatpush1.bf16.msra.mxu0 %v10435_v5  ;;  %v10513_v5 = vld [vmem:[#allocation10 + $0x30c] ss:$16 sps:$4 sm:$0xff]  }
 0x530   : > { %7666 = vmatpush1.bf16.msra.mxu1 %v10438_v34  ;;  %7626 = vmatprep.subr.bf16.mxu0 %v10443_v35  ;;  %v10508_v34 = vld [vmem:[#allocation10 + $0x108] ss:$16 sps:$4 sm:$0xff]  }
 0x531   : > { %7667 = vmatprep.subr.bf16.mxu1 %v10446_v4  ;;  %v10511_v35 = vld [vmem:[#allocation10 + $0x308] ss:$16 sps:$4 sm:$0xff]   ;;  %v10516_v4 = vld [vmem:[#allocation10 + $0x12c] ss:$16 sps:$4 sm:$0xff]  }
 0x533   : > { %7627 = vmatpush1.bf16.msra.mxu0 %v10441_v7  ;;  %v10519_v7 = vld [vmem:[#allocation10 + $0x32c] ss:$16 sps:$4 sm:$0xff]  }
 0x534   : > { %7668 = vmatpush1.bf16.msra.mxu1 %v10444_v8  ;;  %7628 = vmatprep.subr.bf16.mxu0 %v10449_v41  ;;  %v10514_v8 = vld [vmem:[#allocation10 + $0x128] ss:$16 sps:$4 sm:$0xff]  }
 0x535   : > { %7669 = vmatprep.subr.bf16.mxu1 %v10452_v45  ;;  %v10517_v41 = vld [vmem:[#allocation10 + $0x328] ss:$16 sps:$4 sm:$0xff]   ;;  %v10522_v45 = vld [vmem:[#allocation10 + $0x14c] ss:$16 sps:$4 sm:$0xff]  }
 0x537   : > { %7629 = vmatpush1.bf16.msra.mxu0 %v10447_v9  ;;  %v10525_v9 = vld [vmem:[#allocation10 + $0x34c] ss:$16 sps:$4 sm:$0xff]  }
 0x538   : > { %7670 = vmatpush1.bf16.msra.mxu1 %v10450_v14  ;;  %7630 = vmatprep.subr.bf16.mxu0 %v10455_v15  ;;  %v10520_v14 = vld [vmem:[#allocation10 + $0x148] ss:$16 sps:$4 sm:$0xff]  }
 0x539   : > { %7671 = vmatprep.subr.bf16.mxu1 %v10458_v10  ;;  %v10523_v15 = vld [vmem:[#allocation10 + $0x348] ss:$16 sps:$4 sm:$0xff]   ;;  %v10528_v10 = vld [vmem:[#allocation10 + $0x16c] ss:$16 sps:$4 sm:$0xff]  }
 0x53b   : > { %7631 = vmatpush1.bf16.msra.mxu0 %v10453_v11  ;;  %v10531_v11 = vld [vmem:[#allocation10 + $0x36c] ss:$16 sps:$4 sm:$0xff]  }
 0x53c   : > { %7672 = vmatpush1.bf16.msra.mxu1 %v10456_v12  ;;  %7682 = vmatprep.subr.bf16.mxu0 %v10462_v13  ;;  %v10526_v12 = vld [vmem:[#allocation10 + $0x168] ss:$16 sps:$4 sm:$0xff]  }
 0x53d   : > { %7723 = vmatprep.subr.bf16.mxu1 %v10465_v16  ;;  %v10529_v13 = vld [vmem:[#allocation10 + $0x368] ss:$16 sps:$4 sm:$0xff]   ;;  %v10534_v16 = vld [vmem:[#allocation10 + $0x18c] ss:$16 sps:$4 sm:$0xff]  }
 0x53e   : > { %7633 = vmatmul.mubr.bf16.vlgmr.msra.gmra.mrb[32].mxu0 %v11769_v62 }
 0x53f   : > { %7674 = vmatmul.mubr.bf16.vlgmr.msra.gmra.mrb[32].mxu1 %v11773_v2  ;;  %7683 = vmatpush1.bf16.msra.mxu0 %v10460_v18  ;;  %v10537_v18 = vld [vmem:[#allocation10 + $0x38c] ss:$16 sps:$4 sm:$0xff]  }
 0x540   : > { %7724 = vmatpush1.bf16.msra.mxu1 %v10463_v19  ;;  %7684 = vmatprep.subr.bf16.mxu0 %v10468_v23  ;;  %v10532_v19 = vld [vmem:[#allocation10 + $0x188] ss:$16 sps:$4 sm:$0xff]  }
 0x541   : > { %7725 = vmatprep.subr.bf16.mxu1 %v10471_v24  ;;  %7714 = vmatprep.mubr.bf16.mxu0 %v11755_v6  ;;  %v10484_v6 = vld [vmem:[#allocation10 + $0x88] ss:$16 sps:$4 sm:$0xff]   ;;  %v10540_v24 = vld [vmem:[#allocation10 + $0x1ac] ss:$16 sps:$4 sm:$0xff]  }
 0x542   : > { %7755 = vmatprep.mubr.bf16.mxu1 %v11757_v3  ;;  %v10487_v3 = vld [vmem:[#allocation10 + $0x288] ss:$16 sps:$4 sm:$0xff]  }
 0x543   : > { %7685 = vmatpush1.bf16.msra.mxu0 %v10466_v55  ;;  %v10535_v23 = vld [vmem:[#allocation10 + $0x388] ss:$16 sps:$4 sm:$0xff]   ;;  %v10543_v55 = vld [vmem:[#allocation10 + $0x3ac] ss:$16 sps:$4 sm:$0xff]  }
 0x544   : > { %7726 = vmatpush1.bf16.msra.mxu1 %v10469_v46  ;;  %7686 = vmatprep.subr.bf16.mxu0 %v10474_v60  ;;  %v10538_v46 = vld [vmem:[#allocation10 + $0x1a8] ss:$16 sps:$4 sm:$0xff]  }
 0x545   : > { %7727 = vmatprep.subr.bf16.mxu1 %v10477_v48  ;;  %v10541_v60 = vld [vmem:[#allocation10 + $0x3a8] ss:$16 sps:$4 sm:$0xff]   ;;  %v10546_v48 = vld [vmem:[#allocation10 + $0x1cc] ss:$16 sps:$4 sm:$0xff]  }
 0x547   : > { %7687 = vmatpush1.bf16.msra.mxu0 %v10472_v25  ;;  %v10549_v25 = vld [vmem:[#allocation10 + $0x3cc] ss:$16 sps:$4 sm:$0xff]  }
 0x548   : > { %7728 = vmatpush1.bf16.msra.mxu1 %v10475_v21  ;;  %7688 = vmatprep.subr.bf16.mxu0 %v10480_v22  ;;  %v10544_v21 = vld [vmem:[#allocation10 + $0x1c8] ss:$16 sps:$4 sm:$0xff]  }
 0x549   : > { %7729 = vmatprep.subr.bf16.mxu1 %v10483_v30  ;;  %v10547_v22 = vld [vmem:[#allocation10 + $0x3c8] ss:$16 sps:$4 sm:$0xff]   ;;  %v10552_v30 = vld [vmem:[#allocation10 + $0x1ec] ss:$16 sps:$4 sm:$0xff]  }
 0x54b   : > { %7689 = vmatpush1.bf16.msra.mxu0 %v10478_v31  ;;  %v10555_v31 = vld [vmem:[#allocation10 + $0x3ec] ss:$16 sps:$4 sm:$0xff]  }
 0x54c   : > { %7730 = vmatpush1.bf16.msra.mxu1 %v10481_v33  ;;  %7690 = vmatprep.subr.bf16.mxu0 %v10486_v37  ;;  %v10550_v33 = vld [vmem:[#allocation10 + $0x1e8] ss:$16 sps:$4 sm:$0xff]  }
 0x54d   : > { %7731 = vmatprep.subr.bf16.mxu1 %v10489_v40  ;;  %v10553_v37 = vld [vmem:[#allocation10 + $0x3e8] ss:$16 sps:$4 sm:$0xff]  }
 0x54e   : > { %v10556_v40 = vld [vmem:[#allocation14 + $0x40] sm:$0xff]  }
 0x54f   : > { %7691 = vmatpush1.bf16.msra.mxu0 %v10484_v6  ;;  %v10557_v6 = vld [vmem:[#allocation14] sm:$0xff]  }
 0x550   : > { %7732 = vmatpush1.bf16.msra.mxu1 %v10487_v3  ;;  %7692 = vmatprep.subr.bf16.mxu0 %v10492_v54  ;;  %v10558_v3 = vld [vmem:[#allocation14 + $0x48] sm:$0xff]  }
 0x551   : > { %7733 = vmatprep.subr.bf16.mxu1 %v10495_v51  ;;  %v6748_v39 = vpop.f32.mrb[20].mxu0  ;;  %v10559_v54 = vld [vmem:[#allocation14 + $0x8] sm:$0xff]   ;;  %v10560_v51 = vld [vmem:[#allocation14 + $0x50] sm:$0xff]  }
 0x552   : > { %v6789_v42 = vpop.f32.mrb[20].mxu1  ;;  %v6749_v43 = vadd.f32 %v6748_v39, %v11763_v26  ;;  %v6750_v44 = vpop.f32.mrb[21].mxu0  ;;  %v10502_v26 = vld [vmem:[#allocation10 + $0xe8] ss:$16 sps:$4 sm:$0xff]  }
 0x553   : > { %v6791_v49 = vpop.f32.mrb[21].mxu1  ;;  %v6751_v50 = vadd.f32 %v6750_v44, %v11765_v29  ;;  %v6752_v57 = vpop.f32.mrb[22].mxu0  ;;  %7693 = vmatpush1.bf16.msra.mxu0 %v10490_v61  ;;  %v10505_v29 = vld [vmem:[#allocation10 + $0x2e8] ss:$16 sps:$4 sm:$0xff]  }
 0x554   : > { %v6793_v58 = vpop.f32.mrb[22].mxu1  ;;  %7734 = vmatpush1.bf16.msra.mxu1 %v10493_v56  ;;  %v11781_v0 = vadd.f32 %v6789_v42, %v6749_v43  ;;  %v6753_v59 = vpop.f32.mrb[23].mxu0  ;;  %7694 = vmatprep.subr.bf16.mxu0 %v10498_v36  ;;  %v10561_v61 = vld [vmem:[#allocation14 + $0x10] sm:$0xff]   ;;  %v10562_v56 = vld [vmem:[#allocation14 + $0x58] sm:$0xff]   ;;  %v10565_v39 = vld [vmem:[#allocation14 + $0x20] sm:$0xff]  }
 0x555   : > { %v6794_v63 = vpop.f32.mrb[23].mxu1  ;;  %7735 = vmatprep.subr.bf16.mxu1 %v10501_v38  ;;  %v11783_v32 = vadd.f32 %v6791_v49, %v6751_v50  ;;  %v10563_v36 = vld [vmem:[#allocation14 + $0x18] sm:$0xff]   ;;  %v10564_v38 = vld [vmem:[#allocation14 + $0x60] sm:$0xff]   ;;  %v10566_v42 = vld [vmem:[#allocation14 + $0x68] sm:$0xff]  }
 0x556   : > { %v10568_v57 = vld [vmem:[#allocation14 + $0x70] sm:$0xff]  }
 0x557   : > { %7695 = vmatpush1.bf16.msra.mxu0 %v10496_v52  ;;  %v10569_v59 = vld [vmem:[#allocation14 + $0x30] sm:$0xff]  }
 0x558   : > { %7736 = vmatpush1.bf16.msra.mxu1 %v10499_v53  ;;  %7696 = vmatprep.subr.bf16.mxu0 %v10504_v28 }
 0x559   : > { %7737 = vmatprep.subr.bf16.mxu1 %v10507_v1 }
 0x55b   : > { %7697 = vmatpush1.bf16.msra.mxu0 %v10502_v26 }
 0x55c   : > { %7738 = vmatpush1.bf16.msra.mxu1 %v10505_v29  ;;  %7698 = vmatprep.subr.bf16.mxu0 %v10510_v27  ;;  %v10570_v29 = vld [vmem:[#allocation14 + $0x78] sm:$0xff]  }
 0x55d   : > { %7739 = vmatprep.subr.bf16.mxu1 %v10513_v5  ;;  %v10571_v27 = vld [vmem:[#allocation14 + $0x38] sm:$0xff]   ;;  %v10573_v5 = vld [vmem:[#allocation14 + $0x80] sm:$0xff]  }
 0x55f   : > { %7699 = vmatpush1.bf16.msra.mxu0 %v10508_v34  ;;  %v10574_v34 = vld [vmem:[#allocation14 + $0xc8] sm:$0xff]  }
 0x560   : > { %7740 = vmatpush1.bf16.msra.mxu1 %v10511_v35  ;;  %7700 = vmatprep.subr.bf16.mxu0 %v10516_v4  ;;  %v10576_v35 = vld [vmem:[#allocation14 + $0xd0] sm:$0xff]  }
 0x561   : > { %7741 = vmatprep.subr.bf16.mxu1 %v10519_v7  ;;  %v10577_v4 = vld [vmem:[#allocation14 + $0x90] sm:$0xff]   ;;  %v10578_v7 = vld [vmem:[#allocation14 + $0xd8] sm:$0xff]  }
 0x563   : > { %7701 = vmatpush1.bf16.msra.mxu0 %v10514_v8  ;;  %v10579_v8 = vld [vmem:[#allocation14 + $0x98] sm:$0xff]  }
 0x564   : > { %7742 = vmatpush1.bf16.msra.mxu1 %v10517_v41  ;;  %7702 = vmatprep.subr.bf16.mxu0 %v10522_v45  ;;  %v10580_v41 = vld [vmem:[#allocation14 + $0xe0] sm:$0xff]  }
 0x565   : > { %7743 = vmatprep.subr.bf16.mxu1 %v10525_v9  ;;  %v10581_v45 = vld [vmem:[#allocation14 + $0xa0] sm:$0xff]   ;;  %v10582_v9 = vld [vmem:[#allocation14 + $0xe8] sm:$0xff]  }
 0x567   : > { %7703 = vmatpush1.bf16.msra.mxu0 %v10520_v14  ;;  %v10583_v14 = vld [vmem:[#allocation14 + $0xa8] sm:$0xff]  }
 0x568   : > { %7744 = vmatpush1.bf16.msra.mxu1 %v10523_v15  ;;  %7704 = vmatprep.subr.bf16.mxu0 %v10528_v10 }
 0x569   : > { %7745 = vmatprep.subr.bf16.mxu1 %v10531_v11 }
 0x56b   : > { %7705 = vmatpush1.bf16.msra.mxu0 %v10526_v12 }
 0x56c   : > { %7746 = vmatpush1.bf16.msra.mxu1 %v10529_v13  ;;  %7706 = vmatprep.subr.bf16.mxu0 %v10534_v16  ;;  %v10584_v16 = vld [vmem:[#allocation14 + $0xf0] sm:$0xff]  }
 0x56d   : > { %7747 = vmatprep.subr.bf16.mxu1 %v10537_v18 }
 0x56f   : > { %7707 = vmatpush1.bf16.msra.mxu0 %v10532_v19 }
 0x570   : > { %7748 = vmatpush1.bf16.msra.mxu1 %v10535_v23  ;;  %7708 = vmatprep.subr.bf16.mxu0 %v10540_v24  ;;  %v10585_v24 = vld [vmem:[#allocation14 + $0xb0] sm:$0xff]  }
 0x571   : > { %7749 = vmatprep.subr.bf16.mxu1 %v10543_v55 }
 0x573   : > { %7709 = vmatpush1.bf16.msra.mxu0 %v10538_v46 }
 0x574   : > { %7750 = vmatpush1.bf16.msra.mxu1 %v10541_v60  ;;  %7710 = vmatprep.subr.bf16.mxu0 %v10546_v48 }
 0x575   : > { %7751 = vmatprep.subr.bf16.mxu1 %v10549_v25  ;;  %v10586_v25 = vld [vmem:[#allocation14 + $0xf8] sm:$0xff]  }
 0x577   : > { %7711 = vmatpush1.bf16.msra.mxu0 %v10544_v21  ;;  %v10587_v21 = vld [vmem:[#allocation14 + $0xb8] sm:$0xff]  }
 0x578   : > { %7752 = vmatpush1.bf16.msra.mxu1 %v10547_v22  ;;  %7712 = vmatprep.subr.bf16.mxu0 %v10552_v30  ;;  %v7768_v22 = vsub.s32 0, %v11313_v47  ;;  %v7764_v30 = vld [vmem:[#allocation13] sm:$0xf] }
 0x579   : > { %7753 = vmatprep.subr.bf16.mxu1 %v10555_v31  ;;  %v7772_v31 = vsub.s32 1, %v11313_v47 }
 0x57b   : > { %7713 = vmatpush1.bf16.msra.mxu0 %v10550_v33 }
 0x57c   : > { %7754 = vmatpush1.bf16.msra.mxu1 %v10553_v37  ;;  %9315 = vmatprep.subr.bf16.mxu0 %v10556_v40 }
 0x57e   : > { %7715 = vmatmul.mubr.bf16.vlgmr.msra.gmra.mrb[36].mxu0 %v11769_v62  ;;  %v10567_v62 = vld [vmem:[#allocation14 + $0x28] sm:$0xff]  }
 0x57f   : > { %7756 = vmatmul.mubr.bf16.vlgmr.msra.gmra.mrb[36].mxu1 %v11773_v2  ;;  %9316 = vmatpush3.bf16.msra.mxu0 %v10557_v6  ;;  %v7769_v6 = vrot.slane %v7764_v30, %v7768_v22 }
 0x580   : > { %9317 = vmatprep.subr.bf16.mxu0 %v10558_v3 }
 0x583   : > { %9318 = vmatpush3.bf16.msra.mxu0 %v10559_v54 }
 0x584   : > { %9319 = vmatprep.subr.bf16.mxu0 %v10560_v51 }
 0x587   : > { %9320 = vmatpush3.bf16.msra.mxu0 %v10561_v61  ;;  %v7773_v61 = vrot.slane %v7764_v30, %v7772_v31 }
 0x588   : > { %9321 = vmatprep.subr.bf16.mxu0 %v10562_v56 }
 0x58b   : > { %9322 = vmatpush3.bf16.msra.mxu0 %v10563_v36 }
 0x58c   : > { %9323 = vmatprep.subr.bf16.mxu0 %v10564_v38 }
 0x58f   : > { %9324 = vmatpush3.bf16.msra.mxu0 %v10565_v39 }
 0x590   : > { %9325 = vmatprep.subr.bf16.mxu0 %v10566_v42 }
 0x591   : > { %v6830_v2 = vpop.f32.mrb[24].mxu0 }
 0x592   : > { %v6871_v43 = vpop.f32.mrb[24].mxu1  ;;  %v6831_v44 = vadd.f32 %v6830_v2, %v11781_v0  ;;  %v6832_v49 = vpop.f32.mrb[25].mxu0  ;;  %v10572_v0 = vld [vmem:[#allocation14 + $0xc0] sm:$0xff]  }
 0x593   : > { %v6873_v50 = vpop.f32.mrb[25].mxu1  ;;  %v6833_v58 = vadd.f32 %v6832_v49, %v11783_v32  ;;  %v6834_v52 = vpop.f32.mrb[26].mxu0  ;;  %9326 = vmatpush3.bf16.msra.mxu0 %v10567_v62  ;;  %9337 = vmatprep.subr.bf16.mxu1 %v10572_v0  ;;  %v10575_v32 = vld [vmem:[#allocation14 + $0x88] sm:$0xff]  }
 0x594   : > { %v6875_v53 = vpop.f32.mrb[26].mxu1  ;;  %v6872_v63 = vadd.f32 %v6871_v43, %v6831_v44  ;;  %v6835_v28 = vpop.f32.mrb[27].mxu0  ;;  %9327 = vmatprep.subr.bf16.mxu0 %v10568_v57  ;;  %9338 = vmatpush3.bf16.msra.mxu1 %v10573_v5 }
 0x595   : > { %v6876_v1 = vpop.f32.mrb[27].mxu1  ;;  %v6874_v26 = vadd.f32 %v6873_v50, %v6833_v58  ;;  %9339 = vmatprep.subr.bf16.mxu1 %v10574_v34  ;;  %v7780_v50 = vsub.s32 3, %v11313_v47 }
 0x597   : > { %9328 = vmatpush3.bf16.msra.mxu0 %v10569_v59  ;;  %v7781_v28 = vrot.slane %v7764_v30, %v7780_v50 }
 0x598   : > { %9329 = vmatprep.subr.bf16.mxu0 %v10570_v29  ;;  %9340 = vmatpush3.bf16.msra.mxu1 %v10575_v32 }
 0x599   : > { %9341 = vmatprep.subr.bf16.mxu1 %v10576_v35 }
 0x59b   : > { %9330 = vmatpush3.bf16.msra.mxu0 %v10571_v27 }
 0x59c   : > { %9342 = vmatpush3.bf16.msra.mxu1 %v10577_v4 }
 0x59d   : > { %9343 = vmatprep.subr.bf16.mxu1 %v10578_v7 }
 0x5a0   : > { %9344 = vmatpush3.bf16.msra.mxu1 %v10579_v8 }
 0x5a1   : > { %9345 = vmatprep.subr.bf16.mxu1 %v10580_v41 }
 0x5a4   : > { %9346 = vmatpush3.bf16.msra.mxu1 %v10581_v45 }
 0x5a5   : > { %9347 = vmatprep.subr.bf16.mxu1 %v10582_v9  ;;  %v9273_v9 = vld [vmem:[#allocation16] ss:$0 sm:$0xff] }
 0x5a8   : > { %9348 = vmatpush3.bf16.msra.mxu1 %v10583_v14 }
 0x5a9   : > { %9349 = vmatprep.subr.bf16.mxu1 %v10584_v16 }
 0x5ac   : > { %9350 = vmatpush3.bf16.msra.mxu1 %v10585_v24 }
 0x5ad   : > { %9351 = vmatprep.subr.bf16.mxu1 %v10586_v25 }
 0x5b0   : > { %9352 = vmatpush3.bf16.msra.mxu1 %v10587_v21 }
 0x5d1   : > { %v6912_v15 = vpop.f32.mrb[28].mxu0 }
 0x5d2   : > { %v6953_v10 = vpop.f32.mrb[28].mxu1  ;;  %v6913_v11 = vadd.f32 %v6912_v15, %v6872_v63  ;;  %v6914_v12 = vpop.f32.mrb[29].mxu0 }
 0x5d3   : > { %v6955_v13 = vpop.f32.mrb[29].mxu1  ;;  %v6915_v18 = vadd.f32 %v6914_v12, %v6874_v26  ;;  %v6916_v19 = vpop.f32.mrb[30].mxu0 }
 0x5d4   : > { %v6957_v23 = vpop.f32.mrb[30].mxu1  ;;  %v6954_v55 = vadd.f32 %v6953_v10, %v6913_v11  ;;  %v6917_v46 = vpop.f32.mrb[31].mxu0 }
 0x5d5   : > { %v6958_v60 = vpop.f32.mrb[31].mxu1  ;;  %v6956_v48 = vadd.f32 %v6955_v13, %v6915_v18 }
 0x611   : > { %v7634_v33 = vpop.f32.mrb[32].mxu0 }
 0x612   : > { %v7675_v37 = vpop.f32.mrb[32].mxu1  ;;  %v7635_v40 = vadd.f32 %v7634_v33, %v11741_v20  ;;  %v7636_v3 = vpop.f32.mrb[33].mxu0  ;;  %v7776_v20 = vsub.s32 2, %v11313_v47 }
 0x613   : > { %v7677_v54 = vpop.f32.mrb[33].mxu1  ;;  %v7637_v51 = vadd.f32 %v7636_v3, %v11743_v17  ;;  %v7638_v56 = vpop.f32.mrb[34].mxu0 }
 0x614   : > { %v7679_v36 = vpop.f32.mrb[34].mxu1  ;;  %v7676_v38 = vadd.f32 %v7675_v37, %v7635_v40  ;;  %v7639_v39 = vpop.f32.mrb[35].mxu0  ;;  %v7777_v52 = vrot.slane %v7764_v30, %v7776_v20 }
 0x615   : > { %v7680_v42 = vpop.f32.mrb[35].mxu1  ;;  %v7678_v62 = vadd.f32 %v7677_v54, %v7637_v51 }
 0x616   : > { %v7786_v2 = vadd.f32 %v7769_v6, %v7676_v38 }
 0x617   : > { %v7787_v43 = vadd.f32 %v7773_v61, %v7678_v62 }
 0x618   : > { %v7790_v49 = vpack.c.bf16 %v7786_v2, %v7786_v2 }
 0x619   : > { %v7791_v44 = vpack.c.bf16 %v7787_v43, %v7787_v43 }
 0x61b   : > { %8089 = vmatprep.mubr.bf16.mxu0 %v7791_v44 }
 0x61c   : > { %8090 = vmatmul.mubr.bf16.vlgmr.msra.gmra.mrb[40].mxu0 %v7790_v49 }
 0x651   : > { %v7716_v57 = vpop.f32.mrb[36].mxu0 }
 0x652   : > { %v7757_v58 = vpop.f32.mrb[36].mxu1  ;;  %v7717_v17 = vadd.f32 %v7716_v57, %v6954_v55  ;;  %v7718_v53 = vpop.f32.mrb[37].mxu0 }
 0x653   : > { %v7759_v59 = vpop.f32.mrb[37].mxu1  ;;  %v7719_v63 = vadd.f32 %v7718_v53, %v6956_v48  ;;  %v7720_v1 = vpop.f32.mrb[38].mxu0 }
 0x654   : > { %v7761_v26 = vpop.f32.mrb[38].mxu1  ;;  %v7758_v29 = vadd.f32 %v7757_v58, %v7717_v17  ;;  %v7721_v27 = vpop.f32.mrb[39].mxu0 }
 0x655   : > { %v7762_v0 = vpop.f32.mrb[39].mxu1  ;;  %v7760_v5 = vadd.f32 %v7759_v59, %v7719_v63 }
 0x656   : > { %v7788_v34 = vadd.f32 %v7777_v52, %v7758_v29 }
 0x657   : > { %v7789_v32 = vadd.f32 %v7781_v28, %v7760_v5 }
 0x658   : > { %v7792_v4 = vpack.c.bf16 %v7788_v34, %v7788_v34 }
 0x659   : > { %v7793_v35 = vpack.c.bf16 %v7789_v32, %v7789_v32 }
 0x65b   : > { %8129 = vmatprep.mubr.bf16.mxu1 %v7793_v35 }
 0x65c   : > { %8130 = vmatmul.mubr.bf16.vlgmr.msra.gmra.mrb[40].mxu1 %v7792_v4 }
 0x6ef   : > { %v9331_v47 = vpop.f32.mrb[40].mxu0 }
 0x6f0   : > { %v9332_v7 = vpop.f32.mrb[41].mxu0 }
 0x6f1   : > { %v9333_v8 = vadd.f32 %v9332_v7, %v9331_v47  ;;  %v9334_v41 = vpop.f32.mrb[42].mxu0 }
 0x6f2   : > { %v9335_v45 = vpop.f32.mrb[43].mxu0 }
 0x6f3   : > { %v8092_v10 = vadd.f32 %v9333_v8, %v9273_v9 }
 0x72f   : > { %v9353_v14 = vpop.f32.mrb[40].mxu1 }
 0x730   : > { %v9354_v15 = vpop.f32.mrb[41].mxu1 }
 0x731   : > { %v9355_v11 = vadd.f32 %v9354_v15, %v9353_v14  ;;  %v9356_v12 = vpop.f32.mrb[42].mxu1 }
 0x732   : > { %v9357_v13 = vpop.f32.mrb[43].mxu1 }
 0x733   : > { %v8132_v16 = vadd.f32 %v9355_v11, %v8092_v10 }
 0x735   : > { %8137 = vst [vmem:[#allocation17] sm:$0x3] %v8132_v16 }
 0x736 PF: > { %p9430_p2 = scmp.eq.s32.totalorder %s11011_s11, 2  ;;  %s10934_s4 = smov [#allocation17]  }
 0x737   : > { %s8145_s23 = sshll.u32 %s10934_s4, 4  ;;  %s8146_s23 = int_to_ptr.vmem [resolvable:$true] %s8145_s23 }
 0x738   : > { %s10816_s17 = scalar_lea.vmem %s8146_s23, 32  ;;  %p10823_p9 = scmp.lt.s32.totalorder %s8146_s23, %s8146_s23 }
 0x739   : > { %p10817_p3 = scmp.ne.s32.totalorder %s8146_s23, %s10816_s17  ;;  %p10824_p1 = scmp.lt.s32.totalorder %s10816_s17, %s10816_s17 }
 0x73b   : > { %p10818_p4 = pnand %p10817_p3, %p9430_p2  ;;  %p10825_p11 = por %p10824_p1, %p10823_p9 }
 0x73d   : > { %p10819_p8 = pneg %p10818_p4 }
 0x73f   : > { %p10826_p5 = pnand %p10825_p11, %p10819_p8 }
 0x741   : > { %10829 = shalt.err (!%p10826_p5)
}
 0x742   : > { %s11899_s13 = sld [smem:[#allocation32_spill]] }
 0x748   : > { %s10830_s24 = scalar_lea.hbm %s11899_s13, 32 }
 0x749   : > { %p10831_p12 = scmp.ne.s32.totalorder %s11899_s13, %s10830_s24  ;;  %p10836_p10 = scmp.lt.u32.totalorder %s10830_s24, %s11899_s13 }
 0x74b   : > { %p10832_p13 = pnand %p10831_p12, %p9430_p2 }
 0x74d   : > { %p10833_p7 = pneg %p10832_p13 }
 0x74f   : > { %p10838_p6 = pnand %p10836_p10, %p10833_p7 }
 0x751   : > { %10841 = shalt.err (!%p10838_p6)
}
 0x752   : > { %9388 = dma.vmem_to_hbm [thread:$0]  (%p9430_p2), %s8146_s23, 32, %s11899_s13, [#allocation6]  }
 0x753   : > { %10891 = dma.done.wait (%p9430_p2), [#allocation6], 32  }
 0x754   : > { %10893 = vsyncadd (%p9430_p2), [#allocation6], 4294967264 }
 0x755 PF: > { %s25_s10 = sadd.s32 1, %s10916_s10   ;;  %s11900_s6 = sld [smem:[#allocation27_spill]] }
 0x756   : > { %p22_p0 = scmp.ge.s32.totalorder %s25_s10, 5   ;;  %s11901_s22 = sld [smem:[#allocation26_spill]] }
 0x757   : > { %s11902_s27 = smov %s10900_s28  ;;  %s11903_s28 = smov %s10904_s29 }
 0x758   : > { %s11905_s30 = smov %s10912_s9  ;;  %24 = sbr.rel (!%p22_p0) target bundleno = 14 (0xe), region = 133 }
 0x75b   : > { %s11904_s29 = smov %s11900_s6 }
 0x75c   : > { %s11906_s9 = smov %s11901_s22 }
 0x75f   :  { %8158 = vsyncpa [#allocation5], 1 }
 0x760   :  { %8160 = vsyncpa [#allocation5 + $0x1], 1 }
 0x761   :  { %8161 = vsyncpa [#allocation8], 1 }
 0x762   :  { %8162 = vsyncpa [#allocation12], 1 }
 0x763   :  { %8163 = vsyncpa [#allocation15], 1 }
 0x764   :  { %8164 = vsyncpa [#allocation6], 1 }
 0x765   :  { %8166 = vsyncpa [#allocation6 + $0x1], 1 }

</bundles_post_ra>
